<compile_context>
chip_gen: v7x
topology: tpu7x:2x2x1
jax: 0.10.0
libtpu: 0.0.40
codegen_flags: <defaults>
</compile_context>

<pallas_src>
import functools

import jax
import jax.numpy as jnp
from jax.experimental import pallas as pl
from jax.experimental.pallas import tpu as pltpu

_VMEM_LIMIT = 48 * 1024 * 1024  # above v5e's 16MiB scoped default, headroom on v7x 64MiB


# ----------------------------------------------------------------------------
# Pallas kernels
# ----------------------------------------------------------------------------
def _gemm_kernel(a_ref, b_ref, bias_ref, *rest, relu, has_res):
    """out = maybe_relu(A @ B + bias [+ residual]); bf16 operands, fp32 accumulate."""
    if has_res:
        r_ref, o_ref = rest
    else:
        r_ref = None
        (o_ref,) = rest
    y = jnp.dot(a_ref[...], b_ref[...], preferred_element_type=jnp.float32)
    y = y + bias_ref[...]
    if has_res:
        y = y + r_ref[...].astype(jnp.float32)
    if relu:
        y = jnp.maximum(y, 0.0)
    o_ref[...] = y.astype(o_ref.dtype)


def _conv_s1_kernel(x_ref, w_ref, b_ref, *rest, kh, kw, th, wo, relu, has_res):
    """Fused kxk stride-1 conv over a resident padded image.

    x_ref: (1, Hp, Wp, Cin)   padded image for this batch element (bf16, resident)
    w_ref: (kh*kw, Cin, Cout) BN-scale-folded weights (bf16, resident)
    b_ref: (1, Cout)          folded BN bias (fp32)
    rest : [r_ref (1, th, wo, Cout)] o_ref (1, th, wo, Cout)
    """
    if has_res:
        r_ref, o_ref = rest
    else:
        r_ref = None
        (o_ref,) = rest

    row0 = pl.program_id(1) * th
    cout = o_ref.shape[-1]
    bias = b_ref[...]                                    # (1, Cout) f32

    # One dynamic slice of the padded rows needed by this tile; all tap slices below
    # are static (vreg shifts) -> the 9x im2col expansion never touches HBM.
    slab = x_ref[0, pl.ds(row0, th + kh - 1)]            # (th+kh-1, Wp, Cin) bf16

    for j in range(th):                                  # output rows of this tile
        acc = jnp.zeros((wo, cout), jnp.float32)
        for ky in range(kh):
            for kx in range(kw):
                a = slab[j + ky, kx:kx + wo, :]          # (wo, Cin) bf16
                acc += jnp.dot(a, w_ref[ky * kw + kx],
                               preferred_element_type=jnp.float32)
        y = acc + bias
        if has_res:
            y = y + r_ref[0, j].astype(jnp.float32)
        if relu:
            y = jnp.maximum(y, 0.0)
        o_ref[0, j] = y.astype(o_ref.dtype)


# ----------------------------------------------------------------------------
# Pallas wrappers
# ----------------------------------------------------------------------------
def _largest_divisor_at_most(n, cap):
    for d in range(min(n, cap), 0, -1):
        if n % d == 0:
            return d
    return 1


def gemm_bias_act(a, b, bias, *, relu, residual=None, out_dtype=jnp.bfloat16):
    """maybe_relu(a @ b + bias [+ residual]); a:[M,K] b:[K,N]; bf16 MXU / fp32 acc."""
    m, k = a.shape
    _, n = b.shape
    tm = m if m <= 512 else 512                 # 512 rows ~85% of HBM roofline; mult of 8
    grid = (pl.cdiv(m, tm),)

    a = a.astype(jnp.bfloat16)
    b = b.astype(jnp.bfloat16)
    bias2 = bias.reshape(1, n).astype(jnp.float32)

    in_specs = [
        pl.BlockSpec((tm, k), lambda i: (i, 0)),
        pl.BlockSpec((k, n), lambda i: (0, 0)),
        pl.BlockSpec((1, n), lambda i: (0, 0)),
    ]
    args = [a, b, bias2]
    if residual is not None:
        in_specs.append(pl.BlockSpec((tm, n), lambda i: (i, 0)))
        args.append(residual.astype(jnp.bfloat16))

    kernel = functools.partial(_gemm_kernel, relu=relu, has_res=residual is not None)
    flops = 2 * m * k * n
    bytes_accessed = 2 * (m * k + k * n + m * n * (2 if residual is not None else 1)) + 4 * n

    return pl.pallas_call(
        kernel,
        out_shape=jax.ShapeDtypeStruct((m, n), out_dtype),
        grid=grid,
        in_specs=in_specs,
        out_specs=pl.BlockSpec((tm, n), lambda i: (i, 0)),
        compiler_params=pltpu.CompilerParams(
            dimension_semantics=("parallel",),
            vmem_limit_bytes=_VMEM_LIMIT),
        cost_estimate=pl.CostEstimate(flops=int(flops), transcendentals=0,
                                      bytes_accessed=int(bytes_accessed)),
    )(*args)


def _conv_s1(x, wf, bias, *, pad, relu, residual):
    """Fused stride-1 kxk conv. x: NHWC bf16; wf: fp32 BN-folded [Cout, Cin, kh, kw]."""
    n, h, wdim, cin = x.shape
    cout, _, kh, kw = wf.shape
    xp = jnp.pad(x, ((0, 0), (pad, pad), (pad, pad), (0, 0))) if pad else x
    hp, wp = h + 2 * pad, wdim + 2 * pad
    ho, wo = hp - kh + 1, wp - kw + 1

    xp = xp.astype(jnp.bfloat16)
    wmat = jnp.transpose(wf, (2, 3, 1, 0)).reshape(kh * kw, cin, cout).astype(jnp.bfloat16)
    bias2 = bias.reshape(1, cout).astype(jnp.float32)

    th = _largest_divisor_at_most(ho, 8)        # rows of output per grid step
    grid = (n, ho // th)

    in_specs = [
        pl.BlockSpec((1, hp, wp, cin), lambda b, i: (b, 0, 0, 0)),      # resident image
        pl.BlockSpec((kh * kw, cin, cout), lambda b, i: (0, 0, 0)),     # resident weights
        pl.BlockSpec((1, cout), lambda b, i: (0, 0)),
    ]
    args = [xp, wmat, bias2]
    if residual is not None:
        in_specs.append(pl.BlockSpec((1, th, wo, cout), lambda b, i: (b, i, 0, 0)))
        args.append(residual.astype(jnp.bfloat16))

    kernel = functools.partial(_conv_s1_kernel, kh=kh, kw=kw, th=th, wo=wo,
                               relu=relu, has_res=residual is not None)
    flops = 2 * n * ho * wo * kh * kw * cin * cout
    bytes_accessed = 2 * (n * hp * wp * cin + kh * kw * cin * cout
                          + n * ho * wo * cout * (2 if residual is not None else 1))

    return pl.pallas_call(
        kernel,
        out_shape=jax.ShapeDtypeStruct((n, ho, wo, cout), jnp.bfloat16),
        grid=grid,
        in_specs=in_specs,
        out_specs=pl.BlockSpec((1, th, wo, cout), lambda b, i: (b, i, 0, 0)),
        compiler_params=pltpu.CompilerParams(
            dimension_semantics=("parallel", "parallel"),
            vmem_limit_bytes=_VMEM_LIMIT),
        cost_estimate=pl.CostEstimate(flops=int(flops), transcendentals=0,
                                      bytes_accessed=int(bytes_accessed)),
    )(*args)


# ----------------------------------------------------------------------------
# JAX glue: BN folding, im2col fallback, conv / deconv dispatch (NHWC)
# ----------------------------------------------------------------------------
def _fold_bn(bn):
    scale = bn["gamma"] / jnp.sqrt(bn["var"] + bn["eps"])
    bias = bn["beta"] - bn["mean"] * scale
    return scale, bias


def _im2col(x, k, stride, pad):
    # Only used for strided kxk convs (first block of a downsampling level); outputs
    # there are stride^2 smaller so the patch expansion is cheap relative to level 0.
    n, h, w, c = x.shape
    xp = jnp.pad(x, ((0, 0), (pad, pad), (pad, pad), (0, 0)))
    ho = (h + 2 * pad - k) // stride + 1
    wo = (w + 2 * pad - k) // stride + 1
    cols = []
    for ky in range(k):
        for kx in range(k):
            cols.append(xp[:, ky:ky + stride * ho:stride, kx:kx + stride * wo:stride, :])
    patches = jnp.concatenate(cols, axis=-1)
    return patches.reshape(n * ho * wo, k * k * c), (n, ho, wo)


def conv_bn(x, w, bn, *, stride, pad, relu, residual=None):
    """Conv2d(bias=False) + BN (+residual) (+ReLU). x: NHWC bf16; w: torch [Cout,Cin,k,k]."""
    cout, cin, kh, kw = w.shape
    scale, bias = _fold_bn(bn)
    wf = w.astype(jnp.float32) * scale[:, None, None, None]   # fold BN scale into weights
    n, h, wdim, _ = x.shape
    ho = (h + 2 * pad - kh) // stride + 1
    wo = (wdim + 2 * pad - kw) // stride + 1

    if kh == 1 and kw == 1:
        xs = x if stride == 1 else x[:, ::stride, ::stride, :]
        a = xs.reshape(n * ho * wo, cin)
        bmat = wf.reshape(cout, cin).T
        r = residual.reshape(n * ho * wo, cout) if residual is not None else None
        out = gemm_bias_act(a, bmat, bias, relu=relu, residual=r)
        return out.reshape(n, ho, wo, cout)

    if stride == 1:
        return _conv_s1(x, wf, bias, pad=pad, relu=relu, residual=residual)

    # strided kxk conv: im2col fallback (small outputs).
    a, _ = _im2col(x, kh, stride, pad)
    bmat = jnp.transpose(wf, (2, 3, 1, 0)).reshape(kh * kw * cin, cout)
    r = residual.reshape(n * ho * wo, cout) if residual is not None else None
    out = gemm_bias_act(a, bmat, bias, relu=relu, residual=r)
    return out.reshape(n, ho, wo, cout)


def deconv_bn_relu(x, w, bn, stride):
    """ConvTranspose2d(kernel=stride, stride=stride, bias=False) + BN + ReLU.
    x: NHWC bf16; w: torch ConvTranspose2d weight [Cin, Cout, s, s]."""
    n, h, wdim, cin = x.shape
    _, cout, s, _ = w.shape
    scale, bias = _fold_bn(bn)
    wt = jnp.transpose(w.astype(jnp.float32), (0, 2, 3, 1)) * scale[None, None, None, :]
    bmat = wt.reshape(cin, s * s * cout)                      # columns ordered (a, b, co)
    bias_t = jnp.tile(bias, s * s)

    a = x.reshape(n * h * wdim, cin)
    out = gemm_bias_act(a, bmat, bias_t, relu=True)
    out = out.reshape(n, h, wdim, s, s, cout)
    if s > 1:
        # TODO(synk): pixel-shuffle (depth-to-space) is done in XLA; could be fused into
        # the kernel's out_specs to save one HBM round trip per deblock.
        out = out.transpose(0, 1, 3, 2, 4, 5)
    return out.reshape(n, h * s, wdim * s, cout)


def basic_block(x, p, stride):
    """torchvision-style BasicBlock (expansion=1), inference mode."""
    if "wd" in p:
        identity = conv_bn(x, p["wd"], p["bnd"], stride=stride, pad=0, relu=False)
    else:
        identity = x
    out = conv_bn(x, p["w1"], p["bn1"], stride=stride, pad=1, relu=True)
    out = conv_bn(out, p["w2"], p["bn2"], stride=1, pad=1, relu=True, residual=identity)
    return out


# ----------------------------------------------------------------------------
# ResNetBEVBackbone forward
# ----------------------------------------------------------------------------
def resnet_bev_backbone_forward(params, spatial_features_nchw):
    # NCHW -> NHWC, bf16 activations throughout (fp32 accumulation inside the kernels)
    x = jnp.transpose(spatial_features_nchw, (0, 2, 3, 1)).astype(jnp.bfloat16)

    feats = []
    h = x
    for blocks, stride in zip(params["resnet"], params["layer_strides"]):
        for bi, bp in enumerate(blocks):
            h = basic_block(h, bp, stride if bi == 0 else 1)
        feats.append(h)

    num_levels = params["num_levels"]
    ups = []
    for i in range(num_levels):
        if len(params["deblocks"]) > 0:
            db = params["deblocks"][i]
            if db["kind"] == "deconv":
                ups.append(deconv_bn_relu(feats[i], db["w"], db["bn"], db["stride"]))
            else:  # upsample_stride < 1 -> strided Conv2d + BN + ReLU
                ups.append(conv_bn(feats[i], db["w"], db["bn"],
                                   stride=db["stride"], pad=0, relu=True))
        else:
            ups.append(feats[i])
    # TODO(synk): F.dropout2d path (use_dropout/dropout_enable) is stochastic; not modeled.

    out = jnp.concatenate(ups, axis=-1) if len(ups) > 1 else ups[0]

    if len(params["deblocks"]) > num_levels:
        db = params["deblocks"][-1]
        out = deconv_bn_relu(out, db["w"], db["bn"], db["stride"])

    # NHWC -> NCHW, fp32 output (PyTorch convention for spatial_features_2d)
    return jnp.transpose(out, (0, 3, 1, 2)).astype(jnp.float32)


# ----------------------------------------------------------------------------
# Deterministic parameter initialization (shapes per module __init__)
# ----------------------------------------------------------------------------
def init_params(key, model_cfg, input_channels):
    layer_nums = model_cfg["layer_nums"]
    layer_strides = model_cfg["layer_strides"]
    num_filters = model_cfg["num_filters"]
    up_strides = model_cfg.get("upsample_strides", [])
    num_up_filters = model_cfg.get("num_upsample_filter", [])
    inplanes = model_cfg.get("inplanes", 64)
    assert inplanes == input_channels

    keys = iter(jax.random.split(key, 512))

    def conv_w(cout, cin, k):
        return 0.1 * jax.random.normal(next(keys), (cout, cin, k, k), jnp.float32)

    def bn_p(c, eps):
        k1, k2, k3, k4 = jax.random.split(next(keys), 4)
        return {
            "gamma": 1.0 + 0.1 * jax.random.normal(k1, (c,), jnp.float32),
            "beta": 0.1 * jax.random.normal(k2, (c,), jnp.float32),
            "mean": 0.1 * jax.random.normal(k3, (c,), jnp.float32),
            "var": 0.5 + jax.random.uniform(k4, (c,), jnp.float32),
            "eps": eps,
        }

    resnet = []
    cur = inplanes
    for n_blocks, stride, planes in zip(layer_nums, layer_strides, num_filters):
        blocks = []
        for bi in range(n_blocks):
            s = stride if bi == 0 else 1
            bp = {
                "w1": conv_w(planes, cur, 3),
                "bn1": bn_p(planes, 1e-5),
                "w2": conv_w(planes, planes, 3),
                "bn2": bn_p(planes, 1e-5),
            }
            if s != 1 or cur != planes:
                bp["wd"] = conv_w(planes, cur, 1)
                bp["bnd"] = bn_p(planes, 1e-5)
            blocks.append(bp)
            cur = planes
        resnet.append(blocks)

    deblocks = []
    for idx in range(len(layer_nums)):
        if len(up_strides) > 0:
            s = up_strides[idx]
            cin, cout = num_filters[idx], num_up_filters[idx]
            if s >= 1:
                w = 0.1 * jax.random.normal(next(keys), (cin, cout, s, s), jnp.float32)
                deblocks.append({"kind": "deconv", "w": w,
                                 "bn": bn_p(cout, 1e-3), "stride": s})
            else:
                k = int(round(1.0 / s))
                deblocks.append({"kind": "conv", "w": conv_w(cout, cin, k),
                                 "bn": bn_p(cout, 1e-3), "stride": k})

    c_in = sum(num_up_filters)
    if len(up_strides) > len(layer_nums):
        s = up_strides[-1]
        w = 0.1 * jax.random.normal(next(keys), (c_in, c_in, s, s), jnp.float32)
        deblocks.append({"kind": "deconv", "w": w, "bn": bn_p(c_in, 1e-3), "stride": s})

    return {
        "resnet": resnet,
        "deblocks": deblocks,
        "layer_strides": list(layer_strides),
        "num_levels": len(layer_nums),
        "num_bev_features": c_in,
    }


# ----------------------------------------------------------------------------
# Demo
# ----------------------------------------------------------------------------
if __name__ == "__main__":
    model_cfg = {
        "layer_nums": [1, 1],
        "layer_strides": [1, 2],
        "num_filters": [4, 8],
        "upsample_strides": [1, 2],
        "num_upsample_filter": [8, 8],
        "inplanes": 4,
        "use_dropout": False,
    }
    input_channels = 4

    key = jax.random.PRNGKey(0)
    k_param, k_x = jax.random.split(key)
    params = init_params(k_param, model_cfg, input_channels)

    # spatial_features: NCHW, batch=2, channels=4, 16x16 BEV grid
    x = jax.random.normal(k_x, (2, input_channels, 16, 16), jnp.float32)

    out = resnet_bev_backbone_forward(params, x)
    out = jax.block_until_ready(out)

    expected = (2, params["num_bev_features"], 16, 16)
    assert out.shape == expected, (out.shape, expected)
    assert out.dtype == jnp.float32
    assert bool(jnp.all(jnp.isfinite(out)))
    print("KERNEL_OK")
</pallas_src>

<mosaic_0001>
module attributes {stable_mosaic.version = 11 : i64} {
  func.func @_conv_s1_kernel(%arg0: i32, %arg1: i32, %arg2: memref<1x18x18x4xbf16, #tpu.memory_space<vmem>>, %arg3: memref<9x4x4xbf16, #tpu.memory_space<vmem>>, %arg4: memref<1x4xf32, #tpu.memory_space<vmem>>, %arg5: memref<1x8x16x4xbf16, #tpu.memory_space<vmem>>) attributes {dimension_semantics = [#tpu.dimension_semantics<parallel>, #tpu.dimension_semantics<parallel>], iteration_bounds = array<i64: 2, 2>, scalar_prefetch = 0 : i64, scratch_operands = 0 : i64, tpu.core_type = #tpu.core_type<tc>, window_params = [{transform_indices = @transform_0, window_bounds = array<i64: 1, 18, 18, 4>}, {pipeline_mode = #tpu.pipeline_mode<synchronous>, transform_indices = @transform_1, window_bounds = array<i64: 9, 4, 4>}, {pipeline_mode = #tpu.pipeline_mode<synchronous>, transform_indices = @transform_2, window_bounds = array<i64: 1, 4>}, {transform_indices = @transform_3, window_bounds = array<i64: 1, 8, 16, 4>}]} {
    %c8_i32 = arith.constant 8 : i32
    %0 = arith.muli %arg1, %c8_i32 : i32
    %c0 = arith.constant 0 : index
    %c0_0 = arith.constant 0 : index
    %1 = vector.load %arg4[%c0, %c0_0] : memref<1x4xf32, #tpu.memory_space<vmem>>, vector<1x4xf32>
    %c0_1 = arith.constant 0 : index
    %2 = arith.index_cast %0 : i32 to index
    %c0_2 = arith.constant 0 : index
    %c0_3 = arith.constant 0 : index
    %3 = vector.load %arg2[%c0_1, %2, %c0_2, %c0_3] : memref<1x18x18x4xbf16, #tpu.memory_space<vmem>>, vector<1x10x18x4xbf16>
    %4 = vector.shape_cast %3 : vector<1x10x18x4xbf16> to vector<10x18x4xbf16>
    %cst = arith.constant 0.000000e+00 : f32
    %5 = vector.broadcast %cst : f32 to vector<16x4xf32>
    %6 = vector.extract_strided_slice %4 {offsets = [0, 0, 0], sizes = [1, 16, 4], strides = [1, 1, 1]} : vector<10x18x4xbf16> to vector<1x16x4xbf16>
    %7 = vector.shape_cast %6 : vector<1x16x4xbf16> to vector<16x4xbf16>
    %c0_4 = arith.constant 0 : index
    %c0_5 = arith.constant 0 : index
    %c0_6 = arith.constant 0 : index
    %8 = vector.load %arg3[%c0_4, %c0_5, %c0_6] : memref<9x4x4xbf16, #tpu.memory_space<vmem>>, vector<1x4x4xbf16>
    %9 = vector.shape_cast %8 : vector<1x4x4xbf16> to vector<4x4xbf16>
    %cst_7 = arith.constant dense<0.000000e+00> : vector<16x4xf32>
    %10 = tpu.matmul %7, %9, %cst_7 {dimension_numbers = #tpu.dot_dimension_numbers<[1], [0], [0], [1], [0, 0, 1, 1], [], []>} : vector<16x4xbf16>, vector<4x4xbf16>, vector<16x4xf32> -> vector<16x4xf32>
    %11 = arith.addf %5, %10 : vector<16x4xf32>
    %12 = vector.extract_strided_slice %4 {offsets = [0, 1, 0], sizes = [1, 16, 4], strides = [1, 1, 1]} : vector<10x18x4xbf16> to vector<1x16x4xbf16>
    %13 = vector.shape_cast %12 : vector<1x16x4xbf16> to vector<16x4xbf16>
    %c1 = arith.constant 1 : index
    %c0_8 = arith.constant 0 : index
    %c0_9 = arith.constant 0 : index
    %14 = vector.load %arg3[%c1, %c0_8, %c0_9] : memref<9x4x4xbf16, #tpu.memory_space<vmem>>, vector<1x4x4xbf16>
    %15 = vector.shape_cast %14 : vector<1x4x4xbf16> to vector<4x4xbf16>
    %cst_10 = arith.constant dense<0.000000e+00> : vector<16x4xf32>
    %16 = tpu.matmul %13, %15, %cst_10 {dimension_numbers = #tpu.dot_dimension_numbers<[1], [0], [0], [1], [0, 0, 1, 1], [], []>} : vector<16x4xbf16>, vector<4x4xbf16>, vector<16x4xf32> -> vector<16x4xf32>
    %17 = arith.addf %11, %16 : vector<16x4xf32>
    %18 = vector.extract_strided_slice %4 {offsets = [0, 2, 0], sizes = [1, 16, 4], strides = [1, 1, 1]} : vector<10x18x4xbf16> to vector<1x16x4xbf16>
    %19 = vector.shape_cast %18 : vector<1x16x4xbf16> to vector<16x4xbf16>
    %c2 = arith.constant 2 : index
    %c0_11 = arith.constant 0 : index
    %c0_12 = arith.constant 0 : index
    %20 = vector.load %arg3[%c2, %c0_11, %c0_12] : memref<9x4x4xbf16, #tpu.memory_space<vmem>>, vector<1x4x4xbf16>
    %21 = vector.shape_cast %20 : vector<1x4x4xbf16> to vector<4x4xbf16>
    %cst_13 = arith.constant dense<0.000000e+00> : vector<16x4xf32>
    %22 = tpu.matmul %19, %21, %cst_13 {dimension_numbers = #tpu.dot_dimension_numbers<[1], [0], [0], [1], [0, 0, 1, 1], [], []>} : vector<16x4xbf16>, vector<4x4xbf16>, vector<16x4xf32> -> vector<16x4xf32>
    %23 = arith.addf %17, %22 : vector<16x4xf32>
    %24 = vector.extract_strided_slice %4 {offsets = [1, 0, 0], sizes = [1, 16, 4], strides = [1, 1, 1]} : vector<10x18x4xbf16> to vector<1x16x4xbf16>
    %25 = vector.shape_cast %24 : vector<1x16x4xbf16> to vector<16x4xbf16>
    %c3 = arith.constant 3 : index
    %c0_14 = arith.constant 0 : index
    %c0_15 = arith.constant 0 : index
    %26 = vector.load %arg3[%c3, %c0_14, %c0_15] : memref<9x4x4xbf16, #tpu.memory_space<vmem>>, vector<1x4x4xbf16>
    %27 = vector.shape_cast %26 : vector<1x4x4xbf16> to vector<4x4xbf16>
    %cst_16 = arith.constant dense<0.000000e+00> : vector<16x4xf32>
    %28 = tpu.matmul %25, %27, %cst_16 {dimension_numbers = #tpu.dot_dimension_numbers<[1], [0], [0], [1], [0, 0, 1, 1], [], []>} : vector<16x4xbf16>, vector<4x4xbf16>, vector<16x4xf32> -> vector<16x4xf32>
    %29 = arith.addf %23, %28 : vector<16x4xf32>
    %30 = vector.extract_strided_slice %4 {offsets = [1, 1, 0], sizes = [1, 16, 4], strides = [1, 1, 1]} : vector<10x18x4xbf16> to vector<1x16x4xbf16>
    %31 = vector.shape_cast %30 : vector<1x16x4xbf16> to vector<16x4xbf16>
    %c4 = arith.constant 4 : index
    %c0_17 = arith.constant 0 : index
    %c0_18 = arith.constant 0 : index
    %32 = vector.load %arg3[%c4, %c0_17, %c0_18] : memref<9x4x4xbf16, #tpu.memory_space<vmem>>, vector<1x4x4xbf16>
    %33 = vector.shape_cast %32 : vector<1x4x4xbf16> to vector<4x4xbf16>
    %cst_19 = arith.constant dense<0.000000e+00> : vector<16x4xf32>
    %34 = tpu.matmul %31, %33, %cst_19 {dimension_numbers = #tpu.dot_dimension_numbers<[1], [0], [0], [1], [0, 0, 1, 1], [], []>} : vector<16x4xbf16>, vector<4x4xbf16>, vector<16x4xf32> -> vector<16x4xf32>
    %35 = arith.addf %29, %34 : vector<16x4xf32>
    %36 = vector.extract_strided_slice %4 {offsets = [1, 2, 0], sizes = [1, 16, 4], strides = [1, 1, 1]} : vector<10x18x4xbf16> to vector<1x16x4xbf16>
    %37 = vector.shape_cast %36 : vector<1x16x4xbf16> to vector<16x4xbf16>
    %c5 = arith.constant 5 : index
    %c0_20 = arith.constant 0 : index
    %c0_21 = arith.constant 0 : index
    %38 = vector.load %arg3[%c5, %c0_20, %c0_21] : memref<9x4x4xbf16, #tpu.memory_space<vmem>>, vector<1x4x4xbf16>
    %39 = vector.shape_cast %38 : vector<1x4x4xbf16> to vector<4x4xbf16>
    %cst_22 = arith.constant dense<0.000000e+00> : vector<16x4xf32>
    %40 = tpu.matmul %37, %39, %cst_22 {dimension_numbers = #tpu.dot_dimension_numbers<[1], [0], [0], [1], [0, 0, 1, 1], [], []>} : vector<16x4xbf16>, vector<4x4xbf16>, vector<16x4xf32> -> vector<16x4xf32>
    %41 = arith.addf %35, %40 : vector<16x4xf32>
    %42 = vector.extract_strided_slice %4 {offsets = [2, 0, 0], sizes = [1, 16, 4], strides = [1, 1, 1]} : vector<10x18x4xbf16> to vector<1x16x4xbf16>
    %43 = vector.shape_cast %42 : vector<1x16x4xbf16> to vector<16x4xbf16>
    %c6 = arith.constant 6 : index
    %c0_23 = arith.constant 0 : index
    %c0_24 = arith.constant 0 : index
    %44 = vector.load %arg3[%c6, %c0_23, %c0_24] : memref<9x4x4xbf16, #tpu.memory_space<vmem>>, vector<1x4x4xbf16>
    %45 = vector.shape_cast %44 : vector<1x4x4xbf16> to vector<4x4xbf16>
    %cst_25 = arith.constant dense<0.000000e+00> : vector<16x4xf32>
    %46 = tpu.matmul %43, %45, %cst_25 {dimension_numbers = #tpu.dot_dimension_numbers<[1], [0], [0], [1], [0, 0, 1, 1], [], []>} : vector<16x4xbf16>, vector<4x4xbf16>, vector<16x4xf32> -> vector<16x4xf32>
    %47 = arith.addf %41, %46 : vector<16x4xf32>
    %48 = vector.extract_strided_slice %4 {offsets = [2, 1, 0], sizes = [1, 16, 4], strides = [1, 1, 1]} : vector<10x18x4xbf16> to vector<1x16x4xbf16>
    %49 = vector.shape_cast %48 : vector<1x16x4xbf16> to vector<16x4xbf16>
    %c7 = arith.constant 7 : index
    %c0_26 = arith.constant 0 : index
    %c0_27 = arith.constant 0 : index
    %50 = vector.load %arg3[%c7, %c0_26, %c0_27] : memref<9x4x4xbf16, #tpu.memory_space<vmem>>, vector<1x4x4xbf16>
    %51 = vector.shape_cast %50 : vector<1x4x4xbf16> to vector<4x4xbf16>
    %cst_28 = arith.constant dense<0.000000e+00> : vector<16x4xf32>
    %52 = tpu.matmul %49, %51, %cst_28 {dimension_numbers = #tpu.dot_dimension_numbers<[1], [0], [0], [1], [0, 0, 1, 1], [], []>} : vector<16x4xbf16>, vector<4x4xbf16>, vector<16x4xf32> -> vector<16x4xf32>
    %53 = arith.addf %47, %52 : vector<16x4xf32>
    %54 = vector.extract_strided_slice %4 {offsets = [2, 2, 0], sizes = [1, 16, 4], strides = [1, 1, 1]} : vector<10x18x4xbf16> to vector<1x16x4xbf16>
    %55 = vector.shape_cast %54 : vector<1x16x4xbf16> to vector<16x4xbf16>
    %c8 = arith.constant 8 : index
    %c0_29 = arith.constant 0 : index
    %c0_30 = arith.constant 0 : index
    %56 = vector.load %arg3[%c8, %c0_29, %c0_30] : memref<9x4x4xbf16, #tpu.memory_space<vmem>>, vector<1x4x4xbf16>
    %57 = vector.shape_cast %56 : vector<1x4x4xbf16> to vector<4x4xbf16>
    %cst_31 = arith.constant dense<0.000000e+00> : vector<16x4xf32>
    %58 = tpu.matmul %55, %57, %cst_31 {dimension_numbers = #tpu.dot_dimension_numbers<[1], [0], [0], [1], [0, 0, 1, 1], [], []>} : vector<16x4xbf16>, vector<4x4xbf16>, vector<16x4xf32> -> vector<16x4xf32>
    %59 = arith.addf %53, %58 : vector<16x4xf32>
    %60 = vector.broadcast %1 : vector<1x4xf32> to vector<16x4xf32>
    %61 = arith.addf %59, %60 : vector<16x4xf32>
    %cst_32 = arith.constant 0.000000e+00 : f32
    %62 = vector.broadcast %cst_32 : f32 to vector<16x4xf32>
    %63 = arith.maximumf %61, %62 : vector<16x4xf32>
    %64 = arith.truncf %63 : vector<16x4xf32> to vector<16x4xbf16>
    %c0_33 = arith.constant 0 : index
    %c0_34 = arith.constant 0 : index
    %c0_35 = arith.constant 0 : index
    %c0_36 = arith.constant 0 : index
    %65 = vector.load %arg5[%c0_33, %c0_34, %c0_35, %c0_36] : memref<1x8x16x4xbf16, #tpu.memory_space<vmem>>, vector<1x1x16x4xbf16>
    %66 = vector.shape_cast %65 : vector<1x1x16x4xbf16> to vector<16x4xbf16>
    %67 = vector.shape_cast %64 : vector<16x4xbf16> to vector<1x1x16x4xbf16>
    tpu.vector_store %arg5[%c0_33, %c0_34, %c0_35, %c0_36], %67 {strides = array<i32>} : memref<1x8x16x4xbf16, #tpu.memory_space<vmem>>, vector<1x1x16x4xbf16>,
    %cst_37 = arith.constant 0.000000e+00 : f32
    %68 = vector.broadcast %cst_37 : f32 to vector<16x4xf32>
    %69 = vector.extract_strided_slice %4 {offsets = [1, 0, 0], sizes = [1, 16, 4], strides = [1, 1, 1]} : vector<10x18x4xbf16> to vector<1x16x4xbf16>
    %70 = vector.shape_cast %69 : vector<1x16x4xbf16> to vector<16x4xbf16>
    %c0_38 = arith.constant 0 : index
    %c0_39 = arith.constant 0 : index
    %c0_40 = arith.constant 0 : index
    %71 = vector.load %arg3[%c0_38, %c0_39, %c0_40] : memref<9x4x4xbf16, #tpu.memory_space<vmem>>, vector<1x4x4xbf16>
    %72 = vector.shape_cast %71 : vector<1x4x4xbf16> to vector<4x4xbf16>
    %cst_41 = arith.constant dense<0.000000e+00> : vector<16x4xf32>
    %73 = tpu.matmul %70, %72, %cst_41 {dimension_numbers = #tpu.dot_dimension_numbers<[1], [0], [0], [1], [0, 0, 1, 1], [], []>} : vector<16x4xbf16>, vector<4x4xbf16>, vector<16x4xf32> -> vector<16x4xf32>
    %74 = arith.addf %68, %73 : vector<16x4xf32>
    %75 = vector.extract_strided_slice %4 {offsets = [1, 1, 0], sizes = [1, 16, 4], strides = [1, 1, 1]} : vector<10x18x4xbf16> to vector<1x16x4xbf16>
    %76 = vector.shape_cast %75 : vector<1x16x4xbf16> to vector<16x4xbf16>
    %c1_42 = arith.constant 1 : index
    %c0_43 = arith.constant 0 : index
    %c0_44 = arith.constant 0 : index
    %77 = vector.load %arg3[%c1_42, %c0_43, %c0_44] : memref<9x4x4xbf16, #tpu.memory_space<vmem>>, vector<1x4x4xbf16>
    %78 = vector.shape_cast %77 : vector<1x4x4xbf16> to vector<4x4xbf16>
    %cst_45 = arith.constant dense<0.000000e+00> : vector<16x4xf32>
    %79 = tpu.matmul %76, %78, %cst_45 {dimension_numbers = #tpu.dot_dimension_numbers<[1], [0], [0], [1], [0, 0, 1, 1], [], []>} : vector<16x4xbf16>, vector<4x4xbf16>, vector<16x4xf32> -> vector<16x4xf32>
    %80 = arith.addf %74, %79 : vector<16x4xf32>
    %81 = vector.extract_strided_slice %4 {offsets = [1, 2, 0], sizes = [1, 16, 4], strides = [1, 1, 1]} : vector<10x18x4xbf16> to vector<1x16x4xbf16>
    %82 = vector.shape_cast %81 : vector<1x16x4xbf16> to vector<16x4xbf16>
    %c2_46 = arith.constant 2 : index
    %c0_47 = arith.constant 0 : index
    %c0_48 = arith.constant 0 : index
    %83 = vector.load %arg3[%c2_46, %c0_47, %c0_48] : memref<9x4x4xbf16, #tpu.memory_space<vmem>>, vector<1x4x4xbf16>
    %84 = vector.shape_cast %83 : vector<1x4x4xbf16> to vector<4x4xbf16>
    %cst_49 = arith.constant dense<0.000000e+00> : vector<16x4xf32>
    %85 = tpu.matmul %82, %84, %cst_49 {dimension_numbers = #tpu.dot_dimension_numbers<[1], [0], [0], [1], [0, 0, 1, 1], [], []>} : vector<16x4xbf16>, vector<4x4xbf16>, vector<16x4xf32> -> vector<16x4xf32>
    %86 = arith.addf %80, %85 : vector<16x4xf32>
    %87 = vector.extract_strided_slice %4 {offsets = [2, 0, 0], sizes = [1, 16, 4], strides = [1, 1, 1]} : vector<10x18x4xbf16> to vector<1x16x4xbf16>
    %88 = vector.shape_cast %87 : vector<1x16x4xbf16> to vector<16x4xbf16>
    %c3_50 = arith.constant 3 : index
    %c0_51 = arith.constant 0 : index
    %c0_52 = arith.constant 0 : index
    %89 = vector.load %arg3[%c3_50, %c0_51, %c0_52] : memref<9x4x4xbf16, #tpu.memory_space<vmem>>, vector<1x4x4xbf16>
    %90 = vector.shape_cast %89 : vector<1x4x4xbf16> to vector<4x4xbf16>
    %cst_53 = arith.constant dense<0.000000e+00> : vector<16x4xf32>
    %91 = tpu.matmul %88, %90, %cst_53 {dimension_numbers = #tpu.dot_dimension_numbers<[1], [0], [0], [1], [0, 0, 1, 1], [], []>} : vector<16x4xbf16>, vector<4x4xbf16>, vector<16x4xf32> -> vector<16x4xf32>
    %92 = arith.addf %86, %91 : vector<16x4xf32>
    %93 = vector.extract_strided_slice %4 {offsets = [2, 1, 0], sizes = [1, 16, 4], strides = [1, 1, 1]} : vector<10x18x4xbf16> to vector<1x16x4xbf16>
    %94 = vector.shape_cast %93 : vector<1x16x4xbf16> to vector<16x4xbf16>
    %c4_54 = arith.constant 4 : index
    %c0_55 = arith.constant 0 : index
    %c0_56 = arith.constant 0 : index
    %95 = vector.load %arg3[%c4_54, %c0_55, %c0_56] : memref<9x4x4xbf16, #tpu.memory_space<vmem>>, vector<1x4x4xbf16>
    %96 = vector.shape_cast %95 : vector<1x4x4xbf16> to vector<4x4xbf16>
    %cst_57 = arith.constant dense<0.000000e+00> : vector<16x4xf32>
    %97 = tpu.matmul %94, %96, %cst_57 {dimension_numbers = #tpu.dot_dimension_numbers<[1], [0], [0], [1], [0, 0, 1, 1], [], []>} : vector<16x4xbf16>, vector<4x4xbf16>, vector<16x4xf32> -> vector<16x4xf32>
    %98 = arith.addf %92, %97 : vector<16x4xf32>
    %99 = vector.extract_strided_slice %4 {offsets = [2, 2, 0], sizes = [1, 16, 4], strides = [1, 1, 1]} : vector<10x18x4xbf16> to vector<1x16x4xbf16>
    %100 = vector.shape_cast %99 : vector<1x16x4xbf16> to vector<16x4xbf16>
    %c5_58 = arith.constant 5 : index
    %c0_59 = arith.constant 0 : index
    %c0_60 = arith.constant 0 : index
    %101 = vector.load %arg3[%c5_58, %c0_59, %c0_60] : memref<9x4x4xbf16, #tpu.memory_space<vmem>>, vector<1x4x4xbf16>
    %102 = vector.shape_cast %101 : vector<1x4x4xbf16> to vector<4x4xbf16>
    %cst_61 = arith.constant dense<0.000000e+00> : vector<16x4xf32>
    %103 = tpu.matmul %100, %102, %cst_61 {dimension_numbers = #tpu.dot_dimension_numbers<[1], [0], [0], [1], [0, 0, 1, 1], [], []>} : vector<16x4xbf16>, vector<4x4xbf16>, vector<16x4xf32> -> vector<16x4xf32>
    %104 = arith.addf %98, %103 : vector<16x4xf32>
    %105 = vector.extract_strided_slice %4 {offsets = [3, 0, 0], sizes = [1, 16, 4], strides = [1, 1, 1]} : vector<10x18x4xbf16> to vector<1x16x4xbf16>
    %106 = vector.shape_cast %105 : vector<1x16x4xbf16> to vector<16x4xbf16>
    %c6_62 = arith.constant 6 : index
    %c0_63 = arith.constant 0 : index
    %c0_64 = arith.constant 0 : index
    %107 = vector.load %arg3[%c6_62, %c0_63, %c0_64] : memref<9x4x4xbf16, #tpu.memory_space<vmem>>, vector<1x4x4xbf16>
    %108 = vector.shape_cast %107 : vector<1x4x4xbf16> to vector<4x4xbf16>
    %cst_65 = arith.constant dense<0.000000e+00> : vector<16x4xf32>
    %109 = tpu.matmul %106, %108, %cst_65 {dimension_numbers = #tpu.dot_dimension_numbers<[1], [0], [0], [1], [0, 0, 1, 1], [], []>} : vector<16x4xbf16>, vector<4x4xbf16>, vector<16x4xf32> -> vector<16x4xf32>
    %110 = arith.addf %104, %109 : vector<16x4xf32>
    %111 = vector.extract_strided_slice %4 {offsets = [3, 1, 0], sizes = [1, 16, 4], strides = [1, 1, 1]} : vector<10x18x4xbf16> to vector<1x16x4xbf16>
    %112 = vector.shape_cast %111 : vector<1x16x4xbf16> to vector<16x4xbf16>
    %c7_66 = arith.constant 7 : index
    %c0_67 = arith.constant 0 : index
    %c0_68 = arith.constant 0 : index
    %113 = vector.load %arg3[%c7_66, %c0_67, %c0_68] : memref<9x4x4xbf16, #tpu.memory_space<vmem>>, vector<1x4x4xbf16>
    %114 = vector.shape_cast %113 : vector<1x4x4xbf16> to vector<4x4xbf16>
    %cst_69 = arith.constant dense<0.000000e+00> : vector<16x4xf32>
    %115 = tpu.matmul %112, %114, %cst_69 {dimension_numbers = #tpu.dot_dimension_numbers<[1], [0], [0], [1], [0, 0, 1, 1], [], []>} : vector<16x4xbf16>, vector<4x4xbf16>, vector<16x4xf32> -> vector<16x4xf32>
    %116 = arith.addf %110, %115 : vector<16x4xf32>
    %117 = vector.extract_strided_slice %4 {offsets = [3, 2, 0], sizes = [1, 16, 4], strides = [1, 1, 1]} : vector<10x18x4xbf16> to vector<1x16x4xbf16>
    %118 = vector.shape_cast %117 : vector<1x16x4xbf16> to vector<16x4xbf16>
    %c8_70 = arith.constant 8 : index
    %c0_71 = arith.constant 0 : index
    %c0_72 = arith.constant 0 : index
    %119 = vector.load %arg3[%c8_70, %c0_71, %c0_72] : memref<9x4x4xbf16, #tpu.memory_space<vmem>>, vector<1x4x4xbf16>
    %120 = vector.shape_cast %119 : vector<1x4x4xbf16> to vector<4x4xbf16>
    %cst_73 = arith.constant dense<0.000000e+00> : vector<16x4xf32>
    %121 = tpu.matmul %118, %120, %cst_73 {dimension_numbers = #tpu.dot_dimension_numbers<[1], [0], [0], [1], [0, 0, 1, 1], [], []>} : vector<16x4xbf16>, vector<4x4xbf16>, vector<16x4xf32> -> vector<16x4xf32>
    %122 = arith.addf %116, %121 : vector<16x4xf32>
    %123 = vector.broadcast %1 : vector<1x4xf32> to vector<16x4xf32>
    %124 = arith.addf %122, %123 : vector<16x4xf32>
    %cst_74 = arith.constant 0.000000e+00 : f32
    %125 = vector.broadcast %cst_74 : f32 to vector<16x4xf32>
    %126 = arith.maximumf %124, %125 : vector<16x4xf32>
    %127 = arith.truncf %126 : vector<16x4xf32> to vector<16x4xbf16>
    %c0_75 = arith.constant 0 : index
    %c1_76 = arith.constant 1 : index
    %c0_77 = arith.constant 0 : index
    %c0_78 = arith.constant 0 : index
    %128 = vector.load %arg5[%c0_75, %c1_76, %c0_77, %c0_78] : memref<1x8x16x4xbf16, #tpu.memory_space<vmem>>, vector<1x1x16x4xbf16>
    %129 = vector.shape_cast %128 : vector<1x1x16x4xbf16> to vector<16x4xbf16>
    %130 = vector.shape_cast %127 : vector<16x4xbf16> to vector<1x1x16x4xbf16>
    tpu.vector_store %arg5[%c0_75, %c1_76, %c0_77, %c0_78], %130 {strides = array<i32>} : memref<1x8x16x4xbf16, #tpu.memory_space<vmem>>, vector<1x1x16x4xbf16>,
    %cst_79 = arith.constant 0.000000e+00 : f32
    %131 = vector.broadcast %cst_79 : f32 to vector<16x4xf32>
    %132 = vector.extract_strided_slice %4 {offsets = [2, 0, 0], sizes = [1, 16, 4], strides = [1, 1, 1]} : vector<10x18x4xbf16> to vector<1x16x4xbf16>
    %133 = vector.shape_cast %132 : vector<1x16x4xbf16> to vector<16x4xbf16>
    %c0_80 = arith.constant 0 : index
    %c0_81 = arith.constant 0 : index
    %c0_82 = arith.constant 0 : index
    %134 = vector.load %arg3[%c0_80, %c0_81, %c0_82] : memref<9x4x4xbf16, #tpu.memory_space<vmem>>, vector<1x4x4xbf16>
    %135 = vector.shape_cast %134 : vector<1x4x4xbf16> to vector<4x4xbf16>
    %cst_83 = arith.constant dense<0.000000e+00> : vector<16x4xf32>
    %136 = tpu.matmul %133, %135, %cst_83 {dimension_numbers = #tpu.dot_dimension_numbers<[1], [0], [0], [1], [0, 0, 1, 1], [], []>} : vector<16x4xbf16>, vector<4x4xbf16>, vector<16x4xf32> -> vector<16x4xf32>
    %137 = arith.addf %131, %136 : vector<16x4xf32>
    %138 = vector.extract_strided_slice %4 {offsets = [2, 1, 0], sizes = [1, 16, 4], strides = [1, 1, 1]} : vector<10x18x4xbf16> to vector<1x16x4xbf16>
    %139 = vector.shape_cast %138 : vector<1x16x4xbf16> to vector<16x4xbf16>
    %c1_84 = arith.constant 1 : index
    %c0_85 = arith.constant 0 : index
    %c0_86 = arith.constant 0 : index
    %140 = vector.load %arg3[%c1_84, %c0_85, %c0_86] : memref<9x4x4xbf16, #tpu.memory_space<vmem>>, vector<1x4x4xbf16>
    %141 = vector.shape_cast %140 : vector<1x4x4xbf16> to vector<4x4xbf16>
    %cst_87 = arith.constant dense<0.000000e+00> : vector<16x4xf32>
    %142 = tpu.matmul %139, %141, %cst_87 {dimension_numbers = #tpu.dot_dimension_numbers<[1], [0], [0], [1], [0, 0, 1, 1], [], []>} : vector<16x4xbf16>, vector<4x4xbf16>, vector<16x4xf32> -> vector<16x4xf32>
    %143 = arith.addf %137, %142 : vector<16x4xf32>
    %144 = vector.extract_strided_slice %4 {offsets = [2, 2, 0], sizes = [1, 16, 4], strides = [1, 1, 1]} : vector<10x18x4xbf16> to vector<1x16x4xbf16>
    %145 = vector.shape_cast %144 : vector<1x16x4xbf16> to vector<16x4xbf16>
    %c2_88 = arith.constant 2 : index
    %c0_89 = arith.constant 0 : index
    %c0_90 = arith.constant 0 : index
    %146 = vector.load %arg3[%c2_88, %c0_89, %c0_90] : memref<9x4x4xbf16, #tpu.memory_space<vmem>>, vector<1x4x4xbf16>
    %147 = vector.shape_cast %146 : vector<1x4x4xbf16> to vector<4x4xbf16>
    %cst_91 = arith.constant dense<0.000000e+00> : vector<16x4xf32>
    %148 = tpu.matmul %145, %147, %cst_91 {dimension_numbers = #tpu.dot_dimension_numbers<[1], [0], [0], [1], [0, 0, 1, 1], [], []>} : vector<16x4xbf16>, vector<4x4xbf16>, vector<16x4xf32> -> vector<16x4xf32>
    %149 = arith.addf %143, %148 : vector<16x4xf32>
    %150 = vector.extract_strided_slice %4 {offsets = [3, 0, 0], sizes = [1, 16, 4], strides = [1, 1, 1]} : vector<10x18x4xbf16> to vector<1x16x4xbf16>
    %151 = vector.shape_cast %150 : vector<1x16x4xbf16> to vector<16x4xbf16>
    %c3_92 = arith.constant 3 : index
    %c0_93 = arith.constant 0 : index
    %c0_94 = arith.constant 0 : index
    %152 = vector.load %arg3[%c3_92, %c0_93, %c0_94] : memref<9x4x4xbf16, #tpu.memory_space<vmem>>, vector<1x4x4xbf16>
    %153 = vector.shape_cast %152 : vector<1x4x4xbf16> to vector<4x4xbf16>
    %cst_95 = arith.constant dense<0.000000e+00> : vector<16x4xf32>
    %154 = tpu.matmul %151, %153, %cst_95 {dimension_numbers = #tpu.dot_dimension_numbers<[1], [0], [0], [1], [0, 0, 1, 1], [], []>} : vector<16x4xbf16>, vector<4x4xbf16>, vector<16x4xf32> -> vector<16x4xf32>
    %155 = arith.addf %149, %154 : vector<16x4xf32>
    %156 = vector.extract_strided_slice %4 {offsets = [3, 1, 0], sizes = [1, 16, 4], strides = [1, 1, 1]} : vector<10x18x4xbf16> to vector<1x16x4xbf16>
    %157 = vector.shape_cast %156 : vector<1x16x4xbf16> to vector<16x4xbf16>
    %c4_96 = arith.constant 4 : index
    %c0_97 = arith.constant 0 : index
    %c0_98 = arith.constant 0 : index
    %158 = vector.load %arg3[%c4_96, %c0_97, %c0_98] : memref<9x4x4xbf16, #tpu.memory_space<vmem>>, vector<1x4x4xbf16>
    %159 = vector.shape_cast %158 : vector<1x4x4xbf16> to vector<4x4xbf16>
    %cst_99 = arith.constant dense<0.000000e+00> : vector<16x4xf32>
    %160 = tpu.matmul %157, %159, %cst_99 {dimension_numbers = #tpu.dot_dimension_numbers<[1], [0], [0], [1], [0, 0, 1, 1], [], []>} : vector<16x4xbf16>, vector<4x4xbf16>, vector<16x4xf32> -> vector<16x4xf32>
    %161 = arith.addf %155, %160 : vector<16x4xf32>
    %162 = vector.extract_strided_slice %4 {offsets = [3, 2, 0], sizes = [1, 16, 4], strides = [1, 1, 1]} : vector<10x18x4xbf16> to vector<1x16x4xbf16>
    %163 = vector.shape_cast %162 : vector<1x16x4xbf16> to vector<16x4xbf16>
    %c5_100 = arith.constant 5 : index
    %c0_101 = arith.constant 0 : index
    %c0_102 = arith.constant 0 : index
    %164 = vector.load %arg3[%c5_100, %c0_101, %c0_102] : memref<9x4x4xbf16, #tpu.memory_space<vmem>>, vector<1x4x4xbf16>
    %165 = vector.shape_cast %164 : vector<1x4x4xbf16> to vector<4x4xbf16>
    %cst_103 = arith.constant dense<0.000000e+00> : vector<16x4xf32>
    %166 = tpu.matmul %163, %165, %cst_103 {dimension_numbers = #tpu.dot_dimension_numbers<[1], [0], [0], [1], [0, 0, 1, 1], [], []>} : vector<16x4xbf16>, vector<4x4xbf16>, vector<16x4xf32> -> vector<16x4xf32>
    %167 = arith.addf %161, %166 : vector<16x4xf32>
    %168 = vector.extract_strided_slice %4 {offsets = [4, 0, 0], sizes = [1, 16, 4], strides = [1, 1, 1]} : vector<10x18x4xbf16> to vector<1x16x4xbf16>
    %169 = vector.shape_cast %168 : vector<1x16x4xbf16> to vector<16x4xbf16>
    %c6_104 = arith.constant 6 : index
    %c0_105 = arith.constant 0 : index
    %c0_106 = arith.constant 0 : index
    %170 = vector.load %arg3[%c6_104, %c0_105, %c0_106] : memref<9x4x4xbf16, #tpu.memory_space<vmem>>, vector<1x4x4xbf16>
    %171 = vector.shape_cast %170 : vector<1x4x4xbf16> to vector<4x4xbf16>
    %cst_107 = arith.constant dense<0.000000e+00> : vector<16x4xf32>
    %172 = tpu.matmul %169, %171, %cst_107 {dimension_numbers = #tpu.dot_dimension_numbers<[1], [0], [0], [1], [0, 0, 1, 1], [], []>} : vector<16x4xbf16>, vector<4x4xbf16>, vector<16x4xf32> -> vector<16x4xf32>
    %173 = arith.addf %167, %172 : vector<16x4xf32>
    %174 = vector.extract_strided_slice %4 {offsets = [4, 1, 0], sizes = [1, 16, 4], strides = [1, 1, 1]} : vector<10x18x4xbf16> to vector<1x16x4xbf16>
    %175 = vector.shape_cast %174 : vector<1x16x4xbf16> to vector<16x4xbf16>
    %c7_108 = arith.constant 7 : index
    %c0_109 = arith.constant 0 : index
    %c0_110 = arith.constant 0 : index
    %176 = vector.load %arg3[%c7_108, %c0_109, %c0_110] : memref<9x4x4xbf16, #tpu.memory_space<vmem>>, vector<1x4x4xbf16>
    %177 = vector.shape_cast %176 : vector<1x4x4xbf16> to vector<4x4xbf16>
    %cst_111 = arith.constant dense<0.000000e+00> : vector<16x4xf32>
    %178 = tpu.matmul %175, %177, %cst_111 {dimension_numbers = #tpu.dot_dimension_numbers<[1], [0], [0], [1], [0, 0, 1, 1], [], []>} : vector<16x4xbf16>, vector<4x4xbf16>, vector<16x4xf32> -> vector<16x4xf32>
    %179 = arith.addf %173, %178 : vector<16x4xf32>
    %180 = vector.extract_strided_slice %4 {offsets = [4, 2, 0], sizes = [1, 16, 4], strides = [1, 1, 1]} : vector<10x18x4xbf16> to vector<1x16x4xbf16>
    %181 = vector.shape_cast %180 : vector<1x16x4xbf16> to vector<16x4xbf16>
    %c8_112 = arith.constant 8 : index
    %c0_113 = arith.constant 0 : index
    %c0_114 = arith.constant 0 : index
    %182 = vector.load %arg3[%c8_112, %c0_113, %c0_114] : memref<9x4x4xbf16, #tpu.memory_space<vmem>>, vector<1x4x4xbf16>
    %183 = vector.shape_cast %182 : vector<1x4x4xbf16> to vector<4x4xbf16>
    %cst_115 = arith.constant dense<0.000000e+00> : vector<16x4xf32>
    %184 = tpu.matmul %181, %183, %cst_115 {dimension_numbers = #tpu.dot_dimension_numbers<[1], [0], [0], [1], [0, 0, 1, 1], [], []>} : vector<16x4xbf16>, vector<4x4xbf16>, vector<16x4xf32> -> vector<16x4xf32>
    %185 = arith.addf %179, %184 : vector<16x4xf32>
    %186 = vector.broadcast %1 : vector<1x4xf32> to vector<16x4xf32>
    %187 = arith.addf %185, %186 : vector<16x4xf32>
    %cst_116 = arith.constant 0.000000e+00 : f32
    %188 = vector.broadcast %cst_116 : f32 to vector<16x4xf32>
    %189 = arith.maximumf %187, %188 : vector<16x4xf32>
    %190 = arith.truncf %189 : vector<16x4xf32> to vector<16x4xbf16>
    %c0_117 = arith.constant 0 : index
    %c2_118 = arith.constant 2 : index
    %c0_119 = arith.constant 0 : index
    %c0_120 = arith.constant 0 : index
    %191 = vector.load %arg5[%c0_117, %c2_118, %c0_119, %c0_120] : memref<1x8x16x4xbf16, #tpu.memory_space<vmem>>, vector<1x1x16x4xbf16>
    %192 = vector.shape_cast %191 : vector<1x1x16x4xbf16> to vector<16x4xbf16>
    %193 = vector.shape_cast %190 : vector<16x4xbf16> to vector<1x1x16x4xbf16>
    tpu.vector_store %arg5[%c0_117, %c2_118, %c0_119, %c0_120], %193 {strides = array<i32>} : memref<1x8x16x4xbf16, #tpu.memory_space<vmem>>, vector<1x1x16x4xbf16>,
    %cst_121 = arith.constant 0.000000e+00 : f32
    %194 = vector.broadcast %cst_121 : f32 to vector<16x4xf32>
    %195 = vector.extract_strided_slice %4 {offsets = [3, 0, 0], sizes = [1, 16, 4], strides = [1, 1, 1]} : vector<10x18x4xbf16> to vector<1x16x4xbf16>
    %196 = vector.shape_cast %195 : vector<1x16x4xbf16> to vector<16x4xbf16>
    %c0_122 = arith.constant 0 : index
    %c0_123 = arith.constant 0 : index
    %c0_124 = arith.constant 0 : index
    %197 = vector.load %arg3[%c0_122, %c0_123, %c0_124] : memref<9x4x4xbf16, #tpu.memory_space<vmem>>, vector<1x4x4xbf16>
    %198 = vector.shape_cast %197 : vector<1x4x4xbf16> to vector<4x4xbf16>
    %cst_125 = arith.constant dense<0.000000e+00> : vector<16x4xf32>
    %199 = tpu.matmul %196, %198, %cst_125 {dimension_numbers = #tpu.dot_dimension_numbers<[1], [0], [0], [1], [0, 0, 1, 1], [], []>} : vector<16x4xbf16>, vector<4x4xbf16>, vector<16x4xf32> -> vector<16x4xf32>
    %200 = arith.addf %194, %199 : vector<16x4xf32>
    %201 = vector.extract_strided_slice %4 {offsets = [3, 1, 0], sizes = [1, 16, 4], strides = [1, 1, 1]} : vector<10x18x4xbf16> to vector<1x16x4xbf16>
    %202 = vector.shape_cast %201 : vector<1x16x4xbf16> to vector<16x4xbf16>
    %c1_126 = arith.constant 1 : index
    %c0_127 = arith.constant 0 : index
    %c0_128 = arith.constant 0 : index
    %203 = vector.load %arg3[%c1_126, %c0_127, %c0_128] : memref<9x4x4xbf16, #tpu.memory_space<vmem>>, vector<1x4x4xbf16>
    %204 = vector.shape_cast %203 : vector<1x4x4xbf16> to vector<4x4xbf16>
    %cst_129 = arith.constant dense<0.000000e+00> : vector<16x4xf32>
    %205 = tpu.matmul %202, %204, %cst_129 {dimension_numbers = #tpu.dot_dimension_numbers<[1], [0], [0], [1], [0, 0, 1, 1], [], []>} : vector<16x4xbf16>, vector<4x4xbf16>, vector<16x4xf32> -> vector<16x4xf32>
    %206 = arith.addf %200, %205 : vector<16x4xf32>
    %207 = vector.extract_strided_slice %4 {offsets = [3, 2, 0], sizes = [1, 16, 4], strides = [1, 1, 1]} : vector<10x18x4xbf16> to vector<1x16x4xbf16>
    %208 = vector.shape_cast %207 : vector<1x16x4xbf16> to vector<16x4xbf16>
    %c2_130 = arith.constant 2 : index
    %c0_131 = arith.constant 0 : index
    %c0_132 = arith.constant 0 : index
    %209 = vector.load %arg3[%c2_130, %c0_131, %c0_132] : memref<9x4x4xbf16, #tpu.memory_space<vmem>>, vector<1x4x4xbf16>
    %210 = vector.shape_cast %209 : vector<1x4x4xbf16> to vector<4x4xbf16>
    %cst_133 = arith.constant dense<0.000000e+00> : vector<16x4xf32>
    %211 = tpu.matmul %208, %210, %cst_133 {dimension_numbers = #tpu.dot_dimension_numbers<[1], [0], [0], [1], [0, 0, 1, 1], [], []>} : vector<16x4xbf16>, vector<4x4xbf16>, vector<16x4xf32> -> vector<16x4xf32>
    %212 = arith.addf %206, %211 : vector<16x4xf32>
    %213 = vector.extract_strided_slice %4 {offsets = [4, 0, 0], sizes = [1, 16, 4], strides = [1, 1, 1]} : vector<10x18x4xbf16> to vector<1x16x4xbf16>
    %214 = vector.shape_cast %213 : vector<1x16x4xbf16> to vector<16x4xbf16>
    %c3_134 = arith.constant 3 : index
    %c0_135 = arith.constant 0 : index
    %c0_136 = arith.constant 0 : index
    %215 = vector.load %arg3[%c3_134, %c0_135, %c0_136] : memref<9x4x4xbf16, #tpu.memory_space<vmem>>, vector<1x4x4xbf16>
    %216 = vector.shape_cast %215 : vector<1x4x4xbf16> to vector<4x4xbf16>
    %cst_137 = arith.constant dense<0.000000e+00> : vector<16x4xf32>
    %217 = tpu.matmul %214, %216, %cst_137 {dimension_numbers = #tpu.dot_dimension_numbers<[1], [0], [0], [1], [0, 0, 1, 1], [], []>} : vector<16x4xbf16>, vector<4x4xbf16>, vector<16x4xf32> -> vector<16x4xf32>
    %218 = arith.addf %212, %217 : vector<16x4xf32>
    %219 = vector.extract_strided_slice %4 {offsets = [4, 1, 0], sizes = [1, 16, 4], strides = [1, 1, 1]} : vector<10x18x4xbf16> to vector<1x16x4xbf16>
    %220 = vector.shape_cast %219 : vector<1x16x4xbf16> to vector<16x4xbf16>
    %c4_138 = arith.constant 4 : index
    %c0_139 = arith.constant 0 : index
    %c0_140 = arith.constant 0 : index
    %221 = vector.load %arg3[%c4_138, %c0_139, %c0_140] : memref<9x4x4xbf16, #tpu.memory_space<vmem>>, vector<1x4x4xbf16>
    %222 = vector.shape_cast %221 : vector<1x4x4xbf16> to vector<4x4xbf16>
    %cst_141 = arith.constant dense<0.000000e+00> : vector<16x4xf32>
    %223 = tpu.matmul %220, %222, %cst_141 {dimension_numbers = #tpu.dot_dimension_numbers<[1], [0], [0], [1], [0, 0, 1, 1], [], []>} : vector<16x4xbf16>, vector<4x4xbf16>, vector<16x4xf32> -> vector<16x4xf32>
    %224 = arith.addf %218, %223 : vector<16x4xf32>
    %225 = vector.extract_strided_slice %4 {offsets = [4, 2, 0], sizes = [1, 16, 4], strides = [1, 1, 1]} : vector<10x18x4xbf16> to vector<1x16x4xbf16>
    %226 = vector.shape_cast %225 : vector<1x16x4xbf16> to vector<16x4xbf16>
    %c5_142 = arith.constant 5 : index
    %c0_143 = arith.constant 0 : index
    %c0_144 = arith.constant 0 : index
    %227 = vector.load %arg3[%c5_142, %c0_143, %c0_144] : memref<9x4x4xbf16, #tpu.memory_space<vmem>>, vector<1x4x4xbf16>
    %228 = vector.shape_cast %227 : vector<1x4x4xbf16> to vector<4x4xbf16>
    %cst_145 = arith.constant dense<0.000000e+00> : vector<16x4xf32>
    %229 = tpu.matmul %226, %228, %cst_145 {dimension_numbers = #tpu.dot_dimension_numbers<[1], [0], [0], [1], [0, 0, 1, 1], [], []>} : vector<16x4xbf16>, vector<4x4xbf16>, vector<16x4xf32> -> vector<16x4xf32>
    %230 = arith.addf %224, %229 : vector<16x4xf32>
    %231 = vector.extract_strided_slice %4 {offsets = [5, 0, 0], sizes = [1, 16, 4], strides = [1, 1, 1]} : vector<10x18x4xbf16> to vector<1x16x4xbf16>
    %232 = vector.shape_cast %231 : vector<1x16x4xbf16> to vector<16x4xbf16>
    %c6_146 = arith.constant 6 : index
    %c0_147 = arith.constant 0 : index
    %c0_148 = arith.constant 0 : index
    %233 = vector.load %arg3[%c6_146, %c0_147, %c0_148] : memref<9x4x4xbf16, #tpu.memory_space<vmem>>, vector<1x4x4xbf16>
    %234 = vector.shape_cast %233 : vector<1x4x4xbf16> to vector<4x4xbf16>
    %cst_149 = arith.constant dense<0.000000e+00> : vector<16x4xf32>
    %235 = tpu.matmul %232, %234, %cst_149 {dimension_numbers = #tpu.dot_dimension_numbers<[1], [0], [0], [1], [0, 0, 1, 1], [], []>} : vector<16x4xbf16>, vector<4x4xbf16>, vector<16x4xf32> -> vector<16x4xf32>
    %236 = arith.addf %230, %235 : vector<16x4xf32>
    %237 = vector.extract_strided_slice %4 {offsets = [5, 1, 0], sizes = [1, 16, 4], strides = [1, 1, 1]} : vector<10x18x4xbf16> to vector<1x16x4xbf16>
    %238 = vector.shape_cast %237 : vector<1x16x4xbf16> to vector<16x4xbf16>
    %c7_150 = arith.constant 7 : index
    %c0_151 = arith.constant 0 : index
    %c0_152 = arith.constant 0 : index
    %239 = vector.load %arg3[%c7_150, %c0_151, %c0_152] : memref<9x4x4xbf16, #tpu.memory_space<vmem>>, vector<1x4x4xbf16>
    %240 = vector.shape_cast %239 : vector<1x4x4xbf16> to vector<4x4xbf16>
    %cst_153 = arith.constant dense<0.000000e+00> : vector<16x4xf32>
    %241 = tpu.matmul %238, %240, %cst_153 {dimension_numbers = #tpu.dot_dimension_numbers<[1], [0], [0], [1], [0, 0, 1, 1], [], []>} : vector<16x4xbf16>, vector<4x4xbf16>, vector<16x4xf32> -> vector<16x4xf32>
    %242 = arith.addf %236, %241 : vector<16x4xf32>
    %243 = vector.extract_strided_slice %4 {offsets = [5, 2, 0], sizes = [1, 16, 4], strides = [1, 1, 1]} : vector<10x18x4xbf16> to vector<1x16x4xbf16>
    %244 = vector.shape_cast %243 : vector<1x16x4xbf16> to vector<16x4xbf16>
    %c8_154 = arith.constant 8 : index
    %c0_155 = arith.constant 0 : index
    %c0_156 = arith.constant 0 : index
    %245 = vector.load %arg3[%c8_154, %c0_155, %c0_156] : memref<9x4x4xbf16, #tpu.memory_space<vmem>>, vector<1x4x4xbf16>
    %246 = vector.shape_cast %245 : vector<1x4x4xbf16> to vector<4x4xbf16>
    %cst_157 = arith.constant dense<0.000000e+00> : vector<16x4xf32>
    %247 = tpu.matmul %244, %246, %cst_157 {dimension_numbers = #tpu.dot_dimension_numbers<[1], [0], [0], [1], [0, 0, 1, 1], [], []>} : vector<16x4xbf16>, vector<4x4xbf16>, vector<16x4xf32> -> vector<16x4xf32>
    %248 = arith.addf %242, %247 : vector<16x4xf32>
    %249 = vector.broadcast %1 : vector<1x4xf32> to vector<16x4xf32>
    %250 = arith.addf %248, %249 : vector<16x4xf32>
    %cst_158 = arith.constant 0.000000e+00 : f32
    %251 = vector.broadcast %cst_158 : f32 to vector<16x4xf32>
    %252 = arith.maximumf %250, %251 : vector<16x4xf32>
    %253 = arith.truncf %252 : vector<16x4xf32> to vector<16x4xbf16>
    %c0_159 = arith.constant 0 : index
    %c3_160 = arith.constant 3 : index
    %c0_161 = arith.constant 0 : index
    %c0_162 = arith.constant 0 : index
    %254 = vector.load %arg5[%c0_159, %c3_160, %c0_161, %c0_162] : memref<1x8x16x4xbf16, #tpu.memory_space<vmem>>, vector<1x1x16x4xbf16>
    %255 = vector.shape_cast %254 : vector<1x1x16x4xbf16> to vector<16x4xbf16>
    %256 = vector.shape_cast %253 : vector<16x4xbf16> to vector<1x1x16x4xbf16>
    tpu.vector_store %arg5[%c0_159, %c3_160, %c0_161, %c0_162], %256 {strides = array<i32>} : memref<1x8x16x4xbf16, #tpu.memory_space<vmem>>, vector<1x1x16x4xbf16>,
    %cst_163 = arith.constant 0.000000e+00 : f32
    %257 = vector.broadcast %cst_163 : f32 to vector<16x4xf32>
    %258 = vector.extract_strided_slice %4 {offsets = [4, 0, 0], sizes = [1, 16, 4], strides = [1, 1, 1]} : vector<10x18x4xbf16> to vector<1x16x4xbf16>
    %259 = vector.shape_cast %258 : vector<1x16x4xbf16> to vector<16x4xbf16>
    %c0_164 = arith.constant 0 : index
    %c0_165 = arith.constant 0 : index
    %c0_166 = arith.constant 0 : index
    %260 = vector.load %arg3[%c0_164, %c0_165, %c0_166] : memref<9x4x4xbf16, #tpu.memory_space<vmem>>, vector<1x4x4xbf16>
    %261 = vector.shape_cast %260 : vector<1x4x4xbf16> to vector<4x4xbf16>
    %cst_167 = arith.constant dense<0.000000e+00> : vector<16x4xf32>
    %262 = tpu.matmul %259, %261, %cst_167 {dimension_numbers = #tpu.dot_dimension_numbers<[1], [0], [0], [1], [0, 0, 1, 1], [], []>} : vector<16x4xbf16>, vector<4x4xbf16>, vector<16x4xf32> -> vector<16x4xf32>
    %263 = arith.addf %257, %262 : vector<16x4xf32>
    %264 = vector.extract_strided_slice %4 {offsets = [4, 1, 0], sizes = [1, 16, 4], strides = [1, 1, 1]} : vector<10x18x4xbf16> to vector<1x16x4xbf16>
    %265 = vector.shape_cast %264 : vector<1x16x4xbf16> to vector<16x4xbf16>
    %c1_168 = arith.constant 1 : index
    %c0_169 = arith.constant 0 : index
    %c0_170 = arith.constant 0 : index
    %266 = vector.load %arg3[%c1_168, %c0_169, %c0_170] : memref<9x4x4xbf16, #tpu.memory_space<vmem>>, vector<1x4x4xbf16>
    %267 = vector.shape_cast %266 : vector<1x4x4xbf16> to vector<4x4xbf16>
    %cst_171 = arith.constant dense<0.000000e+00> : vector<16x4xf32>
    %268 = tpu.matmul %265, %267, %cst_171 {dimension_numbers = #tpu.dot_dimension_numbers<[1], [0], [0], [1], [0, 0, 1, 1], [], []>} : vector<16x4xbf16>, vector<4x4xbf16>, vector<16x4xf32> -> vector<16x4xf32>
    %269 = arith.addf %263, %268 : vector<16x4xf32>
    %270 = vector.extract_strided_slice %4 {offsets = [4, 2, 0], sizes = [1, 16, 4], strides = [1, 1, 1]} : vector<10x18x4xbf16> to vector<1x16x4xbf16>
    %271 = vector.shape_cast %270 : vector<1x16x4xbf16> to vector<16x4xbf16>
    %c2_172 = arith.constant 2 : index
    %c0_173 = arith.constant 0 : index
    %c0_174 = arith.constant 0 : index
    %272 = vector.load %arg3[%c2_172, %c0_173, %c0_174] : memref<9x4x4xbf16, #tpu.memory_space<vmem>>, vector<1x4x4xbf16>
    %273 = vector.shape_cast %272 : vector<1x4x4xbf16> to vector<4x4xbf16>
    %cst_175 = arith.constant dense<0.000000e+00> : vector<16x4xf32>
    %274 = tpu.matmul %271, %273, %cst_175 {dimension_numbers = #tpu.dot_dimension_numbers<[1], [0], [0], [1], [0, 0, 1, 1], [], []>} : vector<16x4xbf16>, vector<4x4xbf16>, vector<16x4xf32> -> vector<16x4xf32>
    %275 = arith.addf %269, %274 : vector<16x4xf32>
    %276 = vector.extract_strided_slice %4 {offsets = [5, 0, 0], sizes = [1, 16, 4], strides = [1, 1, 1]} : vector<10x18x4xbf16> to vector<1x16x4xbf16>
    %277 = vector.shape_cast %276 : vector<1x16x4xbf16> to vector<16x4xbf16>
    %c3_176 = arith.constant 3 : index
    %c0_177 = arith.constant 0 : index
    %c0_178 = arith.constant 0 : index
    %278 = vector.load %arg3[%c3_176, %c0_177, %c0_178] : memref<9x4x4xbf16, #tpu.memory_space<vmem>>, vector<1x4x4xbf16>
    %279 = vector.shape_cast %278 : vector<1x4x4xbf16> to vector<4x4xbf16>
    %cst_179 = arith.constant dense<0.000000e+00> : vector<16x4xf32>
    %280 = tpu.matmul %277, %279, %cst_179 {dimension_numbers = #tpu.dot_dimension_numbers<[1], [0], [0], [1], [0, 0, 1, 1], [], []>} : vector<16x4xbf16>, vector<4x4xbf16>, vector<16x4xf32> -> vector<16x4xf32>
    %281 = arith.addf %275, %280 : vector<16x4xf32>
    %282 = vector.extract_strided_slice %4 {offsets = [5, 1, 0], sizes = [1, 16, 4], strides = [1, 1, 1]} : vector<10x18x4xbf16> to vector<1x16x4xbf16>
    %283 = vector.shape_cast %282 : vector<1x16x4xbf16> to vector<16x4xbf16>
    %c4_180 = arith.constant 4 : index
    %c0_181 = arith.constant 0 : index
    %c0_182 = arith.constant 0 : index
    %284 = vector.load %arg3[%c4_180, %c0_181, %c0_182] : memref<9x4x4xbf16, #tpu.memory_space<vmem>>, vector<1x4x4xbf16>
    %285 = vector.shape_cast %284 : vector<1x4x4xbf16> to vector<4x4xbf16>
    %cst_183 = arith.constant dense<0.000000e+00> : vector<16x4xf32>
    %286 = tpu.matmul %283, %285, %cst_183 {dimension_numbers = #tpu.dot_dimension_numbers<[1], [0], [0], [1], [0, 0, 1, 1], [], []>} : vector<16x4xbf16>, vector<4x4xbf16>, vector<16x4xf32> -> vector<16x4xf32>
    %287 = arith.addf %281, %286 : vector<16x4xf32>
    %288 = vector.extract_strided_slice %4 {offsets = [5, 2, 0], sizes = [1, 16, 4], strides = [1, 1, 1]} : vector<10x18x4xbf16> to vector<1x16x4xbf16>
    %289 = vector.shape_cast %288 : vector<1x16x4xbf16> to vector<16x4xbf16>
    %c5_184 = arith.constant 5 : index
    %c0_185 = arith.constant 0 : index
    %c0_186 = arith.constant 0 : index
    %290 = vector.load %arg3[%c5_184, %c0_185, %c0_186] : memref<9x4x4xbf16, #tpu.memory_space<vmem>>, vector<1x4x4xbf16>
    %291 = vector.shape_cast %290 : vector<1x4x4xbf16> to vector<4x4xbf16>
    %cst_187 = arith.constant dense<0.000000e+00> : vector<16x4xf32>
    %292 = tpu.matmul %289, %291, %cst_187 {dimension_numbers = #tpu.dot_dimension_numbers<[1], [0], [0], [1], [0, 0, 1, 1], [], []>} : vector<16x4xbf16>, vector<4x4xbf16>, vector<16x4xf32> -> vector<16x4xf32>
    %293 = arith.addf %287, %292 : vector<16x4xf32>
    %294 = vector.extract_strided_slice %4 {offsets = [6, 0, 0], sizes = [1, 16, 4], strides = [1, 1, 1]} : vector<10x18x4xbf16> to vector<1x16x4xbf16>
    %295 = vector.shape_cast %294 : vector<1x16x4xbf16> to vector<16x4xbf16>
    %c6_188 = arith.constant 6 : index
    %c0_189 = arith.constant 0 : index
    %c0_190 = arith.constant 0 : index
    %296 = vector.load %arg3[%c6_188, %c0_189, %c0_190] : memref<9x4x4xbf16, #tpu.memory_space<vmem>>, vector<1x4x4xbf16>
    %297 = vector.shape_cast %296 : vector<1x4x4xbf16> to vector<4x4xbf16>
    %cst_191 = arith.constant dense<0.000000e+00> : vector<16x4xf32>
    %298 = tpu.matmul %295, %297, %cst_191 {dimension_numbers = #tpu.dot_dimension_numbers<[1], [0], [0], [1], [0, 0, 1, 1], [], []>} : vector<16x4xbf16>, vector<4x4xbf16>, vector<16x4xf32> -> vector<16x4xf32>
    %299 = arith.addf %293, %298 : vector<16x4xf32>
    %300 = vector.extract_strided_slice %4 {offsets = [6, 1, 0], sizes = [1, 16, 4], strides = [1, 1, 1]} : vector<10x18x4xbf16> to vector<1x16x4xbf16>
    %301 = vector.shape_cast %300 : vector<1x16x4xbf16> to vector<16x4xbf16>
    %c7_192 = arith.constant 7 : index
    %c0_193 = arith.constant 0 : index
    %c0_194 = arith.constant 0 : index
    %302 = vector.load %arg3[%c7_192, %c0_193, %c0_194] : memref<9x4x4xbf16, #tpu.memory_space<vmem>>, vector<1x4x4xbf16>
    %303 = vector.shape_cast %302 : vector<1x4x4xbf16> to vector<4x4xbf16>
    %cst_195 = arith.constant dense<0.000000e+00> : vector<16x4xf32>
    %304 = tpu.matmul %301, %303, %cst_195 {dimension_numbers = #tpu.dot_dimension_numbers<[1], [0], [0], [1], [0, 0, 1, 1], [], []>} : vector<16x4xbf16>, vector<4x4xbf16>, vector<16x4xf32> -> vector<16x4xf32>
    %305 = arith.addf %299, %304 : vector<16x4xf32>
    %306 = vector.extract_strided_slice %4 {offsets = [6, 2, 0], sizes = [1, 16, 4], strides = [1, 1, 1]} : vector<10x18x4xbf16> to vector<1x16x4xbf16>
    %307 = vector.shape_cast %306 : vector<1x16x4xbf16> to vector<16x4xbf16>
    %c8_196 = arith.constant 8 : index
    %c0_197 = arith.constant 0 : index
    %c0_198 = arith.constant 0 : index
    %308 = vector.load %arg3[%c8_196, %c0_197, %c0_198] : memref<9x4x4xbf16, #tpu.memory_space<vmem>>, vector<1x4x4xbf16>
    %309 = vector.shape_cast %308 : vector<1x4x4xbf16> to vector<4x4xbf16>
    %cst_199 = arith.constant dense<0.000000e+00> : vector<16x4xf32>
    %310 = tpu.matmul %307, %309, %cst_199 {dimension_numbers = #tpu.dot_dimension_numbers<[1], [0], [0], [1], [0, 0, 1, 1], [], []>} : vector<16x4xbf16>, vector<4x4xbf16>, vector<16x4xf32> -> vector<16x4xf32>
    %311 = arith.addf %305, %310 : vector<16x4xf32>
    %312 = vector.broadcast %1 : vector<1x4xf32> to vector<16x4xf32>
    %313 = arith.addf %311, %312 : vector<16x4xf32>
    %cst_200 = arith.constant 0.000000e+00 : f32
    %314 = vector.broadcast %cst_200 : f32 to vector<16x4xf32>
    %315 = arith.maximumf %313, %314 : vector<16x4xf32>
    %316 = arith.truncf %315 : vector<16x4xf32> to vector<16x4xbf16>
    %c0_201 = arith.constant 0 : index
    %c4_202 = arith.constant 4 : index
    %c0_203 = arith.constant 0 : index
    %c0_204 = arith.constant 0 : index
    %317 = vector.load %arg5[%c0_201, %c4_202, %c0_203, %c0_204] : memref<1x8x16x4xbf16, #tpu.memory_space<vmem>>, vector<1x1x16x4xbf16>
    %318 = vector.shape_cast %317 : vector<1x1x16x4xbf16> to vector<16x4xbf16>
    %319 = vector.shape_cast %316 : vector<16x4xbf16> to vector<1x1x16x4xbf16>
    tpu.vector_store %arg5[%c0_201, %c4_202, %c0_203, %c0_204], %319 {strides = array<i32>} : memref<1x8x16x4xbf16, #tpu.memory_space<vmem>>, vector<1x1x16x4xbf16>,
    %cst_205 = arith.constant 0.000000e+00 : f32
    %320 = vector.broadcast %cst_205 : f32 to vector<16x4xf32>
    %321 = vector.extract_strided_slice %4 {offsets = [5, 0, 0], sizes = [1, 16, 4], strides = [1, 1, 1]} : vector<10x18x4xbf16> to vector<1x16x4xbf16>
    %322 = vector.shape_cast %321 : vector<1x16x4xbf16> to vector<16x4xbf16>
    %c0_206 = arith.constant 0 : index
    %c0_207 = arith.constant 0 : index
    %c0_208 = arith.constant 0 : index
    %323 = vector.load %arg3[%c0_206, %c0_207, %c0_208] : memref<9x4x4xbf16, #tpu.memory_space<vmem>>, vector<1x4x4xbf16>
    %324 = vector.shape_cast %323 : vector<1x4x4xbf16> to vector<4x4xbf16>
    %cst_209 = arith.constant dense<0.000000e+00> : vector<16x4xf32>
    %325 = tpu.matmul %322, %324, %cst_209 {dimension_numbers = #tpu.dot_dimension_numbers<[1], [0], [0], [1], [0, 0, 1, 1], [], []>} : vector<16x4xbf16>, vector<4x4xbf16>, vector<16x4xf32> -> vector<16x4xf32>
    %326 = arith.addf %320, %325 : vector<16x4xf32>
    %327 = vector.extract_strided_slice %4 {offsets = [5, 1, 0], sizes = [1, 16, 4], strides = [1, 1, 1]} : vector<10x18x4xbf16> to vector<1x16x4xbf16>
    %328 = vector.shape_cast %327 : vector<1x16x4xbf16> to vector<16x4xbf16>
    %c1_210 = arith.constant 1 : index
    %c0_211 = arith.constant 0 : index
    %c0_212 = arith.constant 0 : index
    %329 = vector.load %arg3[%c1_210, %c0_211, %c0_212] : memref<9x4x4xbf16, #tpu.memory_space<vmem>>, vector<1x4x4xbf16>
    %330 = vector.shape_cast %329 : vector<1x4x4xbf16> to vector<4x4xbf16>
    %cst_213 = arith.constant dense<0.000000e+00> : vector<16x4xf32>
    %331 = tpu.matmul %328, %330, %cst_213 {dimension_numbers = #tpu.dot_dimension_numbers<[1], [0], [0], [1], [0, 0, 1, 1], [], []>} : vector<16x4xbf16>, vector<4x4xbf16>, vector<16x4xf32> -> vector<16x4xf32>
    %332 = arith.addf %326, %331 : vector<16x4xf32>
    %333 = vector.extract_strided_slice %4 {offsets = [5, 2, 0], sizes = [1, 16, 4], strides = [1, 1, 1]} : vector<10x18x4xbf16> to vector<1x16x4xbf16>
    %334 = vector.shape_cast %333 : vector<1x16x4xbf16> to vector<16x4xbf16>
    %c2_214 = arith.constant 2 : index
    %c0_215 = arith.constant 0 : index
    %c0_216 = arith.constant 0 : index
    %335 = vector.load %arg3[%c2_214, %c0_215, %c0_216] : memref<9x4x4xbf16, #tpu.memory_space<vmem>>, vector<1x4x4xbf16>
    %336 = vector.shape_cast %335 : vector<1x4x4xbf16> to vector<4x4xbf16>
    %cst_217 = arith.constant dense<0.000000e+00> : vector<16x4xf32>
    %337 = tpu.matmul %334, %336, %cst_217 {dimension_numbers = #tpu.dot_dimension_numbers<[1], [0], [0], [1], [0, 0, 1, 1], [], []>} : vector<16x4xbf16>, vector<4x4xbf16>, vector<16x4xf32> -> vector<16x4xf32>
    %338 = arith.addf %332, %337 : vector<16x4xf32>
    %339 = vector.extract_strided_slice %4 {offsets = [6, 0, 0], sizes = [1, 16, 4], strides = [1, 1, 1]} : vector<10x18x4xbf16> to vector<1x16x4xbf16>
    %340 = vector.shape_cast %339 : vector<1x16x4xbf16> to vector<16x4xbf16>
    %c3_218 = arith.constant 3 : index
    %c0_219 = arith.constant 0 : index
    %c0_220 = arith.constant 0 : index
    %341 = vector.load %arg3[%c3_218, %c0_219, %c0_220] : memref<9x4x4xbf16, #tpu.memory_space<vmem>>, vector<1x4x4xbf16>
    %342 = vector.shape_cast %341 : vector<1x4x4xbf16> to vector<4x4xbf16>
    %cst_221 = arith.constant dense<0.000000e+00> : vector<16x4xf32>
    %343 = tpu.matmul %340, %342, %cst_221 {dimension_numbers = #tpu.dot_dimension_numbers<[1], [0], [0], [1], [0, 0, 1, 1], [], []>} : vector<16x4xbf16>, vector<4x4xbf16>, vector<16x4xf32> -> vector<16x4xf32>
    %344 = arith.addf %338, %343 : vector<16x4xf32>
    %345 = vector.extract_strided_slice %4 {offsets = [6, 1, 0], sizes = [1, 16, 4], strides = [1, 1, 1]} : vector<10x18x4xbf16> to vector<1x16x4xbf16>
    %346 = vector.shape_cast %345 : vector<1x16x4xbf16> to vector<16x4xbf16>
    %c4_222 = arith.constant 4 : index
    %c0_223 = arith.constant 0 : index
    %c0_224 = arith.constant 0 : index
    %347 = vector.load %arg3[%c4_222, %c0_223, %c0_224] : memref<9x4x4xbf16, #tpu.memory_space<vmem>>, vector<1x4x4xbf16>
    %348 = vector.shape_cast %347 : vector<1x4x4xbf16> to vector<4x4xbf16>
    %cst_225 = arith.constant dense<0.000000e+00> : vector<16x4xf32>
    %349 = tpu.matmul %346, %348, %cst_225 {dimension_numbers = #tpu.dot_dimension_numbers<[1], [0], [0], [1], [0, 0, 1, 1], [], []>} : vector<16x4xbf16>, vector<4x4xbf16>, vector<16x4xf32> -> vector<16x4xf32>
    %350 = arith.addf %344, %349 : vector<16x4xf32>
    %351 = vector.extract_strided_slice %4 {offsets = [6, 2, 0], sizes = [1, 16, 4], strides = [1, 1, 1]} : vector<10x18x4xbf16> to vector<1x16x4xbf16>
    %352 = vector.shape_cast %351 : vector<1x16x4xbf16> to vector<16x4xbf16>
    %c5_226 = arith.constant 5 : index
    %c0_227 = arith.constant 0 : index
    %c0_228 = arith.constant 0 : index
    %353 = vector.load %arg3[%c5_226, %c0_227, %c0_228] : memref<9x4x4xbf16, #tpu.memory_space<vmem>>, vector<1x4x4xbf16>
    %354 = vector.shape_cast %353 : vector<1x4x4xbf16> to vector<4x4xbf16>
    %cst_229 = arith.constant dense<0.000000e+00> : vector<16x4xf32>
    %355 = tpu.matmul %352, %354, %cst_229 {dimension_numbers = #tpu.dot_dimension_numbers<[1], [0], [0], [1], [0, 0, 1, 1], [], []>} : vector<16x4xbf16>, vector<4x4xbf16>, vector<16x4xf32> -> vector<16x4xf32>
    %356 = arith.addf %350, %355 : vector<16x4xf32>
    %357 = vector.extract_strided_slice %4 {offsets = [7, 0, 0], sizes = [1, 16, 4], strides = [1, 1, 1]} : vector<10x18x4xbf16> to vector<1x16x4xbf16>
    %358 = vector.shape_cast %357 : vector<1x16x4xbf16> to vector<16x4xbf16>
    %c6_230 = arith.constant 6 : index
    %c0_231 = arith.constant 0 : index
    %c0_232 = arith.constant 0 : index
    %359 = vector.load %arg3[%c6_230, %c0_231, %c0_232] : memref<9x4x4xbf16, #tpu.memory_space<vmem>>, vector<1x4x4xbf16>
    %360 = vector.shape_cast %359 : vector<1x4x4xbf16> to vector<4x4xbf16>
    %cst_233 = arith.constant dense<0.000000e+00> : vector<16x4xf32>
    %361 = tpu.matmul %358, %360, %cst_233 {dimension_numbers = #tpu.dot_dimension_numbers<[1], [0], [0], [1], [0, 0, 1, 1], [], []>} : vector<16x4xbf16>, vector<4x4xbf16>, vector<16x4xf32> -> vector<16x4xf32>
    %362 = arith.addf %356, %361 : vector<16x4xf32>
    %363 = vector.extract_strided_slice %4 {offsets = [7, 1, 0], sizes = [1, 16, 4], strides = [1, 1, 1]} : vector<10x18x4xbf16> to vector<1x16x4xbf16>
    %364 = vector.shape_cast %363 : vector<1x16x4xbf16> to vector<16x4xbf16>
    %c7_234 = arith.constant 7 : index
    %c0_235 = arith.constant 0 : index
    %c0_236 = arith.constant 0 : index
    %365 = vector.load %arg3[%c7_234, %c0_235, %c0_236] : memref<9x4x4xbf16, #tpu.memory_space<vmem>>, vector<1x4x4xbf16>
    %366 = vector.shape_cast %365 : vector<1x4x4xbf16> to vector<4x4xbf16>
    %cst_237 = arith.constant dense<0.000000e+00> : vector<16x4xf32>
    %367 = tpu.matmul %364, %366, %cst_237 {dimension_numbers = #tpu.dot_dimension_numbers<[1], [0], [0], [1], [0, 0, 1, 1], [], []>} : vector<16x4xbf16>, vector<4x4xbf16>, vector<16x4xf32> -> vector<16x4xf32>
    %368 = arith.addf %362, %367 : vector<16x4xf32>
    %369 = vector.extract_strided_slice %4 {offsets = [7, 2, 0], sizes = [1, 16, 4], strides = [1, 1, 1]} : vector<10x18x4xbf16> to vector<1x16x4xbf16>
    %370 = vector.shape_cast %369 : vector<1x16x4xbf16> to vector<16x4xbf16>
    %c8_238 = arith.constant 8 : index
    %c0_239 = arith.constant 0 : index
    %c0_240 = arith.constant 0 : index
    %371 = vector.load %arg3[%c8_238, %c0_239, %c0_240] : memref<9x4x4xbf16, #tpu.memory_space<vmem>>, vector<1x4x4xbf16>
    %372 = vector.shape_cast %371 : vector<1x4x4xbf16> to vector<4x4xbf16>
    %cst_241 = arith.constant dense<0.000000e+00> : vector<16x4xf32>
    %373 = tpu.matmul %370, %372, %cst_241 {dimension_numbers = #tpu.dot_dimension_numbers<[1], [0], [0], [1], [0, 0, 1, 1], [], []>} : vector<16x4xbf16>, vector<4x4xbf16>, vector<16x4xf32> -> vector<16x4xf32>
    %374 = arith.addf %368, %373 : vector<16x4xf32>
    %375 = vector.broadcast %1 : vector<1x4xf32> to vector<16x4xf32>
    %376 = arith.addf %374, %375 : vector<16x4xf32>
    %cst_242 = arith.constant 0.000000e+00 : f32
    %377 = vector.broadcast %cst_242 : f32 to vector<16x4xf32>
    %378 = arith.maximumf %376, %377 : vector<16x4xf32>
    %379 = arith.truncf %378 : vector<16x4xf32> to vector<16x4xbf16>
    %c0_243 = arith.constant 0 : index
    %c5_244 = arith.constant 5 : index
    %c0_245 = arith.constant 0 : index
    %c0_246 = arith.constant 0 : index
    %380 = vector.load %arg5[%c0_243, %c5_244, %c0_245, %c0_246] : memref<1x8x16x4xbf16, #tpu.memory_space<vmem>>, vector<1x1x16x4xbf16>
    %381 = vector.shape_cast %380 : vector<1x1x16x4xbf16> to vector<16x4xbf16>
    %382 = vector.shape_cast %379 : vector<16x4xbf16> to vector<1x1x16x4xbf16>
    tpu.vector_store %arg5[%c0_243, %c5_244, %c0_245, %c0_246], %382 {strides = array<i32>} : memref<1x8x16x4xbf16, #tpu.memory_space<vmem>>, vector<1x1x16x4xbf16>,
    %cst_247 = arith.constant 0.000000e+00 : f32
    %383 = vector.broadcast %cst_247 : f32 to vector<16x4xf32>
    %384 = vector.extract_strided_slice %4 {offsets = [6, 0, 0], sizes = [1, 16, 4], strides = [1, 1, 1]} : vector<10x18x4xbf16> to vector<1x16x4xbf16>
    %385 = vector.shape_cast %384 : vector<1x16x4xbf16> to vector<16x4xbf16>
    %c0_248 = arith.constant 0 : index
    %c0_249 = arith.constant 0 : index
    %c0_250 = arith.constant 0 : index
    %386 = vector.load %arg3[%c0_248, %c0_249, %c0_250] : memref<9x4x4xbf16, #tpu.memory_space<vmem>>, vector<1x4x4xbf16>
    %387 = vector.shape_cast %386 : vector<1x4x4xbf16> to vector<4x4xbf16>
    %cst_251 = arith.constant dense<0.000000e+00> : vector<16x4xf32>
    %388 = tpu.matmul %385, %387, %cst_251 {dimension_numbers = #tpu.dot_dimension_numbers<[1], [0], [0], [1], [0, 0, 1, 1], [], []>} : vector<16x4xbf16>, vector<4x4xbf16>, vector<16x4xf32> -> vector<16x4xf32>
    %389 = arith.addf %383, %388 : vector<16x4xf32>
    %390 = vector.extract_strided_slice %4 {offsets = [6, 1, 0], sizes = [1, 16, 4], strides = [1, 1, 1]} : vector<10x18x4xbf16> to vector<1x16x4xbf16>
    %391 = vector.shape_cast %390 : vector<1x16x4xbf16> to vector<16x4xbf16>
    %c1_252 = arith.constant 1 : index
    %c0_253 = arith.constant 0 : index
    %c0_254 = arith.constant 0 : index
    %392 = vector.load %arg3[%c1_252, %c0_253, %c0_254] : memref<9x4x4xbf16, #tpu.memory_space<vmem>>, vector<1x4x4xbf16>
    %393 = vector.shape_cast %392 : vector<1x4x4xbf16> to vector<4x4xbf16>
    %cst_255 = arith.constant dense<0.000000e+00> : vector<16x4xf32>
    %394 = tpu.matmul %391, %393, %cst_255 {dimension_numbers = #tpu.dot_dimension_numbers<[1], [0], [0], [1], [0, 0, 1, 1], [], []>} : vector<16x4xbf16>, vector<4x4xbf16>, vector<16x4xf32> -> vector<16x4xf32>
    %395 = arith.addf %389, %394 : vector<16x4xf32>
    %396 = vector.extract_strided_slice %4 {offsets = [6, 2, 0], sizes = [1, 16, 4], strides = [1, 1, 1]} : vector<10x18x4xbf16> to vector<1x16x4xbf16>
    %397 = vector.shape_cast %396 : vector<1x16x4xbf16> to vector<16x4xbf16>
    %c2_256 = arith.constant 2 : index
    %c0_257 = arith.constant 0 : index
    %c0_258 = arith.constant 0 : index
    %398 = vector.load %arg3[%c2_256, %c0_257, %c0_258] : memref<9x4x4xbf16, #tpu.memory_space<vmem>>, vector<1x4x4xbf16>
    %399 = vector.shape_cast %398 : vector<1x4x4xbf16> to vector<4x4xbf16>
    %cst_259 = arith.constant dense<0.000000e+00> : vector<16x4xf32>
    %400 = tpu.matmul %397, %399, %cst_259 {dimension_numbers = #tpu.dot_dimension_numbers<[1], [0], [0], [1], [0, 0, 1, 1], [], []>} : vector<16x4xbf16>, vector<4x4xbf16>, vector<16x4xf32> -> vector<16x4xf32>
    %401 = arith.addf %395, %400 : vector<16x4xf32>
    %402 = vector.extract_strided_slice %4 {offsets = [7, 0, 0], sizes = [1, 16, 4], strides = [1, 1, 1]} : vector<10x18x4xbf16> to vector<1x16x4xbf16>
    %403 = vector.shape_cast %402 : vector<1x16x4xbf16> to vector<16x4xbf16>
    %c3_260 = arith.constant 3 : index
    %c0_261 = arith.constant 0 : index
    %c0_262 = arith.constant 0 : index
    %404 = vector.load %arg3[%c3_260, %c0_261, %c0_262] : memref<9x4x4xbf16, #tpu.memory_space<vmem>>, vector<1x4x4xbf16>
    %405 = vector.shape_cast %404 : vector<1x4x4xbf16> to vector<4x4xbf16>
    %cst_263 = arith.constant dense<0.000000e+00> : vector<16x4xf32>
    %406 = tpu.matmul %403, %405, %cst_263 {dimension_numbers = #tpu.dot_dimension_numbers<[1], [0], [0], [1], [0, 0, 1, 1], [], []>} : vector<16x4xbf16>, vector<4x4xbf16>, vector<16x4xf32> -> vector<16x4xf32>
    %407 = arith.addf %401, %406 : vector<16x4xf32>
    %408 = vector.extract_strided_slice %4 {offsets = [7, 1, 0], sizes = [1, 16, 4], strides = [1, 1, 1]} : vector<10x18x4xbf16> to vector<1x16x4xbf16>
    %409 = vector.shape_cast %408 : vector<1x16x4xbf16> to vector<16x4xbf16>
    %c4_264 = arith.constant 4 : index
    %c0_265 = arith.constant 0 : index
    %c0_266 = arith.constant 0 : index
    %410 = vector.load %arg3[%c4_264, %c0_265, %c0_266] : memref<9x4x4xbf16, #tpu.memory_space<vmem>>, vector<1x4x4xbf16>
    %411 = vector.shape_cast %410 : vector<1x4x4xbf16> to vector<4x4xbf16>
    %cst_267 = arith.constant dense<0.000000e+00> : vector<16x4xf32>
    %412 = tpu.matmul %409, %411, %cst_267 {dimension_numbers = #tpu.dot_dimension_numbers<[1], [0], [0], [1], [0, 0, 1, 1], [], []>} : vector<16x4xbf16>, vector<4x4xbf16>, vector<16x4xf32> -> vector<16x4xf32>
    %413 = arith.addf %407, %412 : vector<16x4xf32>
    %414 = vector.extract_strided_slice %4 {offsets = [7, 2, 0], sizes = [1, 16, 4], strides = [1, 1, 1]} : vector<10x18x4xbf16> to vector<1x16x4xbf16>
    %415 = vector.shape_cast %414 : vector<1x16x4xbf16> to vector<16x4xbf16>
    %c5_268 = arith.constant 5 : index
    %c0_269 = arith.constant 0 : index
    %c0_270 = arith.constant 0 : index
    %416 = vector.load %arg3[%c5_268, %c0_269, %c0_270] : memref<9x4x4xbf16, #tpu.memory_space<vmem>>, vector<1x4x4xbf16>
    %417 = vector.shape_cast %416 : vector<1x4x4xbf16> to vector<4x4xbf16>
    %cst_271 = arith.constant dense<0.000000e+00> : vector<16x4xf32>
    %418 = tpu.matmul %415, %417, %cst_271 {dimension_numbers = #tpu.dot_dimension_numbers<[1], [0], [0], [1], [0, 0, 1, 1], [], []>} : vector<16x4xbf16>, vector<4x4xbf16>, vector<16x4xf32> -> vector<16x4xf32>
    %419 = arith.addf %413, %418 : vector<16x4xf32>
    %420 = vector.extract_strided_slice %4 {offsets = [8, 0, 0], sizes = [1, 16, 4], strides = [1, 1, 1]} : vector<10x18x4xbf16> to vector<1x16x4xbf16>
    %421 = vector.shape_cast %420 : vector<1x16x4xbf16> to vector<16x4xbf16>
    %c6_272 = arith.constant 6 : index
    %c0_273 = arith.constant 0 : index
    %c0_274 = arith.constant 0 : index
    %422 = vector.load %arg3[%c6_272, %c0_273, %c0_274] : memref<9x4x4xbf16, #tpu.memory_space<vmem>>, vector<1x4x4xbf16>
    %423 = vector.shape_cast %422 : vector<1x4x4xbf16> to vector<4x4xbf16>
    %cst_275 = arith.constant dense<0.000000e+00> : vector<16x4xf32>
    %424 = tpu.matmul %421, %423, %cst_275 {dimension_numbers = #tpu.dot_dimension_numbers<[1], [0], [0], [1], [0, 0, 1, 1], [], []>} : vector<16x4xbf16>, vector<4x4xbf16>, vector<16x4xf32> -> vector<16x4xf32>
    %425 = arith.addf %419, %424 : vector<16x4xf32>
    %426 = vector.extract_strided_slice %4 {offsets = [8, 1, 0], sizes = [1, 16, 4], strides = [1, 1, 1]} : vector<10x18x4xbf16> to vector<1x16x4xbf16>
    %427 = vector.shape_cast %426 : vector<1x16x4xbf16> to vector<16x4xbf16>
    %c7_276 = arith.constant 7 : index
    %c0_277 = arith.constant 0 : index
    %c0_278 = arith.constant 0 : index
    %428 = vector.load %arg3[%c7_276, %c0_277, %c0_278] : memref<9x4x4xbf16, #tpu.memory_space<vmem>>, vector<1x4x4xbf16>
    %429 = vector.shape_cast %428 : vector<1x4x4xbf16> to vector<4x4xbf16>
    %cst_279 = arith.constant dense<0.000000e+00> : vector<16x4xf32>
    %430 = tpu.matmul %427, %429, %cst_279 {dimension_numbers = #tpu.dot_dimension_numbers<[1], [0], [0], [1], [0, 0, 1, 1], [], []>} : vector<16x4xbf16>, vector<4x4xbf16>, vector<16x4xf32> -> vector<16x4xf32>
    %431 = arith.addf %425, %430 : vector<16x4xf32>
    %432 = vector.extract_strided_slice %4 {offsets = [8, 2, 0], sizes = [1, 16, 4], strides = [1, 1, 1]} : vector<10x18x4xbf16> to vector<1x16x4xbf16>
    %433 = vector.shape_cast %432 : vector<1x16x4xbf16> to vector<16x4xbf16>
    %c8_280 = arith.constant 8 : index
    %c0_281 = arith.constant 0 : index
    %c0_282 = arith.constant 0 : index
    %434 = vector.load %arg3[%c8_280, %c0_281, %c0_282] : memref<9x4x4xbf16, #tpu.memory_space<vmem>>, vector<1x4x4xbf16>
    %435 = vector.shape_cast %434 : vector<1x4x4xbf16> to vector<4x4xbf16>
    %cst_283 = arith.constant dense<0.000000e+00> : vector<16x4xf32>
    %436 = tpu.matmul %433, %435, %cst_283 {dimension_numbers = #tpu.dot_dimension_numbers<[1], [0], [0], [1], [0, 0, 1, 1], [], []>} : vector<16x4xbf16>, vector<4x4xbf16>, vector<16x4xf32> -> vector<16x4xf32>
    %437 = arith.addf %431, %436 : vector<16x4xf32>
    %438 = vector.broadcast %1 : vector<1x4xf32> to vector<16x4xf32>
    %439 = arith.addf %437, %438 : vector<16x4xf32>
    %cst_284 = arith.constant 0.000000e+00 : f32
    %440 = vector.broadcast %cst_284 : f32 to vector<16x4xf32>
    %441 = arith.maximumf %439, %440 : vector<16x4xf32>
    %442 = arith.truncf %441 : vector<16x4xf32> to vector<16x4xbf16>
    %c0_285 = arith.constant 0 : index
    %c6_286 = arith.constant 6 : index
    %c0_287 = arith.constant 0 : index
    %c0_288 = arith.constant 0 : index
    %443 = vector.load %arg5[%c0_285, %c6_286, %c0_287, %c0_288] : memref<1x8x16x4xbf16, #tpu.memory_space<vmem>>, vector<1x1x16x4xbf16>
    %444 = vector.shape_cast %443 : vector<1x1x16x4xbf16> to vector<16x4xbf16>
    %445 = vector.shape_cast %442 : vector<16x4xbf16> to vector<1x1x16x4xbf16>
    tpu.vector_store %arg5[%c0_285, %c6_286, %c0_287, %c0_288], %445 {strides = array<i32>} : memref<1x8x16x4xbf16, #tpu.memory_space<vmem>>, vector<1x1x16x4xbf16>,
    %cst_289 = arith.constant 0.000000e+00 : f32
    %446 = vector.broadcast %cst_289 : f32 to vector<16x4xf32>
    %447 = vector.extract_strided_slice %4 {offsets = [7, 0, 0], sizes = [1, 16, 4], strides = [1, 1, 1]} : vector<10x18x4xbf16> to vector<1x16x4xbf16>
    %448 = vector.shape_cast %447 : vector<1x16x4xbf16> to vector<16x4xbf16>
    %c0_290 = arith.constant 0 : index
    %c0_291 = arith.constant 0 : index
    %c0_292 = arith.constant 0 : index
    %449 = vector.load %arg3[%c0_290, %c0_291, %c0_292] : memref<9x4x4xbf16, #tpu.memory_space<vmem>>, vector<1x4x4xbf16>
    %450 = vector.shape_cast %449 : vector<1x4x4xbf16> to vector<4x4xbf16>
    %cst_293 = arith.constant dense<0.000000e+00> : vector<16x4xf32>
    %451 = tpu.matmul %448, %450, %cst_293 {dimension_numbers = #tpu.dot_dimension_numbers<[1], [0], [0], [1], [0, 0, 1, 1], [], []>} : vector<16x4xbf16>, vector<4x4xbf16>, vector<16x4xf32> -> vector<16x4xf32>
    %452 = arith.addf %446, %451 : vector<16x4xf32>
    %453 = vector.extract_strided_slice %4 {offsets = [7, 1, 0], sizes = [1, 16, 4], strides = [1, 1, 1]} : vector<10x18x4xbf16> to vector<1x16x4xbf16>
    %454 = vector.shape_cast %453 : vector<1x16x4xbf16> to vector<16x4xbf16>
    %c1_294 = arith.constant 1 : index
    %c0_295 = arith.constant 0 : index
    %c0_296 = arith.constant 0 : index
    %455 = vector.load %arg3[%c1_294, %c0_295, %c0_296] : memref<9x4x4xbf16, #tpu.memory_space<vmem>>, vector<1x4x4xbf16>
    %456 = vector.shape_cast %455 : vector<1x4x4xbf16> to vector<4x4xbf16>
    %cst_297 = arith.constant dense<0.000000e+00> : vector<16x4xf32>
    %457 = tpu.matmul %454, %456, %cst_297 {dimension_numbers = #tpu.dot_dimension_numbers<[1], [0], [0], [1], [0, 0, 1, 1], [], []>} : vector<16x4xbf16>, vector<4x4xbf16>, vector<16x4xf32> -> vector<16x4xf32>
    %458 = arith.addf %452, %457 : vector<16x4xf32>
    %459 = vector.extract_strided_slice %4 {offsets = [7, 2, 0], sizes = [1, 16, 4], strides = [1, 1, 1]} : vector<10x18x4xbf16> to vector<1x16x4xbf16>
    %460 = vector.shape_cast %459 : vector<1x16x4xbf16> to vector<16x4xbf16>
    %c2_298 = arith.constant 2 : index
    %c0_299 = arith.constant 0 : index
    %c0_300 = arith.constant 0 : index
    %461 = vector.load %arg3[%c2_298, %c0_299, %c0_300] : memref<9x4x4xbf16, #tpu.memory_space<vmem>>, vector<1x4x4xbf16>
    %462 = vector.shape_cast %461 : vector<1x4x4xbf16> to vector<4x4xbf16>
    %cst_301 = arith.constant dense<0.000000e+00> : vector<16x4xf32>
    %463 = tpu.matmul %460, %462, %cst_301 {dimension_numbers = #tpu.dot_dimension_numbers<[1], [0], [0], [1], [0, 0, 1, 1], [], []>} : vector<16x4xbf16>, vector<4x4xbf16>, vector<16x4xf32> -> vector<16x4xf32>
    %464 = arith.addf %458, %463 : vector<16x4xf32>
    %465 = vector.extract_strided_slice %4 {offsets = [8, 0, 0], sizes = [1, 16, 4], strides = [1, 1, 1]} : vector<10x18x4xbf16> to vector<1x16x4xbf16>
    %466 = vector.shape_cast %465 : vector<1x16x4xbf16> to vector<16x4xbf16>
    %c3_302 = arith.constant 3 : index
    %c0_303 = arith.constant 0 : index
    %c0_304 = arith.constant 0 : index
    %467 = vector.load %arg3[%c3_302, %c0_303, %c0_304] : memref<9x4x4xbf16, #tpu.memory_space<vmem>>, vector<1x4x4xbf16>
    %468 = vector.shape_cast %467 : vector<1x4x4xbf16> to vector<4x4xbf16>
    %cst_305 = arith.constant dense<0.000000e+00> : vector<16x4xf32>
    %469 = tpu.matmul %466, %468, %cst_305 {dimension_numbers = #tpu.dot_dimension_numbers<[1], [0], [0], [1], [0, 0, 1, 1], [], []>} : vector<16x4xbf16>, vector<4x4xbf16>, vector<16x4xf32> -> vector<16x4xf32>
    %470 = arith.addf %464, %469 : vector<16x4xf32>
    %471 = vector.extract_strided_slice %4 {offsets = [8, 1, 0], sizes = [1, 16, 4], strides = [1, 1, 1]} : vector<10x18x4xbf16> to vector<1x16x4xbf16>
    %472 = vector.shape_cast %471 : vector<1x16x4xbf16> to vector<16x4xbf16>
    %c4_306 = arith.constant 4 : index
    %c0_307 = arith.constant 0 : index
    %c0_308 = arith.constant 0 : index
    %473 = vector.load %arg3[%c4_306, %c0_307, %c0_308] : memref<9x4x4xbf16, #tpu.memory_space<vmem>>, vector<1x4x4xbf16>
    %474 = vector.shape_cast %473 : vector<1x4x4xbf16> to vector<4x4xbf16>
    %cst_309 = arith.constant dense<0.000000e+00> : vector<16x4xf32>
    %475 = tpu.matmul %472, %474, %cst_309 {dimension_numbers = #tpu.dot_dimension_numbers<[1], [0], [0], [1], [0, 0, 1, 1], [], []>} : vector<16x4xbf16>, vector<4x4xbf16>, vector<16x4xf32> -> vector<16x4xf32>
    %476 = arith.addf %470, %475 : vector<16x4xf32>
    %477 = vector.extract_strided_slice %4 {offsets = [8, 2, 0], sizes = [1, 16, 4], strides = [1, 1, 1]} : vector<10x18x4xbf16> to vector<1x16x4xbf16>
    %478 = vector.shape_cast %477 : vector<1x16x4xbf16> to vector<16x4xbf16>
    %c5_310 = arith.constant 5 : index
    %c0_311 = arith.constant 0 : index
    %c0_312 = arith.constant 0 : index
    %479 = vector.load %arg3[%c5_310, %c0_311, %c0_312] : memref<9x4x4xbf16, #tpu.memory_space<vmem>>, vector<1x4x4xbf16>
    %480 = vector.shape_cast %479 : vector<1x4x4xbf16> to vector<4x4xbf16>
    %cst_313 = arith.constant dense<0.000000e+00> : vector<16x4xf32>
    %481 = tpu.matmul %478, %480, %cst_313 {dimension_numbers = #tpu.dot_dimension_numbers<[1], [0], [0], [1], [0, 0, 1, 1], [], []>} : vector<16x4xbf16>, vector<4x4xbf16>, vector<16x4xf32> -> vector<16x4xf32>
    %482 = arith.addf %476, %481 : vector<16x4xf32>
    %483 = vector.extract_strided_slice %4 {offsets = [9, 0, 0], sizes = [1, 16, 4], strides = [1, 1, 1]} : vector<10x18x4xbf16> to vector<1x16x4xbf16>
    %484 = vector.shape_cast %483 : vector<1x16x4xbf16> to vector<16x4xbf16>
    %c6_314 = arith.constant 6 : index
    %c0_315 = arith.constant 0 : index
    %c0_316 = arith.constant 0 : index
    %485 = vector.load %arg3[%c6_314, %c0_315, %c0_316] : memref<9x4x4xbf16, #tpu.memory_space<vmem>>, vector<1x4x4xbf16>
    %486 = vector.shape_cast %485 : vector<1x4x4xbf16> to vector<4x4xbf16>
    %cst_317 = arith.constant dense<0.000000e+00> : vector<16x4xf32>
    %487 = tpu.matmul %484, %486, %cst_317 {dimension_numbers = #tpu.dot_dimension_numbers<[1], [0], [0], [1], [0, 0, 1, 1], [], []>} : vector<16x4xbf16>, vector<4x4xbf16>, vector<16x4xf32> -> vector<16x4xf32>
    %488 = arith.addf %482, %487 : vector<16x4xf32>
    %489 = vector.extract_strided_slice %4 {offsets = [9, 1, 0], sizes = [1, 16, 4], strides = [1, 1, 1]} : vector<10x18x4xbf16> to vector<1x16x4xbf16>
    %490 = vector.shape_cast %489 : vector<1x16x4xbf16> to vector<16x4xbf16>
    %c7_318 = arith.constant 7 : index
    %c0_319 = arith.constant 0 : index
    %c0_320 = arith.constant 0 : index
    %491 = vector.load %arg3[%c7_318, %c0_319, %c0_320] : memref<9x4x4xbf16, #tpu.memory_space<vmem>>, vector<1x4x4xbf16>
    %492 = vector.shape_cast %491 : vector<1x4x4xbf16> to vector<4x4xbf16>
    %cst_321 = arith.constant dense<0.000000e+00> : vector<16x4xf32>
    %493 = tpu.matmul %490, %492, %cst_321 {dimension_numbers = #tpu.dot_dimension_numbers<[1], [0], [0], [1], [0, 0, 1, 1], [], []>} : vector<16x4xbf16>, vector<4x4xbf16>, vector<16x4xf32> -> vector<16x4xf32>
    %494 = arith.addf %488, %493 : vector<16x4xf32>
    %495 = vector.extract_strided_slice %4 {offsets = [9, 2, 0], sizes = [1, 16, 4], strides = [1, 1, 1]} : vector<10x18x4xbf16> to vector<1x16x4xbf16>
    %496 = vector.shape_cast %495 : vector<1x16x4xbf16> to vector<16x4xbf16>
    %c8_322 = arith.constant 8 : index
    %c0_323 = arith.constant 0 : index
    %c0_324 = arith.constant 0 : index
    %497 = vector.load %arg3[%c8_322, %c0_323, %c0_324] : memref<9x4x4xbf16, #tpu.memory_space<vmem>>, vector<1x4x4xbf16>
    %498 = vector.shape_cast %497 : vector<1x4x4xbf16> to vector<4x4xbf16>
    %cst_325 = arith.constant dense<0.000000e+00> : vector<16x4xf32>
    %499 = tpu.matmul %496, %498, %cst_325 {dimension_numbers = #tpu.dot_dimension_numbers<[1], [0], [0], [1], [0, 0, 1, 1], [], []>} : vector<16x4xbf16>, vector<4x4xbf16>, vector<16x4xf32> -> vector<16x4xf32>
    %500 = arith.addf %494, %499 : vector<16x4xf32>
    %501 = vector.broadcast %1 : vector<1x4xf32> to vector<16x4xf32>
    %502 = arith.addf %500, %501 : vector<16x4xf32>
    %cst_326 = arith.constant 0.000000e+00 : f32
    %503 = vector.broadcast %cst_326 : f32 to vector<16x4xf32>
    %504 = arith.maximumf %502, %503 : vector<16x4xf32>
    %505 = arith.truncf %504 : vector<16x4xf32> to vector<16x4xbf16>
    %c0_327 = arith.constant 0 : index
    %c7_328 = arith.constant 7 : index
    %c0_329 = arith.constant 0 : index
    %c0_330 = arith.constant 0 : index
    %506 = vector.load %arg5[%c0_327, %c7_328, %c0_329, %c0_330] : memref<1x8x16x4xbf16, #tpu.memory_space<vmem>>, vector<1x1x16x4xbf16>
    %507 = vector.shape_cast %506 : vector<1x1x16x4xbf16> to vector<16x4xbf16>
    %508 = vector.shape_cast %505 : vector<16x4xbf16> to vector<1x1x16x4xbf16>
    tpu.vector_store %arg5[%c0_327, %c7_328, %c0_329, %c0_330], %508 {strides = array<i32>} : memref<1x8x16x4xbf16, #tpu.memory_space<vmem>>, vector<1x1x16x4xbf16>,
    return
  }
  func.func @transform_0(%arg0: i32, %arg1: i32) -> (i32, i32, i32, i32) {
    %c0_i32 = arith.constant 0 : i32
    %c0_i32_0 = arith.constant 0 : i32
    %c0_i32_1 = arith.constant 0 : i32
    %c0_i32_2 = arith.constant 0 : i32
    return %arg0, %c0_i32, %c0_i32_0, %c0_i32_1 : i32, i32, i32, i32
  }
  func.func @transform_1(%arg0: i32, %arg1: i32) -> (i32, i32, i32) {
    %c0_i32 = arith.constant 0 : i32
    %c0_i32_0 = arith.constant 0 : i32
    %c0_i32_1 = arith.constant 0 : i32
    %c0_i32_2 = arith.constant 0 : i32
    return %c0_i32, %c0_i32_0, %c0_i32_1 : i32, i32, i32
  }
  func.func @transform_2(%arg0: i32, %arg1: i32) -> (i32, i32) {
    %c0_i32 = arith.constant 0 : i32
    %c0_i32_0 = arith.constant 0 : i32
    %c0_i32_1 = arith.constant 0 : i32
    return %c0_i32, %c0_i32_0 : i32, i32
  }
  func.func @transform_3(%arg0: i32, %arg1: i32) -> (i32, i32, i32, i32) {
    %c0_i32 = arith.constant 0 : i32
    %c0_i32_0 = arith.constant 0 : i32
    %c0_i32_1 = arith.constant 0 : i32
    return %arg0, %arg1, %c0_i32, %c0_i32_0 : i32, i32, i32, i32
  }
}

</mosaic_0001>

<bundles_post_ra>
// kernel: tpu_custom_call.1
= control target key start
LH: loop header
LB: loop body
LE: loop exit
PB: predicated region body
PF: predicated region fallthrough
CT: control target
= control target key end

     0   :  { %s5044_s12 = smov 0   ;;  %s5046_s13 = smov 0   ;;  %s5910_s0 = inlined_call_operand.vmem [shape: bf16[2,18,18,4], index: 0, kind: input, shape index: {}]   ;;  %s5911_s1 = inlined_call_operand.vmem [shape: bf16[9,4,4], index: 1, kind: input, shape index: {}]   ;;  %s5912_s2 = inlined_call_operand.vmem [shape: f32[1,4], index: 2, kind: input, shape index: {}]   ;;  %s5913_s3 = inlined_call_operand.vmem [shape: bf16[2,16,16,4], index: 3, kind: output, shape index: {}]  }
   0x1   :  { %s5048_s14 = smov 0   ;;  %s5050_s15 = smov 0  }
   0x2   :  { %s5052_s16 = smov 0  }
   0x3 LB: > { %s22_s17 = sadd.s32 1, %s5012_s14  ;;  %s25_s18 = sadd.s32 1, %s5016_s15  ;;  %s5020_s16 = sphi %s5052_s16, %s13_s16   ;;  %s5016_s15 = sphi %s5050_s15, %s5917_s15   ;;  %s5012_s14 = sphi %s5048_s14, %s5916_s14   ;;  %s5008_s13 = sphi %s5046_s13, %s5915_s13   ;;  %s5004_s12 = sphi %s5044_s12, %s5914_s12  }
   0x4   : > { %p23_p0 = scmp.ge.s32.totalorder %s22_s17, 2  ;;  %p4128_p1 = scmp.ge.s32.totalorder %s5020_s16, 1 }
   0x5   : > { %p151_p2 = scmp.lt.s32.totalorder %s5020_s16, 5 }
   0x6   : > { %s5919_s17 = smov (%p23_p0, %s22_s17), 0  ;;  %s5921_s18 = smov (!%p23_p0, %s25_s18), %s5016_s15 }
   0x7   : > { %p152_p3 = pnand %p4128_p1, %p151_p2  ;;  %p27_p4 = scmp.ge.s32.totalorder %s5921_s18, 2 }
   0x8   : > { %v4137_v0 = vld [vmem:[%s5911_s1 + $0x2] sm:$0x3] (!%p152_p3)  ;;  %vm260_vm0 = vcmask (!%p152_p3), 1041408   ;;  %v232_v1 = vld [vmem:[%s5911_s1] sm:$0x3] (!%p152_p3)  ;;  %v5022_v2 = vmov (!%p152_p3), 0.0  }
   0x9   : > { %s5923_s18 = smov (%p27_p4, %s5921_s18), 0  ;;  %155 = sbr.rel (%p152_p3) target bundleno = 534 (0x216), region = 32 }
   0xa   : > { %4487 = vmatprep.subr.bf16.mxu0 (!%p152_p3), %v5022_v2  ;;  %4493 = vmatprep.subr.bf16.mxu1 (!%p152_p3), %v5022_v2  ;;  %v262_v3 = vsel (!%p152_p3), %vm260_vm0, %v4137_v0, 0  ;;  %v308_v4 = vsel (!%p152_p3), %vm260_vm0, %v232_v1, 0  ;;  %p180_p5 = scmp.lt.s32.totalorder (!%p152_p3), %s5008_s13, 1  ;;  %vm5023_vm1 = vmmov (!%p152_p3), 0   ;;  %s4326_s23 = smul.u32 (!%p152_p3), 96, %s5004_s12  ;;  %vm256_vm2 = vcmask (!%p152_p3), 31744  }
   0xb   : > { %4488 = vmatpush3.bf16.msra.mxu0 (!%p152_p3), %v262_v3  ;;  %4494 = vmatpush3.bf16.msra.mxu1 (!%p152_p3), %v308_v4  ;;  %v4144_v5 = vld [vmem:[%s5911_s1 + $0x6] sm:$0x3] (!%p152_p3)  ;;  %vm243_vm3 = vsmask.f32 (!%p152_p3), 7424  ;;  %v4142_v13 = vld [vmem:[%s5911_s1 + $0x4] sm:$0x3] (!%p152_p3) }
   0xc   : > { %4495 = vmatprep.mubr.msk.bf16.mxu1 (!%p152_p3), %vm5023_vm1, %v5022_v2  ;;  %4489 = vmatprep.mubr.msk.bf16.mxu0 (!%p152_p3), %vm5023_vm1, %v5022_v2  ;;  %v417_v7 = vsel (!%p152_p3), %vm260_vm0, %v4144_v5, 0  ;;  %v4150_v16 = vld [vmem:[%s5911_s1 + $0xa] sm:$0x3] (!%p152_p3)  ;;  %v361_v17 = vsel (!%p152_p3), %vm260_vm0, %v4142_v13, 0  ;;  %vm353_vm4 = vcmask (!%p152_p3), 1046528   ;;  %s4130_s10 = sshll.u32 (!%p152_p3), %s5004_s12, 3 }
   0xd   : > { %4499 = vmatprep.subr.bf16.mxu0 (!%p152_p3), %v5022_v2  ;;  %4505 = vmatprep.subr.bf16.mxu1 (!%p152_p3), %v5022_v2  ;;  %v536_v22 = vsel (!%p152_p3), %vm260_vm0, %v4150_v16, 0  ;;  %v4147_v26 = vld [vmem:[%s5911_s1 + $0x8] sm:$0x3] (!%p152_p3)  ;;  %v4155_v35 = vld [vmem:[%s5911_s1 + $0xe] sm:$0x3] (!%p152_p3)  ;;  %p188_p6 = scmp.lt.s32.totalorder (!%p152_p3), %s4130_s10, 15 }
   0xe   : > { %v482_v36 = vsel (!%p152_p3), %vm260_vm0, %v4147_v26, 0  ;;  %v657_v41 = vsel (!%p152_p3), %vm260_vm0, %v4155_v35, 0  ;;  %v4152_v44 = vld [vmem:[%s5911_s1 + $0xc] sm:$0x3] (!%p152_p3)  ;;  %v4163_v48 = vld [vmem:[%s5911_s1 + $0x2] sm:$0x3] (!%p152_p3) }
   0xf   : > { %v592_v49 = vsel (!%p152_p3), %vm260_vm0, %v4152_v44, 0  ;;  %v780_v51 = vsel (!%p152_p3), %vm260_vm0, %v4163_v48, 0  ;;  %v4158_v52 = vld [vmem:[%s5911_s1 + $0x10] sm:$0x3] (!%p152_p3)  ;;  %v4166_v53 = vld [vmem:[%s5911_s1 + $0x4] sm:$0x3] (!%p152_p3) }
  0x10   : > { %s5925_s13 = smov (!%p180_p5, %s5008_s13), 1  ;;  %v711_v54 = vsel %vm260_vm0, %v4158_v52, 0  ;;  %v869_v55 = vsel %vm260_vm0, %v4166_v53, 0  ;;  %v777_v58 = vld [vmem:[%s5911_s1] sm:$0x3]  ;;  %s5927_s10 = smov (!%p188_p6, %s4130_s10), 15 }
  0x11   : > { %s4919_s24 = smul.u32 216, %s5925_s13  ;;  %v4170_v60 = vld [vmem:[%s5911_s1 + $0x8] sm:$0x3]  ;;  %v824_v61 = vsel %vm260_vm0, %v777_v58, 0  ;;  %v4168_v63 = vld [vmem:[%s5911_s1 + $0x6] sm:$0x3] }
  0x12   : > { %v963_v62 = vsel %vm260_vm0, %v4170_v60, 0  ;;  %v4174_v0 = vld [vmem:[%s5911_s1 + $0xc] sm:$0x3]  ;;  %v916_v1 = vsel %vm260_vm0, %v4168_v63, 0  ;;  %v4172_v4 = vld [vmem:[%s5911_s1 + $0xa] sm:$0x3] }
  0x13   : > { %s184_s29 = scalar_lea.vmem %s5910_s0, %s4919_s24  ;;  %v1065_v3 = vsel %vm260_vm0, %v4174_v0, 0  ;;  %v4180_v5 = vld [vmem:[%s5911_s1 + $0x10] sm:$0x3]  ;;  %v4191_v26 = vld [vmem:[%s5911_s1 + $0x6] sm:$0x3]  ;;  %s4131_s21 = sshll.u32 %s5927_s10, 1 }
  0x14   : > { %s5102_s30 = scalar_lea.vmem %s184_s29, %s4326_s23  ;;  %v4214_v60 = vld [vmem:[%s5911_s1 + $0x6] sm:$0x3]  ;;  %v4218_v0 = vld [vmem:[%s5911_s1 + $0xa] sm:$0x3]  ;;  %s4132_s22 = sshll.u32 %s5925_s13, 5  ;;  %vm774_vm5 = vcmask 27648  }
  0x15   : > { %v4962_v6 = vld [vmem:[%s5102_s30] sm:$0xff]   ;;  %v4963_v8 = vld [vmem:[%s5102_s30 + $0x8] ss:$0 sps:$4 sm:$0x11]   ;;  %v5119_v18 = vld [vmem:[%s5102_s30 + $0xc] sm:$0xff]   ;;  %s192_s23 = sadd.s32 %s4132_s22, %s4131_s21 }
  0x16   : > { %4496 = vmatmul.mubr.msk.bf16.vlgmr.msra.gmra.mrb[0].mxu1 %vm256_vm2, %v4962_v6  ;;  %v245_v9 = vshrl.u32 %v4962_v6, 16  ;;  %v247_v10 = vshll.u32 %v4962_v6, 16  ;;  %v252_v11 = vshll.u32 %v4963_v8, 16  ;;  %v4965_v20 = vld [vmem:[%s5102_s30 + $0x14] ss:$0 sps:$4 sm:$0x11]  }
  0x17   : > { %4506 = vmatpush3.bf16.msra.mxu1 %v417_v7  ;;  %4507 = vmatprep.mubr.msk.bf16.mxu1 %vm5023_vm1, %v5022_v2  ;;  %v5124_v21 = vld [vmem:[%s5102_s30 + $0x18] sm:$0xff]   ;;  %v354_v23 = vrot.slane %v4962_v6, 1  ;;  %v355_v24 = vrot.slane %v4963_v8, 1  ;;  %v469_v25 = vshll.u32 %v5119_v18, 16  ;;  %v529_v27 = vrot.slane %v5119_v18, 1  ;;  %v5245_v7 = vld [vmem:[%s5102_s30 + $0x24] sm:$0xff]  }
  0x18   : > { %v249_v12 = vrot.slane %v247_v10, 1  ;;  %4517 = vmatprep.subr.bf16.mxu1 %v5022_v2  ;;  %v254_v14 = vrot.slane %v252_v11, 1  ;;  %v530_v28 = vrot.slane %v4965_v20, 1  ;;  %v4967_v29 = vld [vmem:[%s5102_s30 + $0x20] ss:$0 sps:$4 sm:$0x11]  }
  0x19   : > { %v644_v30 = vshll.u32 %v5124_v21, 16  ;;  %v356_v31 = vsel %vm353_vm4, %v354_v23, %v355_v24  ;;  %v467_v32 = vshrl.u32 %v5119_v18, 16  ;;  %v471_v33 = vrot.slane %v469_v25, 1  ;;  %v4969_v8 = vld [vmem:[%s5102_s30 + $0x2c] ss:$0 sps:$4 sm:$0x11]  }
  0x1a   : > { %v250_v15 = vor.u32 %v249_v12, %v245_v9  ;;  %v474_v34 = vshll.u32 %v4965_v20, 16  ;;  %v531_v37 = vsel %vm353_vm4, %v529_v27, %v530_v28  ;;  %v642_v38 = vshrl.u32 %v5124_v21, 16  ;;  %v4177_v11 = vld [vmem:[%s5911_s1 + $0xe] sm:$0x3]  ;;  %v4186_v24 = vld [vmem:[%s5911_s1 + $0x2] sm:$0x3] }
  0x1b   : > { %v646_v39 = vrot.slane %v644_v30, 1  ;;  %v649_v40 = vshll.u32 %v4967_v29, 16  ;;  %v472_v42 = vor.u32 %v471_v33, %v467_v32  ;;  %v704_v56 = vrot.slane %v5124_v21, 1  ;;  %v4195_v30 = vld [vmem:[%s5911_s1 + $0xa] sm:$0x3]  ;;  %s4133_s29 = sshll.u32 %s192_s23, 2 }
  0x1c   : > { %v255_v19 = vsel %vm243_vm3, %v250_v15, %v254_v14  ;;  %v476_v43 = vrot.slane %v474_v34, 1  ;;  %v705_v57 = vrot.slane %v4967_v29, 1  ;;  %v1010_v6 = vsel %vm260_vm0, %v4172_v4, 0  ;;  %v4189_v29 = vld [vmem:[%s5911_s1 + $0x4] sm:$0x3]  ;;  %v5433_v4 = vld [vmem:[%s5102_s30 + $0x3c] sm:$0xff]   ;;  %s5791_s6 = scalar_lea.vmem %s5913_s3, %s4133_s29 }
  0x1d   : > { %4490 = vmatmul.mubr.msk.bf16.vlgmr.msra.gmra.mrb[0].mxu0 %vm256_vm2, %v255_v19  ;;  %v647_v45 = vor.u32 %v646_v39, %v642_v38  ;;  %v651_v46 = vrot.slane %v649_v40, 1  ;;  %v1182_v9 = vsel %vm260_vm0, %v4180_v5, 0  ;;  %v1116_v10 = vshll.u32 %v5245_v7, 16  ;;  %v4193_v33 = vld [vmem:[%s5911_s1 + $0x8] sm:$0x3] }
  0x1e   : > { %4500 = vmatpush3.bf16.msra.mxu0 %v361_v17  ;;  %4501 = vmatprep.mubr.msk.bf16.mxu0 %vm5023_vm1, %v5022_v2  ;;  %v477_v47 = vsel %vm243_vm3, %v472_v42, %v476_v43  ;;  %v5203_v59 = vsel %vm353_vm4, %v704_v56, %v705_v57  ;;  %v1175_v12 = vrot.slane %v5245_v7, 1  ;;  %v1176_v13 = vrot.slane %v4969_v8, 1  ;;  %v1242_v17 = vld [vmem:[%s5911_s1] sm:$0x3]  ;;  %v4197_v42 = vld [vmem:[%s5911_s1 + $0xc] sm:$0x3] }
  0x1f   : > { %4508 = vmatmul.mubr.msk.bf16.vlgmr.msra.gmra.mrb[4].mxu1 %vm256_vm2, %v5119_v18  ;;  %4511 = vmatprep.subr.bf16.mxu0 %v5022_v2  ;;  %v5169_v50 = vsel %vm243_vm3, %v647_v45, %v651_v46  ;;  %v1114_v14 = vshrl.u32 %v5245_v7, 16  ;;  %v1118_v15 = vrot.slane %v1116_v10, 1  ;;  %v1121_v16 = vshll.u32 %v4969_v8, 16  ;;  %v4971_v34 = vld [vmem:[%s5102_s30 + $0x38] ss:$0 sps:$4 sm:$0x11]  }
  0x20   : > { %4518 = vmatpush3.bf16.msra.mxu1 %v536_v22  ;;  %4519 = vmatprep.mubr.msk.bf16.mxu1 %vm5023_vm1, %v5022_v2  ;;  %v5270_v19 = vsel %vm353_vm4, %v1175_v12, %v1176_v13  ;;  %v1289_v20 = vsel %vm260_vm0, %v1242_v17, 0  ;;  %v1245_v27 = vsel %vm260_vm0, %v4186_v24, 0  ;;  %v1381_v28 = vsel %vm260_vm0, %v4191_v26, 0  ;;  %v4209_v45 = vld [vmem:[%s5911_s1 + $0x2] sm:$0x3] }
  0x21   : > { %4529 = vmatprep.subr.bf16.mxu1 %v5022_v2  ;;  %v1119_v22 = vor.u32 %v1118_v15, %v1114_v14  ;;  %v1123_v23 = vrot.slane %v1121_v16, 1  ;;  %v1475_v32 = vsel %vm260_vm0, %v4195_v30, 0  ;;  %v1586_v40 = vshll.u32 %v4971_v34, 16  ;;  %v4216_v57 = vld [vmem:[%s5911_s1 + $0x8] sm:$0x3] }
  0x22   : > { %v1530_v46 = vsel %vm260_vm0, %v4197_v42, 0  ;;  %v1710_v48 = vsel %vm260_vm0, %v4209_v45, 0  ;;  %v4973_v5 = vld [vmem:[%s5102_s30 + $0x44] ss:$0 sps:$4 sm:$0x11]  }
  0x23   : > { %v5287_v25 = vsel %vm243_vm3, %v1119_v22, %v1123_v23  ;;  %v1588_v44 = vrot.slane %v1586_v40, 1  ;;  %v4223_v8 = vld [vmem:[%s5911_s1 + $0xe] sm:$0x3]  ;;  %v2106_v10 = vrot.slane %v4973_v5, 1  ;;  %v2051_v13 = vshll.u32 %v4973_v5, 16 }
  0x24   : > { %v2172_v14 = vld [vmem:[%s5911_s1] sm:$0x3]  ;;  %v2059_v15 = vsel %vm260_vm0, %v4223_v8, 0  ;;  %v4237_v23 = vld [vmem:[%s5911_s1 + $0x6] sm:$0x3] }
  0x25   : > { %4502 = vmatmul.mubr.msk.bf16.vlgmr.msra.gmra.mrb[4].mxu0 %vm256_vm2, %v356_v31  ;;  %v1334_v31 = vsel %vm260_vm0, %v4189_v29, 0  ;;  %v2219_v17 = vsel %vm260_vm0, %v2172_v14, 0  ;;  %v4235_v26 = vld [vmem:[%s5911_s1 + $0x4] sm:$0x3]  ;;  %v5500_v29 = vld [vmem:[%s5102_s30 + $0x48] sm:$0xff]  }
  0x26   : > { %4512 = vmatpush3.bf16.msra.mxu0 %v482_v36  ;;  %4513 = vmatprep.mubr.msk.bf16.mxu0 %vm5023_vm1, %v5022_v2  ;;  %v4200_v36 = vld [vmem:[%s5911_s1 + $0xe] sm:$0x3]  ;;  %v4255_v42 = vld [vmem:[%s5911_s1 + $0x2] sm:$0x3] }
  0x27   : > { %4520 = vmatmul.mubr.msk.bf16.vlgmr.msra.gmra.mrb[8].mxu1 %vm256_vm2, %v531_v37  ;;  %4523 = vmatprep.subr.bf16.mxu0 %v5022_v2  ;;  %v2640_v45 = vsel %vm260_vm0, %v4255_v42, 0  ;;  %v4269_v5 = vld [vmem:[%s5911_s1 + $0xe] sm:$0x3] }
  0x28   : > { %4530 = vmatpush3.bf16.msra.mxu1 %v657_v41  ;;  %4531 = vmatprep.mubr.msk.bf16.mxu1 %vm5023_vm1, %v5022_v2  ;;  %v1594_v41 = vsel %vm260_vm0, %v4200_v36, 0 }
  0x29   : > { %4541 = vmatprep.subr.bf16.mxu1 %v5022_v2 }
  0x2d   : > { %4514 = vmatmul.mubr.msk.bf16.vlgmr.msra.gmra.mrb[8].mxu0 %vm256_vm2, %v477_v47 }
  0x2e   : > { %4524 = vmatpush3.bf16.msra.mxu0 %v592_v49  ;;  %4525 = vmatprep.mubr.msk.bf16.mxu0 %vm5023_vm1, %v5022_v2  ;;  %v4203_v49 = vld [vmem:[%s5911_s1 + $0x10] sm:$0x3] }
  0x2f   : > { %4532 = vmatmul.mubr.msk.bf16.vlgmr.msra.gmra.mrb[12].mxu1 %vm256_vm2, %v5169_v50  ;;  %4535 = vmatprep.subr.bf16.mxu0 %v5022_v2 }
  0x30   : > { %4542 = vmatpush3.bf16.msra.mxu1 %v780_v51  ;;  %4543 = vmatprep.mubr.msk.bf16.mxu1 %vm5023_vm1, %v5022_v2  ;;  %v1647_v51 = vsel %vm260_vm0, %v4203_v49, 0 }
  0x31   : > { %4553 = vmatprep.subr.bf16.mxu1 %v5022_v2 }
  0x35   : > { %4526 = vmatmul.mubr.msk.bf16.vlgmr.msra.gmra.mrb[12].mxu0 %vm256_vm2, %v5124_v21 }
  0x36   : > { %4536 = vmatpush3.bf16.msra.mxu0 %v711_v54  ;;  %4537 = vmatprep.mubr.msk.bf16.mxu0 %vm5023_vm1, %v5022_v2  ;;  %v1641_v54 = vrot.slane %v4971_v34, 1 }
  0x37   : > { %4544 = vmatmul.mubr.msk.bf16.vlgmr.msra.gmra.mrb[16].mxu1 %vm256_vm2, %v477_v47  ;;  %4547 = vmatprep.subr.bf16.mxu0 %v5022_v2 }
  0x38   : > { %4554 = vmatpush3.bf16.msra.mxu1 %v869_v55  ;;  %4555 = vmatprep.mubr.msk.bf16.mxu1 %vm5023_vm1, %v5022_v2  ;;  %v1707_v55 = vld [vmem:[%s5911_s1] sm:$0x3] }
  0x39   : > { %4565 = vmatprep.subr.bf16.mxu1 %v5022_v2  ;;  %v1754_v58 = vsel %vm260_vm0, %v1707_v55, 0 }
  0x3d   : > { %4538 = vmatmul.mubr.msk.bf16.vlgmr.msra.gmra.mrb[16].mxu0 %vm256_vm2, %v5203_v59 }
  0x3e   : > { %4548 = vmatpush3.bf16.msra.mxu0 %v824_v61  ;;  %4549 = vmatprep.mubr.msk.bf16.mxu0 %vm5023_vm1, %v5022_v2  ;;  %v4220_v61 = vld [vmem:[%s5911_s1 + $0xc] sm:$0x3] }
  0x3f   : > { %4556 = vmatmul.mubr.msk.bf16.vlgmr.msra.gmra.mrb[20].mxu1 %vm256_vm2, %v531_v37  ;;  %4559 = vmatprep.subr.bf16.mxu0 %v5022_v2  ;;  %v1428_v37 = vsel %vm260_vm0, %v4193_v33, 0  ;;  %v1995_v63 = vsel %vm260_vm0, %v4220_v61, 0  ;;  %v4246_v33 = vld [vmem:[%s5911_s1 + $0xe] sm:$0x3]  ;;  %v4264_v61 = vld [vmem:[%s5911_s1 + $0xa] sm:$0x3] }
  0x40   : > { %4566 = vmatpush3.bf16.msra.mxu1 %v963_v62  ;;  %4567 = vmatprep.mubr.msk.bf16.mxu1 %vm5023_vm1, %v5022_v2  ;;  %v1846_v62 = vsel %vm260_vm0, %v4214_v60, 0 }
  0x41   : > { %4577 = vmatprep.subr.bf16.mxu1 %v5022_v2 }
  0x45   : > { %4550 = vmatmul.mubr.msk.bf16.vlgmr.msra.gmra.mrb[20].mxu0 %vm256_vm2, %v5119_v18  ;;  %v1129_v18 = vsel %vm260_vm0, %v4177_v11, 0  ;;  %v2044_v11 = vshrl.u32 %v5433_v4, 16 }
  0x46   : > { %4560 = vmatpush3.bf16.msra.mxu0 %v916_v1  ;;  %4561 = vmatprep.mubr.msk.bf16.mxu0 %vm5023_vm1, %v5022_v2  ;;  %v4226_v1 = vld [vmem:[%s5911_s1 + $0x10] sm:$0x3] }
  0x47   : > { %4568 = vmatmul.mubr.msk.bf16.vlgmr.msra.gmra.mrb[24].mxu1 %vm256_vm2, %v5169_v50  ;;  %4571 = vmatprep.subr.bf16.mxu0 %v5022_v2 }
  0x48   : > { %4578 = vmatpush3.bf16.msra.mxu1 %v1065_v3  ;;  %4579 = vmatprep.mubr.msk.bf16.mxu1 %vm5023_vm1, %v5022_v2  ;;  %v1940_v3 = vsel %vm260_vm0, %v4218_v0, 0  ;;  %v5621_v0 = vld [vmem:[%s5102_s30 + $0x54] sm:$0xff]  }
  0x49   : > { %4589 = vmatprep.subr.bf16.mxu1 %v5022_v2  ;;  %v2974_v8 = vshrl.u32 %v5621_v0, 16 }
  0x4d   : > { %4562 = vmatmul.mubr.msk.bf16.vlgmr.msra.gmra.mrb[24].mxu0 %vm256_vm2, %v5124_v21 }
  0x4e   : > { %4572 = vmatpush3.bf16.msra.mxu0 %v1010_v6  ;;  %4573 = vmatprep.mubr.msk.bf16.mxu0 %vm5023_vm1, %v5022_v2  ;;  %v2112_v6 = vsel %vm260_vm0, %v4226_v1, 0  ;;  %v4977_v1 = vld [vmem:[%s5102_s30 + $0x5c] ss:$0 sps:$4 sm:$0x11]  }
  0x4f   : > { %4580 = vmatmul.mubr.msk.bf16.vlgmr.msra.gmra.mrb[28].mxu1 %vm256_vm2, %v5245_v7  ;;  %4583 = vmatprep.subr.bf16.mxu0 %v5022_v2 }
  0x50   : > { %4590 = vmatpush3.bf16.msra.mxu1 %v1182_v9  ;;  %4591 = vmatprep.mubr.msk.bf16.mxu1 %vm5023_vm1, %v5022_v2  ;;  %v2105_v9 = vrot.slane %v5433_v4, 1 }
  0x51   : > { %4601 = vmatprep.subr.bf16.mxu1 %v5022_v2 }
  0x52   : > { %v5458_v16 = vsel %vm353_vm4, %v2105_v9, %v2106_v10  ;;  %v2981_v10 = vshll.u32 %v4977_v1, 16 }
  0x55   : > { %4574 = vmatmul.mubr.msk.bf16.vlgmr.msra.gmra.mrb[28].mxu0 %vm256_vm2, %v5203_v59 }
  0x56   : > { %4584 = vmatpush3.bf16.msra.mxu0 %v1129_v18  ;;  %4585 = vmatprep.mubr.msk.bf16.mxu0 %vm5023_vm1, %v5022_v2 }
  0x57   : > { %4592 = vmatmul.mubr.msk.bf16.vlgmr.msra.gmra.mrb[32].mxu1 %vm256_vm2, %v5270_v19  ;;  %4595 = vmatprep.subr.bf16.mxu0 %v5022_v2 }
  0x58   : > { %4602 = vmatpush3.bf16.msra.mxu1 %v1289_v20  ;;  %4603 = vmatprep.mubr.msk.bf16.mxu1 %vm5023_vm1, %v5022_v2  ;;  %v4232_v20 = vld [vmem:[%s5911_s1 + $0x2] sm:$0x3] }
  0x59   : > { %4613 = vmatprep.subr.bf16.mxu1 %v5022_v2  ;;  %v2175_v24 = vsel %vm260_vm0, %v4232_v20, 0 }
  0x5d   : > { %4586 = vmatmul.mubr.msk.bf16.vlgmr.msra.gmra.mrb[32].mxu0 %vm256_vm2, %v5287_v25 }
  0x5e   : > { %4596 = vmatpush3.bf16.msra.mxu0 %v1245_v27  ;;  %4597 = vmatprep.mubr.msk.bf16.mxu0 %vm5023_vm1, %v5022_v2  ;;  %v4241_v27 = vld [vmem:[%s5911_s1 + $0xa] sm:$0x3] }
  0x5f   : > { %4604 = vmatmul.mubr.msk.bf16.vlgmr.msra.gmra.mrb[36].mxu1 %vm256_vm2, %v5124_v21  ;;  %4607 = vmatprep.subr.bf16.mxu0 %v5022_v2  ;;  %v5312_v21 = vld [vmem:[%s5102_s30 + $0x30] sm:$0xff]   ;;  %v2405_v30 = vsel %vm260_vm0, %v4241_v27, 0 }
  0x60   : > { %4614 = vmatpush3.bf16.msra.mxu1 %v1381_v28  ;;  %4615 = vmatprep.mubr.msk.bf16.mxu1 %vm5023_vm1, %v5022_v2  ;;  %v1581_v35 = vshll.u32 %v5312_v21, 16  ;;  %v1579_v38 = vshrl.u32 %v5312_v21, 16  ;;  %v1640_v53 = vrot.slane %v5312_v21, 1  ;;  %v2264_v28 = vsel %vm260_vm0, %v4235_v26, 0 }
  0x61   : > { %4625 = vmatprep.subr.bf16.mxu1 %v5022_v2 }
  0x62   : > { %v1583_v39 = vrot.slane %v1581_v35, 1  ;;  %v5390_v56 = vsel %vm353_vm4, %v1640_v53, %v1641_v54  ;;  %v2509_v35 = vshrl.u32 %v5500_v29, 16  ;;  %v4262_v54 = vld [vmem:[%s5911_s1 + $0x8] sm:$0x3] }
  0x64   : > { %v1584_v43 = vor.u32 %v1583_v39, %v1579_v38  ;;  %v2524_v38 = vsel %vm260_vm0, %v4246_v33, 0  ;;  %v4243_v39 = vld [vmem:[%s5911_s1 + $0xc] sm:$0x3] }
  0x65   : > { %4598 = vmatmul.mubr.msk.bf16.vlgmr.msra.gmra.mrb[36].mxu0 %vm256_vm2, %v5169_v50  ;;  %v4212_v50 = vld [vmem:[%s5911_s1 + $0x4] sm:$0x3] }
  0x66   : > { %4608 = vmatpush3.bf16.msra.mxu0 %v1334_v31  ;;  %4609 = vmatprep.mubr.msk.bf16.mxu0 %vm5023_vm1, %v5022_v2  ;;  %v5354_v47 = vsel %vm243_vm3, %v1584_v43, %v1588_v44  ;;  %v1799_v52 = vsel %vm260_vm0, %v4212_v50, 0  ;;  %v4239_v31 = vld [vmem:[%s5911_s1 + $0x8] sm:$0x3]  ;;  %v2460_v43 = vsel %vm260_vm0, %v4243_v39, 0  ;;  %v2570_v50 = vrot.slane %v5500_v29, 1 }
  0x67   : > { %4616 = vmatmul.mubr.msk.bf16.vlgmr.msra.gmra.mrb[40].mxu1 %vm256_vm2, %v5245_v7  ;;  %4619 = vmatprep.subr.bf16.mxu0 %v5022_v2  ;;  %v2358_v34 = vsel %vm260_vm0, %v4239_v31, 0 }
  0x68   : > { %4626 = vmatpush3.bf16.msra.mxu1 %v1475_v32  ;;  %4627 = vmatprep.mubr.msk.bf16.mxu1 %vm5023_vm1, %v5022_v2  ;;  %v2511_v32 = vshll.u32 %v5500_v29, 16 }
  0x69   : > { %4637 = vmatprep.subr.bf16.mxu1 %v5022_v2 }
  0x6a   : > { %v2513_v36 = vrot.slane %v2511_v32, 1 }
  0x6c   : > { %v2514_v40 = vor.u32 %v2513_v36, %v2509_v35 }
  0x6d   : > { %4610 = vmatmul.mubr.msk.bf16.vlgmr.msra.gmra.mrb[40].mxu0 %vm256_vm2, %v5203_v59  ;;  %v1893_v59 = vsel %vm260_vm0, %v4216_v57, 0  ;;  %v4260_v57 = vld [vmem:[%s5911_s1 + $0x6] sm:$0x3] }
  0x6e   : > { %4620 = vmatpush3.bf16.msra.mxu0 %v1428_v37  ;;  %4621 = vmatprep.mubr.msk.bf16.mxu0 %vm5023_vm1, %v5022_v2 }
  0x6f   : > { %4628 = vmatmul.mubr.msk.bf16.vlgmr.msra.gmra.mrb[44].mxu1 %vm256_vm2, %v5270_v19  ;;  %4631 = vmatprep.subr.bf16.mxu0 %v5022_v2 }
  0x70   : > { %4638 = vmatpush3.bf16.msra.mxu1 %v1594_v41  ;;  %4639 = vmatprep.mubr.msk.bf16.mxu1 %vm5023_vm1, %v5022_v2 }
  0x71   : > { %4649 = vmatprep.subr.bf16.mxu1 %v5022_v2 }
  0x75   : > { %4622 = vmatmul.mubr.msk.bf16.vlgmr.msra.gmra.mrb[44].mxu0 %vm256_vm2, %v5287_v25 }
  0x76   : > { %4632 = vmatpush3.bf16.msra.mxu0 %v1530_v46  ;;  %4633 = vmatprep.mubr.msk.bf16.mxu0 %vm5023_vm1, %v5022_v2  ;;  %v4249_v46 = vld [vmem:[%s5911_s1 + $0x10] sm:$0x3] }
  0x77   : > { %4640 = vmatmul.mubr.msk.bf16.vlgmr.msra.gmra.mrb[48].mxu1 %vm256_vm2, %v5354_v47  ;;  %4643 = vmatprep.subr.bf16.mxu0 %v5022_v2 }
  0x78   : > { %4650 = vmatpush3.bf16.msra.mxu1 %v1710_v48  ;;  %4651 = vmatprep.mubr.msk.bf16.mxu1 %vm5023_vm1, %v5022_v2  ;;  %v2577_v48 = vsel %vm260_vm0, %v4249_v46, 0 }
  0x79   : > { %4661 = vmatprep.subr.bf16.mxu1 %v5022_v2 }
  0x7d   : > { %4634 = vmatmul.mubr.msk.bf16.vlgmr.msra.gmra.mrb[48].mxu0 %vm256_vm2, %v5312_v21 }
  0x7e   : > { %4644 = vmatpush3.bf16.msra.mxu0 %v1647_v51  ;;  %4645 = vmatprep.mubr.msk.bf16.mxu0 %vm5023_vm1, %v5022_v2 }
  0x7f   : > { %4652 = vmatmul.mubr.msk.bf16.vlgmr.msra.gmra.mrb[52].mxu1 %vm256_vm2, %v5287_v25  ;;  %4655 = vmatprep.subr.bf16.mxu0 %v5022_v2  ;;  %v2311_v25 = vsel %vm260_vm0, %v4237_v23, 0 }
  0x80   : > { %4662 = vmatpush3.bf16.msra.mxu1 %v1799_v52  ;;  %4663 = vmatprep.mubr.msk.bf16.mxu1 %vm5023_vm1, %v5022_v2  ;;  %v2637_v52 = vld [vmem:[%s5911_s1] sm:$0x3] }
  0x81   : > { %4673 = vmatprep.subr.bf16.mxu1 %v5022_v2  ;;  %v2684_v55 = vsel %vm260_vm0, %v2637_v52, 0 }
  0x85   : > { %4646 = vmatmul.mubr.msk.bf16.vlgmr.msra.gmra.mrb[52].mxu0 %vm256_vm2, %v5390_v56 }
  0x86   : > { %4656 = vmatpush3.bf16.msra.mxu0 %v1754_v58  ;;  %4657 = vmatprep.mubr.msk.bf16.mxu0 %vm5023_vm1, %v5022_v2  ;;  %v4266_v58 = vld [vmem:[%s5911_s1 + $0xc] sm:$0x3] }
  0x87   : > { %4664 = vmatmul.mubr.msk.bf16.vlgmr.msra.gmra.mrb[56].mxu1 %vm256_vm2, %v5270_v19  ;;  %4667 = vmatprep.subr.bf16.mxu0 %v5022_v2  ;;  %v2053_v19 = vrot.slane %v2051_v13, 1  ;;  %v2925_v60 = vsel %vm260_vm0, %v4266_v58, 0 }
  0x88   : > { %4674 = vmatpush3.bf16.msra.mxu1 %v1893_v59  ;;  %4675 = vmatprep.mubr.msk.bf16.mxu1 %vm5023_vm1, %v5022_v2  ;;  %v2776_v59 = vsel %vm260_vm0, %v4260_v57, 0 }
  0x89   : > { %4685 = vmatprep.subr.bf16.mxu1 %v5022_v2 }
  0x8d   : > { %4658 = vmatmul.mubr.msk.bf16.vlgmr.msra.gmra.mrb[56].mxu0 %vm256_vm2, %v5245_v7  ;;  %v2046_v7 = vshll.u32 %v5433_v4, 16 }
  0x8e   : > { %4668 = vmatpush3.bf16.msra.mxu0 %v1846_v62  ;;  %4669 = vmatprep.mubr.msk.bf16.mxu0 %vm5023_vm1, %v5022_v2  ;;  %v4272_v62 = vld [vmem:[%s5911_s1 + $0x10] sm:$0x3] }
  0x8f   : > { %4676 = vmatmul.mubr.msk.bf16.vlgmr.msra.gmra.mrb[60].mxu1 %vm256_vm2, %v5354_v47  ;;  %4679 = vmatprep.subr.bf16.mxu0 %v5022_v2  ;;  %v2048_v12 = vrot.slane %v2046_v7, 1  ;;  %v3036_v7 = vrot.slane %v4977_v1, 1  ;;  %v4289_v1 = vld [vmem:[%s5911_s1 + $0xc] sm:$0x3] }
  0x90   : > { %4686 = vmatpush3.bf16.msra.mxu1 %v1995_v63  ;;  %4687 = vmatprep.mubr.msk.bf16.mxu1 %vm5023_vm1, %v5022_v2  ;;  %v2870_v63 = vsel %vm260_vm0, %v4264_v61, 0 }
  0x91   : > { %4697 = vmatprep.subr.bf16.mxu1 %v5022_v2  ;;  %v2049_v18 = vor.u32 %v2048_v12, %v2044_v11  ;;  %v3102_v11 = vld [vmem:[%s5911_s1] sm:$0x3]  ;;  %v2989_v12 = vsel %vm260_vm0, %v4269_v5, 0 }
  0x92   : > { %v3149_v14 = vsel %vm260_vm0, %v3102_v11, 0  ;;  %v3390_v11 = vsel %vm260_vm0, %v4289_v1, 0 }
  0x93   : > { %v5475_v22 = vsel %vm243_vm3, %v2049_v18, %v2053_v19 }
  0x95   : > { %4670 = vmatmul.mubr.msk.bf16.vlgmr.msra.gmra.mrb[60].mxu0 %vm256_vm2, %v5312_v21 }
  0x96   : > { %4680 = vmatpush3.bf16.msra.mxu0 %v1940_v3  ;;  %4681 = vmatprep.mubr.msk.bf16.mxu0 %vm5023_vm1, %v5022_v2  ;;  %v3042_v3 = vsel %vm260_vm0, %v4272_v62, 0 }
  0x97   : > { %4688 = vmatmul.mubr.msk.bf16.vlgmr.msra.gmra.mrb[64].mxu1 %vm256_vm2, %v5433_v4  ;;  %4691 = vmatprep.subr.bf16.mxu0 %v5022_v2 }
  0x98   : > { %4698 = vmatpush3.bf16.msra.mxu1 %v2112_v6  ;;  %4699 = vmatprep.mubr.msk.bf16.mxu1 %vm5023_vm1, %v5022_v2  ;;  %v3035_v6 = vrot.slane %v5621_v0, 1 }
  0x99   : > { %4709 = vmatprep.subr.bf16.mxu1 %v5022_v2 }
  0x9a   : > { %v5646_v13 = vsel %vm353_vm4, %v3035_v6, %v3036_v7 }
  0x9d   : > { %4682 = vmatmul.mubr.msk.bf16.vlgmr.msra.gmra.mrb[64].mxu0 %vm256_vm2, %v5390_v56 }
  0x9e   : > { %4692 = vmatpush3.bf16.msra.mxu0 %v2059_v15  ;;  %4693 = vmatprep.mubr.msk.bf16.mxu0 %vm5023_vm1, %v5022_v2 }
  0x9f   : > { %4700 = vmatmul.mubr.msk.bf16.vlgmr.msra.gmra.mrb[68].mxu1 %vm256_vm2, %v5458_v16  ;;  %4703 = vmatprep.subr.bf16.mxu0 %v5022_v2 }
  0xa0   : > { %4710 = vmatpush3.bf16.msra.mxu1 %v2219_v17  ;;  %4711 = vmatprep.mubr.msk.bf16.mxu1 %vm5023_vm1, %v5022_v2  ;;  %v4278_v17 = vld [vmem:[%s5911_s1 + $0x2] sm:$0x3] }
  0xa1   : > { %4721 = vmatprep.subr.bf16.mxu1 %v5022_v2  ;;  %v3105_v23 = vsel %vm260_vm0, %v4278_v17, 0 }
  0xa5   : > { %4694 = vmatmul.mubr.msk.bf16.vlgmr.msra.gmra.mrb[68].mxu0 %vm256_vm2, %v5475_v22 }
  0xa6   : > { %4704 = vmatpush3.bf16.msra.mxu0 %v2175_v24  ;;  %4705 = vmatprep.mubr.msk.bf16.mxu0 %vm5023_vm1, %v5022_v2 }
  0xa7   : > { %4712 = vmatmul.mubr.msk.bf16.vlgmr.msra.gmra.mrb[72].mxu1 %vm256_vm2, %v5312_v21  ;;  %4715 = vmatprep.subr.bf16.mxu0 %v5022_v2  ;;  %v4975_v21 = vld [vmem:[%s5102_s30 + $0x50] ss:$0 sps:$4 sm:$0x11]  }
  0xa8   : > { %4722 = vmatpush3.bf16.msra.mxu1 %v2311_v25  ;;  %4723 = vmatprep.mubr.msk.bf16.mxu1 %vm5023_vm1, %v5022_v2  ;;  %v2516_v37 = vshll.u32 %v4975_v21, 16  ;;  %v2571_v51 = vrot.slane %v4975_v21, 1 }
  0xa9   : > { %4733 = vmatprep.subr.bf16.mxu1 %v5022_v2 }
  0xaa   : > { %v2518_v41 = vrot.slane %v2516_v37, 1  ;;  %v5578_v53 = vsel %vm353_vm4, %v2570_v50, %v2571_v51 }
  0xac   : > { %v5542_v44 = vsel %vm243_vm3, %v2514_v40, %v2518_v41  ;;  %v4285_v41 = vld [vmem:[%s5911_s1 + $0x8] sm:$0x3] }
  0xad   : > { %4706 = vmatmul.mubr.msk.bf16.vlgmr.msra.gmra.mrb[72].mxu0 %vm256_vm2, %v5354_v47  ;;  %v4258_v47 = vld [vmem:[%s5911_s1 + $0x4] sm:$0x3]  ;;  %v3288_v52 = vsel %vm260_vm0, %v4285_v41, 0 }
  0xae   : > { %4716 = vmatpush3.bf16.msra.mxu0 %v2264_v28  ;;  %4717 = vmatprep.mubr.msk.bf16.mxu0 %vm5023_vm1, %v5022_v2  ;;  %v2729_v49 = vsel %vm260_vm0, %v4258_v47, 0  ;;  %v4281_v28 = vld [vmem:[%s5911_s1 + $0x4] sm:$0x3] }
  0xaf   : > { %4724 = vmatmul.mubr.msk.bf16.vlgmr.msra.gmra.mrb[76].mxu1 %vm256_vm2, %v5433_v4  ;;  %4727 = vmatprep.subr.bf16.mxu0 %v5022_v2  ;;  %v3194_v35 = vsel %vm260_vm0, %v4281_v28, 0  ;;  %v4304_v28 = vld [vmem:[%s5911_s1 + $0x4] sm:$0x3] }
  0xb0   : > { %4734 = vmatpush3.bf16.msra.mxu1 %v2405_v30  ;;  %4735 = vmatprep.mubr.msk.bf16.mxu1 %vm5023_vm1, %v5022_v2 }
  0xb1   : > { %4745 = vmatprep.subr.bf16.mxu1 %v5022_v2 }
  0xb5   : > { %4718 = vmatmul.mubr.msk.bf16.vlgmr.msra.gmra.mrb[76].mxu0 %vm256_vm2, %v5390_v56  ;;  %v2823_v56 = vsel %vm260_vm0, %v4262_v54, 0 }
  0xb6   : > { %4728 = vmatpush3.bf16.msra.mxu0 %v2358_v34  ;;  %4729 = vmatprep.mubr.msk.bf16.mxu0 %vm5023_vm1, %v5022_v2 }
  0xb7   : > { %4736 = vmatmul.mubr.msk.bf16.vlgmr.msra.gmra.mrb[80].mxu1 %vm256_vm2, %v5458_v16  ;;  %4739 = vmatprep.subr.bf16.mxu0 %v5022_v2 }
  0xb8   : > { %4746 = vmatpush3.bf16.msra.mxu1 %v2524_v38  ;;  %4747 = vmatprep.mubr.msk.bf16.mxu1 %vm5023_vm1, %v5022_v2  ;;  %v5688_v38 = vld [vmem:[%s5102_s30 + $0x60] sm:$0xff]  }
  0xb9   : > { %4757 = vmatprep.subr.bf16.mxu1 %v5022_v2  ;;  %v3439_v57 = vshrl.u32 %v5688_v38, 16 }
  0xbd   : > { %4730 = vmatmul.mubr.msk.bf16.vlgmr.msra.gmra.mrb[80].mxu0 %vm256_vm2, %v5475_v22 }
  0xbe   : > { %4740 = vmatpush3.bf16.msra.mxu0 %v2460_v43  ;;  %4741 = vmatprep.mubr.msk.bf16.mxu0 %vm5023_vm1, %v5022_v2  ;;  %v5704_v43 = vld [vmem:[%s5102_s30 + $0x68] ss:$0 sps:$4 sm:$0x11]  }
  0xbf   : > { %4748 = vmatmul.mubr.msk.bf16.vlgmr.msra.gmra.mrb[84].mxu1 %vm256_vm2, %v5542_v44  ;;  %4751 = vmatprep.subr.bf16.mxu0 %v5022_v2 }
  0xc0   : > { %4758 = vmatpush3.bf16.msra.mxu1 %v2640_v45  ;;  %4759 = vmatprep.mubr.msk.bf16.mxu1 %vm5023_vm1, %v5022_v2 }
  0xc1   : > { %4769 = vmatprep.subr.bf16.mxu1 %v5022_v2 }
  0xc5   : > { %4742 = vmatmul.mubr.msk.bf16.vlgmr.msra.gmra.mrb[84].mxu0 %vm256_vm2, %v5500_v29 }
  0xc6   : > { %4752 = vmatpush3.bf16.msra.mxu0 %v2577_v48  ;;  %4753 = vmatprep.mubr.msk.bf16.mxu0 %vm5023_vm1, %v5022_v2 }
  0xc7   : > { %4760 = vmatmul.mubr.msk.bf16.vlgmr.msra.gmra.mrb[88].mxu1 %vm256_vm2, %v5475_v22  ;;  %4763 = vmatprep.subr.bf16.mxu0 %v5022_v2  ;;  %v4283_v22 = vld [vmem:[%s5911_s1 + $0x6] sm:$0x3] }
  0xc8   : > { %4770 = vmatpush3.bf16.msra.mxu1 %v2729_v49  ;;  %4771 = vmatprep.mubr.msk.bf16.mxu1 %vm5023_vm1, %v5022_v2  ;;  %v3241_v26 = vsel %vm260_vm0, %v4283_v22, 0  ;;  %v4292_v49 = vld [vmem:[%s5911_s1 + $0xe] sm:$0x3] }
  0xc9   : > { %4781 = vmatprep.subr.bf16.mxu1 %v5022_v2  ;;  %v3454_v62 = vsel %vm260_vm0, %v4292_v49, 0 }
  0xcd   : > { %4754 = vmatmul.mubr.msk.bf16.vlgmr.msra.gmra.mrb[88].mxu0 %vm256_vm2, %v5578_v53 }
  0xce   : > { %4764 = vmatpush3.bf16.msra.mxu0 %v2684_v55  ;;  %4765 = vmatprep.mubr.msk.bf16.mxu0 %vm5023_vm1, %v5022_v2 }
  0xcf   : > { %4772 = vmatmul.mubr.msk.bf16.vlgmr.msra.gmra.mrb[92].mxu1 %vm256_vm2, %v5458_v16  ;;  %4775 = vmatprep.subr.bf16.mxu0 %v5022_v2  ;;  %v2983_v16 = vrot.slane %v2981_v10, 1 }
  0xd0   : > { %4782 = vmatpush3.bf16.msra.mxu1 %v2823_v56  ;;  %4783 = vmatprep.mubr.msk.bf16.mxu1 %vm5023_vm1, %v5022_v2 }
  0xd1   : > { %4793 = vmatprep.subr.bf16.mxu1 %v5022_v2 }
  0xd5   : > { %4766 = vmatmul.mubr.msk.bf16.vlgmr.msra.gmra.mrb[92].mxu0 %vm256_vm2, %v5433_v4  ;;  %v2976_v4 = vshll.u32 %v5621_v0, 16 }
  0xd6   : > { %4776 = vmatpush3.bf16.msra.mxu0 %v2776_v59  ;;  %4777 = vmatprep.mubr.msk.bf16.mxu0 %vm5023_vm1, %v5022_v2  ;;  %v3446_v59 = vshll.u32 %v5704_v43, 16 }
  0xd7   : > { %4784 = vmatmul.mubr.msk.bf16.vlgmr.msra.gmra.mrb[96].mxu1 %vm256_vm2, %v5542_v44  ;;  %4787 = vmatprep.subr.bf16.mxu0 %v5022_v2  ;;  %v2978_v9 = vrot.slane %v2976_v4, 1 }
  0xd8   : > { %4794 = vmatpush3.bf16.msra.mxu1 %v2925_v60  ;;  %4795 = vmatprep.mubr.msk.bf16.mxu1 %vm5023_vm1, %v5022_v2 }
  0xd9   : > { %4805 = vmatprep.subr.bf16.mxu1 %v5022_v2  ;;  %v2979_v15 = vor.u32 %v2978_v9, %v2974_v8  ;;  %v4301_v8 = vld [vmem:[%s5911_s1 + $0x2] sm:$0x3] }
  0xdb   : > { %v5663_v19 = vsel %vm243_vm3, %v2979_v15, %v2983_v16 }
  0xdd   : > { %4778 = vmatmul.mubr.msk.bf16.vlgmr.msra.gmra.mrb[96].mxu0 %vm256_vm2, %v5500_v29 }
  0xde   : > { %4788 = vmatpush3.bf16.msra.mxu0 %v2870_v63  ;;  %4789 = vmatprep.mubr.msk.bf16.mxu0 %vm5023_vm1, %v5022_v2 }
  0xdf   : > { %4796 = vmatmul.mubr.msk.bf16.vlgmr.msra.gmra.mrb[100].mxu1 %vm256_vm2, %v5621_v0  ;;  %4799 = vmatprep.subr.bf16.mxu0 %v5022_v2 }
  0xe0   : > { %4806 = vmatpush3.bf16.msra.mxu1 %v3042_v3  ;;  %4807 = vmatprep.mubr.msk.bf16.mxu1 %vm5023_vm1, %v5022_v2  ;;  %v3448_v3 = vrot.slane %v3446_v59, 1 }
  0xe1   : > { %4817 = vmatprep.subr.bf16.mxu1 %v5022_v2 }
  0xe5   : > { %4790 = vmatmul.mubr.msk.bf16.vlgmr.msra.gmra.mrb[100].mxu0 %vm256_vm2, %v5578_v53 }
  0xe6   : > { %4800 = vmatpush3.bf16.msra.mxu0 %v2989_v12  ;;  %4801 = vmatprep.mubr.msk.bf16.mxu0 %vm5023_vm1, %v5022_v2 }
  0xe7   : > { %4808 = vmatmul.mubr.msk.bf16.vlgmr.msra.gmra.mrb[104].mxu1 %vm256_vm2, %v5646_v13  ;;  %4811 = vmatprep.subr.bf16.mxu0 %v5022_v2 }
  0xe8   : > { %4818 = vmatpush3.bf16.msra.mxu1 %v3149_v14  ;;  %4819 = vmatprep.mubr.msk.bf16.mxu1 %vm5023_vm1, %v5022_v2 }
  0xe9   : > { %v344_v18 = vpop.f32.mrb[0].mxu1  ;;  %4829 = vmatprep.subr.bf16.mxu1 %v5022_v2 }
  0xea   : > { %v4497_v20 = vpop.f32.mrb[1].mxu1 }
  0xeb   : > { %v347_v24 = vpop.f32.mrb[2].mxu1  ;;  %v3570_v20 = vsel %vm260_vm0, %v4301_v8, 0 }
  0xec   : > { %v4498_v25 = vpop.f32.mrb[3].mxu1 }
  0xed   : > { %4802 = vmatmul.mubr.msk.bf16.vlgmr.msra.gmra.mrb[104].mxu0 %vm256_vm2, %v5663_v19 }
  0xee   : > { %4812 = vmatpush3.bf16.msra.mxu0 %v3105_v23  ;;  %4813 = vmatprep.mubr.msk.bf16.mxu0 %vm5023_vm1, %v5022_v2  ;;  %v4295_v23 = vld [vmem:[%s5911_s1 + $0x10] sm:$0x3] }
  0xef   : > { %4820 = vmatmul.mubr.msk.bf16.vlgmr.msra.gmra.mrb[108].mxu1 %vm256_vm2, %v5500_v29  ;;  %4823 = vmatprep.subr.bf16.mxu0 %v5022_v2  ;;  %v4287_v29 = vld [vmem:[%s5911_s1 + $0xa] sm:$0x3] }
  0xf0   : > { %v298_v27 = vpop.f32.mrb[0].mxu0  ;;  %4830 = vmatpush3.bf16.msra.mxu1 %v3241_v26  ;;  %4831 = vmatprep.mubr.msk.bf16.mxu1 %vm5023_vm1, %v5022_v2  ;;  %v3335_v40 = vsel %vm260_vm0, %v4287_v29, 0 }
  0xf1   : > { %v345_v30 = vadd.f32 %v344_v18, %v298_v27  ;;  %v4491_v31 = vpop.f32.mrb[1].mxu0  ;;  %4841 = vmatprep.subr.bf16.mxu1 %v5022_v2 }
  0xf2   : > { %v301_v21 = vpop.f32.mrb[2].mxu0  ;;  %v453_v32 = vpop.f32.mrb[4].mxu1 }
  0xf3   : > { %v348_v33 = vadd.f32 %v347_v24, %v301_v21  ;;  %v4492_v34 = vpop.f32.mrb[3].mxu0  ;;  %v4509_v36 = vpop.f32.mrb[5].mxu1  ;;  %v3507_v21 = vsel %vm260_vm0, %v4295_v23, 0 }
  0xf4   : > { %v456_v37 = vpop.f32.mrb[6].mxu1  ;;  %v3659_v36 = vsel %vm260_vm0, %v4304_v28, 0  ;;  %v4980_v28 = vld [vmem:[%s5102_s30 + $0x6c] sm:$0xff]  }
  0xf5   : > { %4814 = vmatmul.mubr.msk.bf16.vlgmr.msra.gmra.mrb[108].mxu0 %vm256_vm2, %v5542_v44  ;;  %v4510_v39 = vpop.f32.mrb[7].mxu1  ;;  %v3441_v44 = vshll.u32 %v5688_v38, 16 }
  0xf6   : > { %4824 = vmatpush3.bf16.msra.mxu0 %v3194_v35  ;;  %4825 = vmatprep.mubr.msk.bf16.mxu0 %vm5023_vm1, %v5022_v2  ;;  %v3501_v39 = vrot.slane %v5704_v43, 1 }
  0xf7   : > { %4832 = vmatmul.mubr.msk.bf16.vlgmr.msra.gmra.mrb[112].mxu1 %vm256_vm2, %v5621_v0  ;;  %4835 = vmatprep.subr.bf16.mxu0 %v5022_v2  ;;  %v3443_v58 = vrot.slane %v3441_v44, 1 }
  0xf8   : > { %v397_v42 = vpop.f32.mrb[4].mxu0  ;;  %4842 = vmatpush3.bf16.msra.mxu1 %v3335_v40  ;;  %4843 = vmatprep.mubr.msk.bf16.mxu1 %vm5023_vm1, %v5022_v2  ;;  %v5768_v40 = vld [vmem:[%s5912_s2] ss:$0 sm:$0xff] }
  0xf9   : > { %v404_v45 = vadd.f32 %v397_v42, %v345_v30  ;;  %v4503_v46 = vpop.f32.mrb[5].mxu0  ;;  %4853 = vmatprep.subr.bf16.mxu1 %v5022_v2  ;;  %v3567_v42 = vld [vmem:[%s5911_s1] sm:$0x3] }
  0xfa   : > { %v400_v47 = vpop.f32.mrb[6].mxu0  ;;  %v572_v48 = vpop.f32.mrb[8].mxu1 }
  0xfb   : > { %v405_v50 = vadd.f32 %v400_v47, %v348_v33  ;;  %v4504_v51 = vpop.f32.mrb[7].mxu0  ;;  %v460_v54 = vadd.f32 %v453_v32, %v404_v45  ;;  %v4521_v55 = vpop.f32.mrb[9].mxu1  ;;  %v4308_v47 = vld [vmem:[%s5911_s1 + $0x8] sm:$0x3] }
  0xfc   : > { %v575_v56 = vpop.f32.mrb[10].mxu1  ;;  %v3614_v51 = vsel %vm260_vm0, %v3567_v42, 0 }
  0xfd   : > { %4826 = vmatmul.mubr.msk.bf16.vlgmr.msra.gmra.mrb[112].mxu0 %vm256_vm2, %v5578_v53  ;;  %v461_v60 = vadd.f32 %v456_v37, %v405_v50  ;;  %v4522_v61 = vpop.f32.mrb[11].mxu1  ;;  %v3444_v53 = vor.u32 %v3443_v58, %v3439_v57  ;;  %v3500_v37 = vrot.slane %v5688_v38, 1  ;;  %v3753_v58 = vsel %vm260_vm0, %v4308_v47, 0 }
  0xfe   : > { %4836 = vmatpush3.bf16.msra.mxu0 %v3288_v52  ;;  %4837 = vmatprep.mubr.msk.bf16.mxu0 %vm5023_vm1, %v5022_v2 }
  0xff   : > { %4844 = vmatmul.mubr.msk.bf16.vlgmr.msra.gmra.mrb[116].mxu1 %vm256_vm2, %v5646_v13  ;;  %4847 = vmatprep.subr.bf16.mxu0 %v5022_v2  ;;  %v5734_v16 = vsel %vm243_vm3, %v3444_v53, %v3448_v3  ;;  %v5777_v45 = vsel %vm353_vm4, %v3500_v37, %v3501_v39 }
 0x100   : > { %v518_v63 = vpop.f32.mrb[8].mxu0  ;;  %4854 = vmatpush3.bf16.msra.mxu1 %v3454_v62  ;;  %4855 = vmatprep.mubr.msk.bf16.mxu1 %vm5023_vm1, %v5022_v2  ;;  %v4306_v62 = vld [vmem:[%s5911_s1 + $0x6] sm:$0x3] }
 0x101   : > { %v525_v4 = vadd.f32 %v518_v63, %v460_v54  ;;  %v4515_v5 = vpop.f32.mrb[9].mxu0  ;;  %4865 = vmatprep.subr.bf16.mxu1 %v5022_v2 }
 0x102   : > { %v521_v6 = vpop.f32.mrb[10].mxu0  ;;  %v693_v7 = vpop.f32.mrb[12].mxu1 }
 0x103   : > { %v526_v9 = vadd.f32 %v521_v6, %v461_v60  ;;  %v4516_v10 = vpop.f32.mrb[11].mxu0  ;;  %v579_v12 = vadd.f32 %v572_v48, %v525_v4  ;;  %v4533_v14 = vpop.f32.mrb[13].mxu1  ;;  %v4312_v4 = vld [vmem:[%s5911_s1 + $0xc] sm:$0x3] }
 0x104   : > { %v696_v15 = vpop.f32.mrb[14].mxu1  ;;  %v3855_v14 = vsel %vm260_vm0, %v4312_v4, 0 }
 0x105   : > { %4838 = vmatmul.mubr.msk.bf16.vlgmr.msra.gmra.mrb[116].mxu0 %vm256_vm2, %v5663_v19  ;;  %v580_v17 = vadd.f32 %v575_v56, %v526_v9  ;;  %v4534_v18 = vpop.f32.mrb[15].mxu1 }
 0x106   : > { %4848 = vmatpush3.bf16.msra.mxu0 %v3390_v11  ;;  %4849 = vmatprep.mubr.msk.bf16.mxu0 %vm5023_vm1, %v5022_v2 }
 0x107   : > { %4856 = vmatmul.mubr.msk.bf16.vlgmr.msra.gmra.mrb[120].mxu1 %vm256_vm2, %v5734_v16  ;;  %4859 = vmatprep.subr.bf16.mxu0 %v5022_v2 }
 0x108   : > { %v628_v22 = vpop.f32.mrb[12].mxu0  ;;  %4866 = vmatpush3.bf16.msra.mxu1 %v3570_v20  ;;  %4867 = vmatprep.mubr.msk.bf16.mxu1 %vm5023_vm1, %v5022_v2 }
 0x109   : > { %v635_v24 = vadd.f32 %v628_v22, %v579_v12  ;;  %v4527_v25 = vpop.f32.mrb[13].mxu0  ;;  %4877 = vmatprep.subr.bf16.mxu1 %v5022_v2 }
 0x10a   : > { %v631_v26 = vpop.f32.mrb[14].mxu0  ;;  %v816_v27 = vpop.f32.mrb[16].mxu1 }
 0x10b   : > { %v636_v30 = vadd.f32 %v631_v26, %v580_v17  ;;  %v4528_v31 = vpop.f32.mrb[15].mxu0  ;;  %v700_v32 = vadd.f32 %v693_v7, %v635_v24  ;;  %v4545_v29 = vpop.f32.mrb[17].mxu1  ;;  %v3706_v7 = vsel %vm260_vm0, %v4306_v62, 0  ;;  %v4310_v17 = vld [vmem:[%s5911_s1 + $0xa] sm:$0x3] }
 0x10c   : > { %v819_v33 = vpop.f32.mrb[18].mxu1  ;;  %v3800_v25 = vsel %vm260_vm0, %v4310_v17, 0  ;;  %v4981_v31 = vld [vmem:[%s5102_s30 + $0x74] ss:$0 sps:$4 sm:$0x11]  }
 0x10d   : > { %4850 = vmatmul.mubr.msk.bf16.vlgmr.msra.gmra.mrb[120].mxu0 %vm256_vm2, %v5688_v38  ;;  %v701_v34 = vadd.f32 %v696_v15, %v636_v30  ;;  %v4546_v35 = vpop.f32.mrb[19].mxu1 }
 0x10e   : > { %4860 = vmatpush3.bf16.msra.mxu0 %v3507_v21  ;;  %4861 = vmatprep.mubr.msk.bf16.mxu0 %vm5023_vm1, %v5022_v2  ;;  %v4315_v35 = vld [vmem:[%s5911_s1 + $0xe] sm:$0x3] }
 0x10f   : > { %4868 = vmatmul.mubr.msk.bf16.vlgmr.msra.gmra.mrb[124].mxu1 %vm256_vm2, %v5663_v19  ;;  %4871 = vmatprep.subr.bf16.mxu0 %v5022_v2 }
 0x110   : > { %v747_v41 = vpop.f32.mrb[16].mxu0  ;;  %4878 = vmatpush3.bf16.msra.mxu1 %v3659_v36  ;;  %4879 = vmatprep.mubr.msk.bf16.mxu1 %vm5023_vm1, %v5022_v2  ;;  %v3966_v36 = vrot.slane %v4981_v31, 1 }
 0x111   : > { %v754_v43 = vadd.f32 %v747_v41, %v700_v32  ;;  %v4539_v44 = vpop.f32.mrb[17].mxu0  ;;  %4889 = vmatprep.subr.bf16.mxu1 %v5022_v2 }
 0x112   : > { %v750_v19 = vpop.f32.mrb[18].mxu0  ;;  %v905_v46 = vpop.f32.mrb[20].mxu1 }
 0x113   : > { %v762_v48 = vadd.f32 %v5768_v40, %v754_v43  ;;  %v755_v49 = vadd.f32 %v750_v19, %v701_v34  ;;  %v4540_v50 = vpop.f32.mrb[19].mxu0  ;;  %v4557_v52 = vpop.f32.mrb[21].mxu1  ;;  %v3904_v43 = vshrl.u32 %v4980_v28, 16  ;;  %v3911_v19 = vshll.u32 %v4981_v31, 16 }
 0x114   : > { %v908_v54 = vpop.f32.mrb[22].mxu1 }
 0x115   : > { %v764_v55 = vmax.f32 %v762_v48, 0.0  ;;  %v763_v56 = vadd.f32 %v5768_v40, %v755_v49  ;;  %4862 = vmatmul.mubr.msk.bf16.vlgmr.msra.gmra.mrb[124].mxu0 %vm256_vm2, %v5777_v45  ;;  %v4558_v57 = vpop.f32.mrb[23].mxu1  ;;  %v3919_v48 = vsel %vm260_vm0, %v4315_v35, 0 }
 0x116   : > { %4872 = vmatpush3.bf16.msra.mxu0 %v3614_v51  ;;  %4873 = vmatprep.mubr.msk.bf16.mxu0 %vm5023_vm1, %v5022_v2  ;;  %v3913_v57 = vrot.slane %v3911_v19, 1 }
 0x117   : > { %v4327_v59 = vpack.c.bf16 %v764_v55, %v764_v55  ;;  %v765_v60 = vmax.f32 %v763_v56, 0.0  ;;  %4880 = vmatmul.mubr.msk.bf16.vlgmr.msra.gmra.mrb[128].mxu1 %vm256_vm2, %v5646_v13  ;;  %4883 = vmatprep.subr.bf16.mxu0 %v5022_v2 }
 0x118   : > { %v860_v61 = vpop.f32.mrb[20].mxu0  ;;  %4890 = vmatpush3.bf16.msra.mxu1 %v3753_v58  ;;  %4891 = vmatprep.mubr.msk.bf16.mxu1 %vm5023_vm1, %v5022_v2 }
 0x119   : > { %775 = vst.msk [vmem:[%s5791_s6] sm:$0xf] %vm774_vm5, %v4327_v59  ;;  %v4328_v63 = vpack.c.bf16 %v765_v60, %v765_v60  ;;  %v861_v1 = vadd.f32 %v860_v61, %v816_v27  ;;  %v4551_v53 = vpop.f32.mrb[21].mxu0  ;;  %4901 = vmatprep.subr.bf16.mxu1 %v5022_v2 }
 0x11a   : > { %v863_v3 = vpop.f32.mrb[22].mxu0  ;;  %v999_v13 = vpop.f32.mrb[24].mxu1 }
 0x11b   : > { %776 = vst.msk [vmem:[%s5791_s6 + $0x4] sm:$0xf] %vm774_vm5, %v4328_v63  ;;  %v864_v5 = vadd.f32 %v863_v3, %v819_v33  ;;  %v4552_v6 = vpop.f32.mrb[23].mxu0  ;;  %v912_v8 = vadd.f32 %v905_v46, %v861_v1  ;;  %v4569_v9 = vpop.f32.mrb[25].mxu1  ;;  %v3906_v33 = vshll.u32 %v4980_v28, 16 }
 0x11c   : > { %v1002_v10 = vpop.f32.mrb[26].mxu1 }
 0x11d   : > { %4874 = vmatmul.mubr.msk.bf16.vlgmr.msra.gmra.mrb[128].mxu0 %vm256_vm2, %v5621_v0  ;;  %v913_v11 = vadd.f32 %v908_v54, %v864_v5  ;;  %v4570_v12 = vpop.f32.mrb[27].mxu1  ;;  %v3908_v44 = vrot.slane %v3906_v33, 1 }
 0x11e   : > { %4884 = vmatpush3.bf16.msra.mxu0 %v3706_v7  ;;  %4885 = vmatprep.mubr.msk.bf16.mxu0 %vm5023_vm1, %v5022_v2 }
 0x11f   : > { %4892 = vmatmul.mubr.msk.bf16.vlgmr.msra.gmra.mrb[132].mxu1 %vm256_vm2, %v5734_v16  ;;  %4895 = vmatprep.subr.bf16.mxu0 %v5022_v2  ;;  %v4318_v16 = vld [vmem:[%s5911_s1 + $0x10] sm:$0x3]  ;;  %v3909_v56 = vor.u32 %v3908_v44, %v3904_v43 }
 0x120   : > { %v952_v15 = vpop.f32.mrb[24].mxu0  ;;  %4902 = vmatpush3.bf16.msra.mxu1 %v3855_v14  ;;  %4903 = vmatprep.mubr.msk.bf16.mxu1 %vm5023_vm1, %v5022_v2  ;;  %v3972_v29 = vsel %vm260_vm0, %v4318_v16, 0 }
 0x121   : > { %v959_v0 = vadd.f32 %v952_v15, %v912_v8  ;;  %v4563_v18 = vpop.f32.mrb[25].mxu0  ;;  %4913 = vmatprep.subr.bf16.mxu1 %v5022_v2  ;;  %v3914_v62 = vsel %vm243_vm3, %v3909_v56, %v3913_v57 }
 0x122   : > { %v955_v20 = vpop.f32.mrb[26].mxu0  ;;  %v1101_v22 = vpop.f32.mrb[28].mxu1 }
 0x123   : > { %v960_v23 = vadd.f32 %v955_v20, %v913_v11  ;;  %v4564_v24 = vpop.f32.mrb[27].mxu0  ;;  %v1006_v26 = vadd.f32 %v999_v13, %v959_v0  ;;  %v4581_v27 = vpop.f32.mrb[29].mxu1 }
 0x124   : > { %v1104_v30 = vpop.f32.mrb[30].mxu1 }
 0x125   : > { %4886 = vmatmul.mubr.msk.bf16.vlgmr.msra.gmra.mrb[132].mxu0 %vm256_vm2, %v5688_v38  ;;  %v1007_v21 = vadd.f32 %v1002_v10, %v960_v23  ;;  %v4582_v32 = vpop.f32.mrb[31].mxu1  ;;  %v3965_v38 = vrot.slane %v4980_v28, 1 }
 0x126   : > { %4896 = vmatpush3.bf16.msra.mxu0 %v3800_v25  ;;  %4897 = vmatprep.mubr.msk.bf16.mxu0 %vm5023_vm1, %v5022_v2 }
 0x127   : > { %4904 = vmatmul.mubr.msk.bf16.vlgmr.msra.gmra.mrb[136].mxu1 %vm256_vm2, %v4980_v28  ;;  %4907 = vmatprep.subr.bf16.mxu0 %v5022_v2  ;;  %v3967_v52 = vsel %vm353_vm4, %v3965_v38, %v3966_v36 }
 0x128   : > { %v1046_v34 = vpop.f32.mrb[28].mxu0  ;;  %4914 = vmatpush3.bf16.msra.mxu1 %v3972_v29  ;;  %4915 = vmatprep.mubr.msk.bf16.mxu1 %vm5023_vm1, %v5022_v2 }
 0x129   : > { %v1053_v37 = vadd.f32 %v1046_v34, %v1006_v26  ;;  %v4575_v39 = vpop.f32.mrb[29].mxu0 }
 0x12a   : > { %v1049_v41 = vpop.f32.mrb[30].mxu0  ;;  %v1218_v42 = vpop.f32.mrb[32].mxu1 }
 0x12b   : > { %v1054_v46 = vadd.f32 %v1049_v41, %v1007_v21  ;;  %v4576_v47 = vpop.f32.mrb[31].mxu0  ;;  %v1108_v49 = vadd.f32 %v1101_v22, %v1053_v37  ;;  %v4593_v50 = vpop.f32.mrb[33].mxu1 }
 0x12c   : > { %v1221_v51 = vpop.f32.mrb[34].mxu1 }
 0x12d   : > { %4898 = vmatmul.mubr.msk.bf16.vlgmr.msra.gmra.mrb[136].mxu0 %vm256_vm2, %v5777_v45  ;;  %v1109_v54 = vadd.f32 %v1104_v30, %v1054_v46  ;;  %v4594_v55 = vpop.f32.mrb[35].mxu1 }
 0x12e   : > { %4908 = vmatpush3.bf16.msra.mxu0 %v3919_v48  ;;  %4909 = vmatprep.mubr.msk.bf16.mxu0 %vm5023_vm1, %v5022_v2 }
 0x12f   : > { %4916 = vmatmul.mubr.msk.bf16.vlgmr.msra.gmra.mrb[140].mxu1 %vm256_vm2, %v3967_v52 }
 0x130   : > { %v1165_v58 = vpop.f32.mrb[32].mxu0 }
 0x131   : > { %v1172_v59 = vadd.f32 %v1165_v58, %v1108_v49  ;;  %v4587_v60 = vpop.f32.mrb[33].mxu0 }
 0x132   : > { %v1168_v61 = vpop.f32.mrb[34].mxu0  ;;  %v1325_v63 = vpop.f32.mrb[36].mxu1 }
 0x133   : > { %v1225_v1 = vadd.f32 %v1218_v42, %v1172_v59  ;;  %v1173_v53 = vadd.f32 %v1168_v61, %v1109_v54  ;;  %v4588_v45 = vpop.f32.mrb[35].mxu0  ;;  %v4605_v3 = vpop.f32.mrb[37].mxu1 }
 0x134   : > { %v1328_v13 = vpop.f32.mrb[38].mxu1 }
 0x135   : > { %v1227_v4 = vadd.f32 %v5768_v40, %v1225_v1  ;;  %v1226_v2 = vadd.f32 %v1221_v51, %v1173_v53  ;;  %4910 = vmatmul.mubr.msk.bf16.vlgmr.msra.gmra.mrb[140].mxu0 %vm256_vm2, %v3914_v62  ;;  %v4606_v5 = vpop.f32.mrb[39].mxu1 }
 0x137   : > { %v1229_v6 = vmax.f32 %v1227_v4, 0.0  ;;  %v1228_v7 = vadd.f32 %v5768_v40, %v1226_v2 }
 0x138   : > { %v1281_v8 = vpop.f32.mrb[36].mxu0 }
 0x139   : > { %v4329_v9 = vpack.c.bf16 %v1229_v6, %v1229_v6  ;;  %v1230_v10 = vmax.f32 %v1228_v7, 0.0  ;;  %v1326_v11 = vadd.f32 %v1325_v63, %v1281_v8  ;;  %v4599_v12 = vpop.f32.mrb[37].mxu0 }
 0x13a   : > { %v1284_v14 = vpop.f32.mrb[38].mxu0  ;;  %v1417_v15 = vpop.f32.mrb[40].mxu1 }
 0x13b   : > { %4184 = vst.msk [vmem:[%s5791_s6 + $0x8] sm:$0xf] %vm774_vm5, %v4329_v9  ;;  %v4330_v17 = vpack.c.bf16 %v1230_v10, %v1230_v10  ;;  %v1329_v0 = vadd.f32 %v1328_v13, %v1284_v14  ;;  %v4600_v18 = vpop.f32.mrb[39].mxu0  ;;  %v4617_v20 = vpop.f32.mrb[41].mxu1 }
 0x13c   : > { %v1420_v22 = vpop.f32.mrb[42].mxu1 }
 0x13d   : > { %4185 = vst.msk [vmem:[%s5791_s6 + $0xc] sm:$0xf] %vm774_vm5, %v4330_v17  ;;  %v4618_v16 = vpop.f32.mrb[43].mxu1 }
 0x140   : > { %v1370_v23 = vpop.f32.mrb[40].mxu0 }
 0x141   : > { %v1377_v24 = vadd.f32 %v1370_v23, %v1326_v11  ;;  %v4611_v25 = vpop.f32.mrb[41].mxu0 }
 0x142   : > { %v1373_v26 = vpop.f32.mrb[42].mxu0  ;;  %v1511_v27 = vpop.f32.mrb[44].mxu1 }
 0x143   : > { %v1378_v28 = vadd.f32 %v1373_v26, %v1329_v0  ;;  %v4612_v30 = vpop.f32.mrb[43].mxu0  ;;  %v1424_v31 = vadd.f32 %v1417_v15, %v1377_v24  ;;  %v4629_v21 = vpop.f32.mrb[45].mxu1 }
 0x144   : > { %v1514_v32 = vpop.f32.mrb[46].mxu1 }
 0x145   : > { %v1425_v29 = vadd.f32 %v1420_v22, %v1378_v28  ;;  %v4630_v33 = vpop.f32.mrb[47].mxu1 }
 0x148   : > { %v1464_v34 = vpop.f32.mrb[44].mxu0 }
 0x149   : > { %v1471_v35 = vadd.f32 %v1464_v34, %v1424_v31  ;;  %v4623_v38 = vpop.f32.mrb[45].mxu0 }
 0x14a   : > { %v1467_v36 = vpop.f32.mrb[46].mxu0  ;;  %v1630_v37 = vpop.f32.mrb[48].mxu1 }
 0x14b   : > { %v1472_v39 = vadd.f32 %v1467_v36, %v1425_v29  ;;  %v4624_v41 = vpop.f32.mrb[47].mxu0  ;;  %v1518_v42 = vadd.f32 %v1511_v27, %v1471_v35  ;;  %v4641_v43 = vpop.f32.mrb[49].mxu1 }
 0x14c   : > { %v1633_v44 = vpop.f32.mrb[50].mxu1 }
 0x14d   : > { %v1519_v19 = vadd.f32 %v1514_v32, %v1472_v39  ;;  %v4642_v46 = vpop.f32.mrb[51].mxu1 }
 0x150   : > { %v1566_v47 = vpop.f32.mrb[48].mxu0 }
 0x151   : > { %v1573_v48 = vadd.f32 %v1566_v47, %v1518_v42  ;;  %v4635_v49 = vpop.f32.mrb[49].mxu0 }
 0x152   : > { %v1569_v50 = vpop.f32.mrb[50].mxu0  ;;  %v1746_v51 = vpop.f32.mrb[52].mxu1 }
 0x153   : > { %v1574_v52 = vadd.f32 %v1569_v50, %v1519_v19  ;;  %v4636_v54 = vpop.f32.mrb[51].mxu0  ;;  %v1637_v55 = vadd.f32 %v1630_v37, %v1573_v48  ;;  %v4653_v56 = vpop.f32.mrb[53].mxu1 }
 0x154   : > { %v1749_v57 = vpop.f32.mrb[54].mxu1 }
 0x155   : > { %v1638_v58 = vadd.f32 %v1633_v44, %v1574_v52  ;;  %v4654_v59 = vpop.f32.mrb[55].mxu1 }
 0x158   : > { %v1683_v60 = vpop.f32.mrb[52].mxu0 }
 0x159   : > { %v1690_v61 = vadd.f32 %v1683_v60, %v1637_v55  ;;  %v4647_v62 = vpop.f32.mrb[53].mxu0 }
 0x15a   : > { %v1686_v63 = vpop.f32.mrb[54].mxu0  ;;  %v1835_v1 = vpop.f32.mrb[56].mxu1 }
 0x15b   : > { %v1692_v53 = vadd.f32 %v5768_v40, %v1690_v61  ;;  %v1691_v45 = vadd.f32 %v1686_v63, %v1638_v58  ;;  %v4648_v3 = vpop.f32.mrb[55].mxu0  ;;  %v4665_v13 = vpop.f32.mrb[57].mxu1 }
 0x15c   : > { %v1838_v4 = vpop.f32.mrb[58].mxu1 }
 0x15d   : > { %v1694_v2 = vmax.f32 %v1692_v53, 0.0  ;;  %v1693_v5 = vadd.f32 %v5768_v40, %v1691_v45  ;;  %v4666_v6 = vpop.f32.mrb[59].mxu1 }
 0x15f   : > { %v4331_v7 = vpack.c.bf16 %v1694_v2, %v1694_v2  ;;  %v1695_v8 = vmax.f32 %v1693_v5, 0.0 }
 0x160   : > { %v1790_v9 = vpop.f32.mrb[56].mxu0 }
 0x161   : > { %4207 = vst.msk [vmem:[%s5791_s6 + $0x10] sm:$0xf] %vm774_vm5, %v4331_v7  ;;  %v4332_v10 = vpack.c.bf16 %v1695_v8, %v1695_v8  ;;  %v1791_v11 = vadd.f32 %v1790_v9, %v1746_v51  ;;  %v4659_v12 = vpop.f32.mrb[57].mxu0 }
 0x162   : > { %v1793_v14 = vpop.f32.mrb[58].mxu0  ;;  %v1929_v15 = vpop.f32.mrb[60].mxu1 }
 0x163   : > { %4208 = vst.msk [vmem:[%s5791_s6 + $0x14] sm:$0xf] %vm774_vm5, %v4332_v10  ;;  %v1794_v17 = vadd.f32 %v1793_v14, %v1749_v57  ;;  %v4660_v0 = vpop.f32.mrb[59].mxu0  ;;  %v1842_v18 = vadd.f32 %v1835_v1, %v1791_v11  ;;  %v4677_v20 = vpop.f32.mrb[61].mxu1 }
 0x164   : > { %v1932_v22 = vpop.f32.mrb[62].mxu1 }
 0x165   : > { %v1843_v16 = vadd.f32 %v1838_v4, %v1794_v17  ;;  %v4678_v23 = vpop.f32.mrb[63].mxu1 }
 0x168   : > { %v1882_v24 = vpop.f32.mrb[60].mxu0 }
 0x169   : > { %v1889_v25 = vadd.f32 %v1882_v24, %v1842_v18  ;;  %v4671_v26 = vpop.f32.mrb[61].mxu0 }
 0x16a   : > { %v1885_v27 = vpop.f32.mrb[62].mxu0  ;;  %v2031_v28 = vpop.f32.mrb[64].mxu1 }
 0x16b   : > { %v1890_v30 = vadd.f32 %v1885_v27, %v1843_v16  ;;  %v4672_v31 = vpop.f32.mrb[63].mxu0  ;;  %v1936_v21 = vadd.f32 %v1929_v15, %v1889_v25  ;;  %v4689_v32 = vpop.f32.mrb[65].mxu1 }
 0x16c   : > { %v2034_v29 = vpop.f32.mrb[66].mxu1 }
 0x16d   : > { %v1937_v33 = vadd.f32 %v1932_v22, %v1890_v30  ;;  %v4690_v34 = vpop.f32.mrb[67].mxu1 }
 0x170   : > { %v1976_v35 = vpop.f32.mrb[64].mxu0 }
 0x171   : > { %v1983_v38 = vadd.f32 %v1976_v35, %v1936_v21  ;;  %v4683_v36 = vpop.f32.mrb[65].mxu0 }
 0x172   : > { %v1979_v37 = vpop.f32.mrb[66].mxu0  ;;  %v2148_v39 = vpop.f32.mrb[68].mxu1 }
 0x173   : > { %v1984_v41 = vadd.f32 %v1979_v37, %v1937_v33  ;;  %v4684_v42 = vpop.f32.mrb[67].mxu0  ;;  %v2038_v43 = vadd.f32 %v2031_v28, %v1983_v38  ;;  %v4701_v44 = vpop.f32.mrb[69].mxu1 }
 0x174   : > { %v2151_v19 = vpop.f32.mrb[70].mxu1 }
 0x175   : > { %v2039_v46 = vadd.f32 %v2034_v29, %v1984_v41  ;;  %v4702_v47 = vpop.f32.mrb[71].mxu1 }
 0x178   : > { %v2095_v48 = vpop.f32.mrb[68].mxu0 }
 0x179   : > { %v2102_v49 = vadd.f32 %v2095_v48, %v2038_v43  ;;  %v4695_v50 = vpop.f32.mrb[69].mxu0 }
 0x17a   : > { %v2098_v51 = vpop.f32.mrb[70].mxu0  ;;  %v2255_v52 = vpop.f32.mrb[72].mxu1 }
 0x17b   : > { %v2155_v54 = vadd.f32 %v2148_v39, %v2102_v49  ;;  %v2103_v55 = vadd.f32 %v2098_v51, %v2039_v46  ;;  %v4696_v56 = vpop.f32.mrb[71].mxu0  ;;  %v4713_v57 = vpop.f32.mrb[73].mxu1 }
 0x17c   : > { %v2258_v58 = vpop.f32.mrb[74].mxu1 }
 0x17d   : > { %v2157_v59 = vadd.f32 %v5768_v40, %v2155_v54  ;;  %v2156_v60 = vadd.f32 %v2151_v19, %v2103_v55  ;;  %v4714_v61 = vpop.f32.mrb[75].mxu1 }
 0x17f   : > { %v2159_v62 = vmax.f32 %v2157_v59, 0.0  ;;  %v2158_v63 = vadd.f32 %v5768_v40, %v2156_v60 }
 0x180   : > { %v2211_v1 = vpop.f32.mrb[72].mxu0 }
 0x181   : > { %v4333_v53 = vpack.c.bf16 %v2159_v62, %v2159_v62  ;;  %v2160_v45 = vmax.f32 %v2158_v63, 0.0  ;;  %v2256_v3 = vadd.f32 %v2255_v52, %v2211_v1  ;;  %v4707_v13 = vpop.f32.mrb[73].mxu0 }
 0x182   : > { %v2214_v4 = vpop.f32.mrb[74].mxu0  ;;  %v2347_v2 = vpop.f32.mrb[76].mxu1 }
 0x183   : > { %4230 = vst.msk [vmem:[%s5791_s6 + $0x18] sm:$0xf] %vm774_vm5, %v4333_v53  ;;  %v4334_v5 = vpack.c.bf16 %v2160_v45, %v2160_v45  ;;  %v2259_v6 = vadd.f32 %v2258_v58, %v2214_v4  ;;  %v4708_v7 = vpop.f32.mrb[75].mxu0  ;;  %v4725_v8 = vpop.f32.mrb[77].mxu1 }
 0x184   : > { %v2350_v9 = vpop.f32.mrb[78].mxu1 }
 0x185   : > { %4231 = vst.msk [vmem:[%s5791_s6 + $0x1c] sm:$0xf] %vm774_vm5, %v4334_v5  ;;  %v4726_v10 = vpop.f32.mrb[79].mxu1 }
 0x188   : > { %v2300_v11 = vpop.f32.mrb[76].mxu0 }
 0x189   : > { %v2307_v12 = vadd.f32 %v2300_v11, %v2256_v3  ;;  %v4719_v14 = vpop.f32.mrb[77].mxu0 }
 0x18a   : > { %v2303_v15 = vpop.f32.mrb[78].mxu0  ;;  %v2441_v17 = vpop.f32.mrb[80].mxu1 }
 0x18b   : > { %v2308_v0 = vadd.f32 %v2303_v15, %v2259_v6  ;;  %v4720_v18 = vpop.f32.mrb[79].mxu0  ;;  %v2354_v20 = vadd.f32 %v2347_v2, %v2307_v12  ;;  %v4737_v22 = vpop.f32.mrb[81].mxu1 }
 0x18c   : > { %v2444_v16 = vpop.f32.mrb[82].mxu1 }
 0x18d   : > { %v2355_v23 = vadd.f32 %v2350_v9, %v2308_v0  ;;  %v4738_v24 = vpop.f32.mrb[83].mxu1 }
 0x190   : > { %v2394_v25 = vpop.f32.mrb[80].mxu0 }
 0x191   : > { %v2401_v26 = vadd.f32 %v2394_v25, %v2354_v20  ;;  %v4731_v27 = vpop.f32.mrb[81].mxu0 }
 0x192   : > { %v2397_v28 = vpop.f32.mrb[82].mxu0  ;;  %v2560_v30 = vpop.f32.mrb[84].mxu1 }
 0x193   : > { %v2402_v31 = vadd.f32 %v2397_v28, %v2355_v23  ;;  %v4732_v21 = vpop.f32.mrb[83].mxu0  ;;  %v2448_v32 = vadd.f32 %v2441_v17, %v2401_v26  ;;  %v4749_v29 = vpop.f32.mrb[85].mxu1 }
 0x194   : > { %v2563_v33 = vpop.f32.mrb[86].mxu1 }
 0x195   : > { %v2449_v34 = vadd.f32 %v2444_v16, %v2402_v31  ;;  %v4750_v35 = vpop.f32.mrb[87].mxu1 }
 0x198   : > { %v2496_v38 = vpop.f32.mrb[84].mxu0 }
 0x199   : > { %v2503_v36 = vadd.f32 %v2496_v38, %v2448_v32  ;;  %v4743_v37 = vpop.f32.mrb[85].mxu0 }
 0x19a   : > { %v2499_v39 = vpop.f32.mrb[86].mxu0  ;;  %v2676_v41 = vpop.f32.mrb[88].mxu1 }
 0x19b   : > { %v2504_v42 = vadd.f32 %v2499_v39, %v2449_v34  ;;  %v4744_v43 = vpop.f32.mrb[87].mxu0  ;;  %v2567_v44 = vadd.f32 %v2560_v30, %v2503_v36  ;;  %v4761_v19 = vpop.f32.mrb[89].mxu1 }
 0x19c   : > { %v2679_v46 = vpop.f32.mrb[90].mxu1 }
 0x19d   : > { %v2568_v47 = vadd.f32 %v2563_v33, %v2504_v42  ;;  %v4762_v48 = vpop.f32.mrb[91].mxu1 }
 0x1a0   : > { %v2613_v49 = vpop.f32.mrb[88].mxu0 }
 0x1a1   : > { %v2620_v50 = vadd.f32 %v2613_v49, %v2567_v44  ;;  %v4755_v51 = vpop.f32.mrb[89].mxu0 }
 0x1a2   : > { %v2616_v52 = vpop.f32.mrb[90].mxu0  ;;  %v2765_v54 = vpop.f32.mrb[92].mxu1 }
 0x1a3   : > { %v2622_v55 = vadd.f32 %v5768_v40, %v2620_v50  ;;  %v2621_v56 = vadd.f32 %v2616_v52, %v2568_v47  ;;  %v4756_v57 = vpop.f32.mrb[91].mxu0  ;;  %v4773_v58 = vpop.f32.mrb[93].mxu1 }
 0x1a4   : > { %v2768_v59 = vpop.f32.mrb[94].mxu1 }
 0x1a5   : > { %v2624_v60 = vmax.f32 %v2622_v55, 0.0  ;;  %v2623_v61 = vadd.f32 %v5768_v40, %v2621_v56  ;;  %v4774_v62 = vpop.f32.mrb[95].mxu1 }
 0x1a7   : > { %v4335_v63 = vpack.c.bf16 %v2624_v60, %v2624_v60  ;;  %v2625_v1 = vmax.f32 %v2623_v61, 0.0 }
 0x1a8   : > { %v2720_v53 = vpop.f32.mrb[92].mxu0 }
 0x1a9   : > { %4253 = vst.msk [vmem:[%s5791_s6 + $0x20] sm:$0xf] %vm774_vm5, %v4335_v63  ;;  %v4336_v45 = vpack.c.bf16 %v2625_v1, %v2625_v1  ;;  %v2721_v3 = vadd.f32 %v2720_v53, %v2676_v41  ;;  %v4767_v13 = vpop.f32.mrb[93].mxu0 }
 0x1aa   : > { %v2723_v4 = vpop.f32.mrb[94].mxu0  ;;  %v2859_v2 = vpop.f32.mrb[96].mxu1 }
 0x1ab   : > { %4254 = vst.msk [vmem:[%s5791_s6 + $0x24] sm:$0xf] %vm774_vm5, %v4336_v45  ;;  %v2724_v5 = vadd.f32 %v2723_v4, %v2679_v46  ;;  %v4768_v6 = vpop.f32.mrb[95].mxu0  ;;  %v2772_v7 = vadd.f32 %v2765_v54, %v2721_v3  ;;  %v4785_v8 = vpop.f32.mrb[97].mxu1 }
 0x1ac   : > { %v2862_v9 = vpop.f32.mrb[98].mxu1 }
 0x1ad   : > { %v2773_v10 = vadd.f32 %v2768_v59, %v2724_v5  ;;  %v4786_v11 = vpop.f32.mrb[99].mxu1 }
 0x1b0   : > { %v2812_v12 = vpop.f32.mrb[96].mxu0 }
 0x1b1   : > { %v2819_v14 = vadd.f32 %v2812_v12, %v2772_v7  ;;  %v4779_v15 = vpop.f32.mrb[97].mxu0 }
 0x1b2   : > { %v2815_v17 = vpop.f32.mrb[98].mxu0  ;;  %v2961_v0 = vpop.f32.mrb[100].mxu1 }
 0x1b3   : > { %v2820_v18 = vadd.f32 %v2815_v17, %v2773_v10  ;;  %v4780_v20 = vpop.f32.mrb[99].mxu0  ;;  %v2866_v22 = vadd.f32 %v2859_v2, %v2819_v14  ;;  %v4797_v16 = vpop.f32.mrb[101].mxu1 }
 0x1b4   : > { %v2964_v23 = vpop.f32.mrb[102].mxu1 }
 0x1b5   : > { %v2867_v24 = vadd.f32 %v2862_v9, %v2820_v18  ;;  %v4798_v25 = vpop.f32.mrb[103].mxu1 }
 0x1b8   : > { %v2906_v26 = vpop.f32.mrb[100].mxu0 }
 0x1b9   : > { %v2913_v27 = vadd.f32 %v2906_v26, %v2866_v22  ;;  %v4791_v28 = vpop.f32.mrb[101].mxu0 }
 0x1ba   : > { %v2909_v30 = vpop.f32.mrb[102].mxu0  ;;  %v3078_v31 = vpop.f32.mrb[104].mxu1 }
 0x1bb   : > { %v2914_v21 = vadd.f32 %v2909_v30, %v2867_v24  ;;  %v4792_v32 = vpop.f32.mrb[103].mxu0  ;;  %v2968_v29 = vadd.f32 %v2961_v0, %v2913_v27  ;;  %v4809_v33 = vpop.f32.mrb[105].mxu1 }
 0x1bc   : > { %v3081_v34 = vpop.f32.mrb[106].mxu1 }
 0x1bd   : > { %v2969_v35 = vadd.f32 %v2964_v23, %v2914_v21  ;;  %v4810_v38 = vpop.f32.mrb[107].mxu1 }
 0x1c0   : > { %v3025_v36 = vpop.f32.mrb[104].mxu0 }
 0x1c1   : > { %v3032_v37 = vadd.f32 %v3025_v36, %v2968_v29  ;;  %v4803_v39 = vpop.f32.mrb[105].mxu0 }
 0x1c2   : > { %v3028_v41 = vpop.f32.mrb[106].mxu0  ;;  %v3185_v42 = vpop.f32.mrb[108].mxu1 }
 0x1c3   : > { %v3085_v43 = vadd.f32 %v3078_v31, %v3032_v37  ;;  %v3033_v44 = vadd.f32 %v3028_v41, %v2969_v35  ;;  %v4804_v19 = vpop.f32.mrb[107].mxu0  ;;  %v4821_v46 = vpop.f32.mrb[109].mxu1 }
 0x1c4   : > { %v3188_v47 = vpop.f32.mrb[110].mxu1 }
 0x1c5   : > { %v3087_v48 = vadd.f32 %v5768_v40, %v3085_v43  ;;  %v3086_v49 = vadd.f32 %v3081_v34, %v3033_v44  ;;  %v4822_v50 = vpop.f32.mrb[111].mxu1 }
 0x1c7   : > { %v3089_v51 = vmax.f32 %v3087_v48, 0.0  ;;  %v3088_v52 = vadd.f32 %v5768_v40, %v3086_v49 }
 0x1c8   : > { %v3141_v54 = vpop.f32.mrb[108].mxu0 }
 0x1c9   : > { %v4337_v55 = vpack.c.bf16 %v3089_v51, %v3089_v51  ;;  %v3090_v56 = vmax.f32 %v3088_v52, 0.0  ;;  %v3186_v57 = vadd.f32 %v3185_v42, %v3141_v54  ;;  %v4815_v58 = vpop.f32.mrb[109].mxu0 }
 0x1ca   : > { %v3144_v59 = vpop.f32.mrb[110].mxu0  ;;  %v3277_v60 = vpop.f32.mrb[112].mxu1 }
 0x1cb   : > { %4276 = vst.msk [vmem:[%s5791_s6 + $0x28] sm:$0xf] %vm774_vm5, %v4337_v55  ;;  %v4338_v61 = vpack.c.bf16 %v3090_v56, %v3090_v56  ;;  %v3189_v62 = vadd.f32 %v3188_v47, %v3144_v59  ;;  %v4816_v63 = vpop.f32.mrb[111].mxu0  ;;  %v4833_v1 = vpop.f32.mrb[113].mxu1 }
 0x1cc   : > { %v3280_v53 = vpop.f32.mrb[114].mxu1 }
 0x1cd   : > { %4277 = vst.msk [vmem:[%s5791_s6 + $0x2c] sm:$0xf] %vm774_vm5, %v4338_v61  ;;  %v4834_v45 = vpop.f32.mrb[115].mxu1 }
 0x1d0   : > { %v3230_v3 = vpop.f32.mrb[112].mxu0 }
 0x1d1   : > { %v3237_v13 = vadd.f32 %v3230_v3, %v3186_v57  ;;  %v4827_v4 = vpop.f32.mrb[113].mxu0 }
 0x1d2   : > { %v3233_v2 = vpop.f32.mrb[114].mxu0  ;;  %v3371_v5 = vpop.f32.mrb[116].mxu1 }
 0x1d3   : > { %v3238_v6 = vadd.f32 %v3233_v2, %v3189_v62  ;;  %v4828_v7 = vpop.f32.mrb[115].mxu0  ;;  %v3284_v8 = vadd.f32 %v3277_v60, %v3237_v13  ;;  %v4845_v9 = vpop.f32.mrb[117].mxu1 }
 0x1d4   : > { %v3374_v10 = vpop.f32.mrb[118].mxu1 }
 0x1d5   : > { %v3285_v11 = vadd.f32 %v3280_v53, %v3238_v6  ;;  %v4846_v12 = vpop.f32.mrb[119].mxu1 }
 0x1d8   : > { %v3324_v14 = vpop.f32.mrb[116].mxu0 }
 0x1d9   : > { %v3331_v15 = vadd.f32 %v3324_v14, %v3284_v8  ;;  %v4839_v17 = vpop.f32.mrb[117].mxu0 }
 0x1da   : > { %v3327_v0 = vpop.f32.mrb[118].mxu0  ;;  %v3490_v18 = vpop.f32.mrb[120].mxu1 }
 0x1db   : > { %v3332_v20 = vadd.f32 %v3327_v0, %v3285_v11  ;;  %v4840_v22 = vpop.f32.mrb[119].mxu0  ;;  %v3378_v16 = vadd.f32 %v3371_v5, %v3331_v15  ;;  %v4857_v23 = vpop.f32.mrb[121].mxu1 }
 0x1dc   : > { %v3493_v24 = vpop.f32.mrb[122].mxu1 }
 0x1dd   : > { %v3379_v25 = vadd.f32 %v3374_v10, %v3332_v20  ;;  %v4858_v26 = vpop.f32.mrb[123].mxu1 }
 0x1e0   : > { %v3426_v27 = vpop.f32.mrb[120].mxu0 }
 0x1e1   : > { %v3433_v28 = vadd.f32 %v3426_v27, %v3378_v16  ;;  %v4851_v30 = vpop.f32.mrb[121].mxu0 }
 0x1e2   : > { %v3429_v31 = vpop.f32.mrb[122].mxu0  ;;  %v3606_v21 = vpop.f32.mrb[124].mxu1 }
 0x1e3   : > { %v3434_v32 = vadd.f32 %v3429_v31, %v3379_v25  ;;  %v4852_v29 = vpop.f32.mrb[123].mxu0  ;;  %v3497_v33 = vadd.f32 %v3490_v18, %v3433_v28  ;;  %v4869_v34 = vpop.f32.mrb[125].mxu1 }
 0x1e4   : > { %v3609_v35 = vpop.f32.mrb[126].mxu1 }
 0x1e5   : > { %v3498_v38 = vadd.f32 %v3493_v24, %v3434_v32  ;;  %v4870_v36 = vpop.f32.mrb[127].mxu1 }
 0x1e8   : > { %v3543_v37 = vpop.f32.mrb[124].mxu0 }
 0x1e9   : > { %v3550_v39 = vadd.f32 %v3543_v37, %v3497_v33  ;;  %v4863_v41 = vpop.f32.mrb[125].mxu0 }
 0x1ea   : > { %v3546_v42 = vpop.f32.mrb[126].mxu0  ;;  %v3695_v43 = vpop.f32.mrb[128].mxu1 }
 0x1eb   : > { %v3552_v44 = vadd.f32 %v5768_v40, %v3550_v39  ;;  %v3551_v19 = vadd.f32 %v3546_v42, %v3498_v38  ;;  %v4864_v46 = vpop.f32.mrb[127].mxu0  ;;  %v4881_v47 = vpop.f32.mrb[129].mxu1 }
 0x1ec   : > { %v3698_v48 = vpop.f32.mrb[130].mxu1 }
 0x1ed   : > { %v3554_v49 = vmax.f32 %v3552_v44, 0.0  ;;  %v3553_v50 = vadd.f32 %v5768_v40, %v3551_v19  ;;  %v4882_v51 = vpop.f32.mrb[131].mxu1 }
 0x1ef   : > { %v4339_v52 = vpack.c.bf16 %v3554_v49, %v3554_v49  ;;  %v3555_v54 = vmax.f32 %v3553_v50, 0.0 }
 0x1f0   : > { %v3650_v55 = vpop.f32.mrb[128].mxu0 }
 0x1f1   : > { %4299 = vst.msk [vmem:[%s5791_s6 + $0x30] sm:$0xf] %vm774_vm5, %v4339_v52  ;;  %v4340_v56 = vpack.c.bf16 %v3555_v54, %v3555_v54  ;;  %v3651_v57 = vadd.f32 %v3650_v55, %v3606_v21  ;;  %v4875_v58 = vpop.f32.mrb[129].mxu0 }
 0x1f2   : > { %v3653_v59 = vpop.f32.mrb[130].mxu0  ;;  %v3789_v60 = vpop.f32.mrb[132].mxu1 }
 0x1f3   : > { %4300 = vst.msk [vmem:[%s5791_s6 + $0x34] sm:$0xf] %vm774_vm5, %v4340_v56  ;;  %v3654_v61 = vadd.f32 %v3653_v59, %v3609_v35  ;;  %v4876_v62 = vpop.f32.mrb[131].mxu0  ;;  %v3702_v63 = vadd.f32 %v3695_v43, %v3651_v57  ;;  %v4893_v1 = vpop.f32.mrb[133].mxu1 }
 0x1f4   : > { %v3792_v53 = vpop.f32.mrb[134].mxu1 }
 0x1f5   : > { %v3703_v45 = vadd.f32 %v3698_v48, %v3654_v61  ;;  %v4894_v3 = vpop.f32.mrb[135].mxu1 }
 0x1f8   : > { %v3742_v13 = vpop.f32.mrb[132].mxu0 }
 0x1f9   : > { %v3749_v4 = vadd.f32 %v3742_v13, %v3702_v63  ;;  %v4887_v2 = vpop.f32.mrb[133].mxu0 }
 0x1fa   : > { %v3745_v5 = vpop.f32.mrb[134].mxu0  ;;  %v3891_v6 = vpop.f32.mrb[136].mxu1 }
 0x1fb   : > { %v3750_v7 = vadd.f32 %v3745_v5, %v3703_v45  ;;  %v4888_v8 = vpop.f32.mrb[135].mxu0  ;;  %v3796_v9 = vadd.f32 %v3789_v60, %v3749_v4  ;;  %v4905_v10 = vpop.f32.mrb[137].mxu1 }
 0x1fc   : > { %v3894_v11 = vpop.f32.mrb[138].mxu1 }
 0x1fd   : > { %v3797_v12 = vadd.f32 %v3792_v53, %v3750_v7  ;;  %v4906_v14 = vpop.f32.mrb[139].mxu1 }
 0x200   : > { %v3836_v15 = vpop.f32.mrb[136].mxu0 }
 0x201   : > { %v3843_v17 = vadd.f32 %v3836_v15, %v3796_v9  ;;  %v4899_v0 = vpop.f32.mrb[137].mxu0 }
 0x202   : > { %v3839_v18 = vpop.f32.mrb[138].mxu0  ;;  %v4008_v20 = vpop.f32.mrb[140].mxu1 }
 0x203   : > { %v3844_v22 = vadd.f32 %v3839_v18, %v3797_v12  ;;  %v4900_v16 = vpop.f32.mrb[139].mxu0  ;;  %v3898_v23 = vadd.f32 %v3891_v6, %v3843_v17  ;;  %v4917_v24 = vpop.f32.mrb[141].mxu1 }
 0x204   : > { %v4011_v25 = vpop.f32.mrb[142].mxu1 }
 0x205   : > { %v3899_v26 = vadd.f32 %v3894_v11, %v3844_v22  ;;  %v4918_v27 = vpop.f32.mrb[143].mxu1 }
 0x208   : > { %v3955_v28 = vpop.f32.mrb[140].mxu0 }
 0x209   : > { %v3962_v30 = vadd.f32 %v3955_v28, %v3898_v23  ;;  %v4911_v31 = vpop.f32.mrb[141].mxu0 }
 0x20a   : > { %v3958_v21 = vpop.f32.mrb[142].mxu0 }
 0x20b   : > { %v4015_v32 = vadd.f32 %v4008_v20, %v3962_v30  ;;  %v3963_v29 = vadd.f32 %v3958_v21, %v3899_v26  ;;  %v4912_v33 = vpop.f32.mrb[143].mxu0 }
 0x20d   : > { %v4017_v34 = vadd.f32 %v5768_v40, %v4015_v32  ;;  %v4016_v35 = vadd.f32 %v4011_v25, %v3963_v29 }
 0x20f   : > { %v4019_v38 = vmax.f32 %v4017_v34, 0.0  ;;  %v4018_v36 = vadd.f32 %v5768_v40, %v4016_v35 }
 0x211   : > { %v4341_v37 = vpack.c.bf16 %v4019_v38, %v4019_v38  ;;  %v4020_v39 = vmax.f32 %v4018_v36, 0.0 }
 0x213   : > { %4322 = vst.msk [vmem:[%s5791_s6 + $0x38] sm:$0xf] %vm774_vm5, %v4341_v37  ;;  %v4342_v41 = vpack.c.bf16 %v4020_v39, %v4020_v39 }
 0x215   : > { %4323 = vst.msk [vmem:[%s5791_s6 + $0x3c] sm:$0xf] %vm774_vm5, %v4342_v41 }
 0x216 PF: > { %s13_s16 = sadd.s32 1, %s5020_s16   ;;  %s5914_s12 = smov %s5012_s14 }
 0x217   : > { %p10_p7 = scmp.ge.s32.totalorder %s13_s16, 6   ;;  %s5915_s13 = smov %s5016_s15 }
 0x218   : > { %s5916_s14 = smov %s5919_s17  ;;  %s5917_s15 = smov %s5923_s18 }
 0x219   :  { %12 = sbr.rel (!%p10_p7) target bundleno = 3 (0x3), region = 78 }

</bundles_post_ra>
